<compile_context>
chip_gen: v7x
topology: tpu7x:2x2x1
jax: 0.10.0
libtpu: 0.0.40
codegen_flags: <defaults>
</compile_context>

<pallas_src>
import functools
import math

import jax
import jax.numpy as jnp
from jax.experimental import pallas as pl
from jax.experimental.pallas import tpu as pltpu

TILE_N = 256          # dst-row tile  (256 fills the v6e/v7x 256^2 MXU dims)
TILE_K = 256          # src / reduction tile
TILE_F = 256          # feature-dim reduction tile for the projection stage
LANE = 128
VMEM_LIMIT = 48 * 1024 * 1024          # < v7x 64 MiB physical, << v5e/v6e 128 MiB
FUSED_VMEM_BUDGET = 32 * 1024 * 1024   # threshold for the fully fused fast path


def _ceil_to(v, m):
    return ((v + m - 1) // m) * m


def _pad2(a, rows, cols):
    return jnp.pad(a, ((0, rows - a.shape[0]), (0, cols - a.shape[1])))


def _fused_vmem_bytes(NP, FP, HP, CP):
    """Rough VMEM footprint of the fully fused path (bf16 inputs, f32 temps)."""
    return (4 * NP * NP * 2          # adjacencies
            + NP * FP * 2            # x
            + FP * 3 * HP * 2 + 2 * HP * HP * 2 + HP * CP * 2 + CP * 4  # weights
            + NP * LANE * 4          # lamx (lane-padded)
            + NP * CP * 4            # out
            + NP * 3 * HP * 4 + 6 * NP * HP * 4)   # intermediates headroom


# ------------------------------------------------------------ fused small-N kernel
def _fused_kernel(x_ref, al_ref, ah_ref, all_ref, ahh_ref, lamx_ref,
                  wcat_ref, w2_ref, linw_ref, linb_ref, out_ref, *, hp):
    f32, bf16 = jnp.float32, jnp.bfloat16
    # P = x @ [W1L | W1H | WX]   (bf16 operands, f32 accumulation)
    p = jnp.dot(x_ref[...], wcat_ref[...], preferred_element_type=f32)
    # first aggregation + relu (both branches)
    zl = jnp.maximum(jnp.dot(al_ref[...], p[:, :hp].astype(bf16),
                             preferred_element_type=f32), 0.0)
    zh = jnp.maximum(jnp.dot(ah_ref[...], p[:, hp:2 * hp].astype(bf16),
                             preferred_element_type=f32), 0.0)
    # second aggregation + gated W2 (gates already folded into w2_ref)
    xl = jnp.dot(all_ref[...], zl.astype(bf16), preferred_element_type=f32)
    xh = jnp.dot(ahh_ref[...], zh.astype(bf16), preferred_element_type=f32)
    xlh = (jnp.dot(xl.astype(bf16), w2_ref[:hp, :], preferred_element_type=f32)
           + jnp.dot(xh.astype(bf16), w2_ref[hp:, :], preferred_element_type=f32))
    # gated skip branch + relu + classifier
    xx = lamx_ref[...] * p[:, 2 * hp:]
    xf = jnp.maximum(xx + xlh, 0.0)
    out_ref[...] = (jnp.dot(xf.astype(bf16), linw_ref[...],
                            preferred_element_type=f32) + linb_ref[...])


# ----------------------------------------------------------------- tiled kernels
def _proj_kernel(x_ref, w_ref, lamx_ref, p2_ref, xx_ref, acc_ref, *, hp):
    """acc += x @ [W1L|W1H|WX]; last k: split into [h1l|h1h] and lamx*xx (bf16)."""
    k = pl.program_id(1)

    @pl.when(k == 0)
    def _():
        acc_ref[...] = jnp.zeros_like(acc_ref)

    acc_ref[...] += jnp.dot(x_ref[...], w_ref[...],
                            preferred_element_type=jnp.float32)

    @pl.when(k == pl.num_programs(1) - 1)
    def _():
        # read lane-aligned ref slices directly (no [TILE_N, 3H] f32 materialize)
        p2_ref[...] = acc_ref[:, :2 * hp].astype(p2_ref.dtype)
        xx_ref[...] = (lamx_ref[...] * acc_ref[:, 2 * hp:]).astype(xx_ref.dtype)


def _hop1_kernel(al_ref, ah_ref, p2_ref, zl_ref, zh_ref,
                 accl_ref, acch_ref, *, hp, tk):
    """accl += A_l @ h1l ; acch += A_h @ h1h ; relu + store on last src tile.

    p2_ref is the whole, VMEM-resident [NP, 2*HP] activation; slice per k-step.
    """
    k = pl.program_id(1)

    @pl.when(k == 0)
    def _():
        accl_ref[...] = jnp.zeros_like(accl_ref)
        acch_ref[...] = jnp.zeros_like(acch_ref)

    k0 = pl.multiple_of(k * tk, tk)
    accl_ref[...] += jnp.dot(al_ref[...], p2_ref[pl.ds(k0, tk), :hp],
                             preferred_element_type=jnp.float32)
    acch_ref[...] += jnp.dot(ah_ref[...], p2_ref[pl.ds(k0, tk), hp:],
                             preferred_element_type=jnp.float32)

    @pl.when(k == pl.num_programs(1) - 1)
    def _():
        zl_ref[...] = jnp.maximum(accl_ref[...], 0.0).astype(zl_ref.dtype)
        zh_ref[...] = jnp.maximum(acch_ref[...], 0.0).astype(zh_ref.dtype)


def _hop2_kernel(all_ref, ahh_ref, zl_ref, zh_ref, xx_ref,
                 w2_ref, linw_ref, linb_ref, out_ref,
                 accl_ref, acch_ref, *, hp, tk):
    """accl += A_ll @ ZL ; acch += A_hh @ ZH ; last k: gated combine + classifier.

    zl_ref / zh_ref are whole, VMEM-resident [NP, HP] activations.
    """
    k = pl.program_id(1)

    @pl.when(k == 0)
    def _():
        accl_ref[...] = jnp.zeros_like(accl_ref)
        acch_ref[...] = jnp.zeros_like(acch_ref)

    k0 = pl.multiple_of(k * tk, tk)
    accl_ref[...] += jnp.dot(all_ref[...], zl_ref[pl.ds(k0, tk), :],
                             preferred_element_type=jnp.float32)
    acch_ref[...] += jnp.dot(ahh_ref[...], zh_ref[pl.ds(k0, tk), :],
                             preferred_element_type=jnp.float32)

    @pl.when(k == pl.num_programs(1) - 1)
    def _():
        bf16 = jnp.bfloat16
        # [laml*W2L ; lamh*W2H] folded into w2_ref; tiny finalize matmuls.
        xlh = (jnp.dot(accl_ref[...].astype(bf16), w2_ref[:hp, :],
                       preferred_element_type=jnp.float32)
               + jnp.dot(acch_ref[...].astype(bf16), w2_ref[hp:, :],
                         preferred_element_type=jnp.float32))
        xf = jnp.maximum(xx_ref[...].astype(jnp.float32) + xlh, 0.0)
        out_ref[...] = (jnp.dot(xf.astype(bf16), linw_ref[...],
                                preferred_element_type=jnp.float32)
                        + linb_ref[...])


# --------------------------------------------------------------------- wrapper
def ncgcn_forward(x, cc_mask, A_l, A_ll, A_h, A_hh, params, *, force_tiled=False):
    N, F = x.shape
    H = params["W1L"].shape[1]
    C = params["lin_w"].shape[1]

    f32, bf16 = jnp.float32, jnp.bfloat16
    HP = _ceil_to(H, LANE)
    CP = _ceil_to(C, LANE)          # lane-dense classifier slab, sliced outside

    # ---- 2-element softmax gates (parameter glue) ---------------------------
    s1 = jax.nn.softmax(params["lam1"])        # [lamxl, laml]
    s2 = jax.nn.softmax(params["lam2"])        # [lamxh, lamh]

    np_fused = _ceil_to(N, LANE)
    fp_fused = _ceil_to(F, LANE)
    use_fused = (not force_tiled
                 and _fused_vmem_bytes(np_fused, fp_fused, HP, CP)
                 <= FUSED_VMEM_BUDGET)

    if use_fused:
        NP, FP = np_fused, fp_fused
    else:
        NP = _ceil_to(N, max(TILE_N, TILE_K))
        FP = _ceil_to(F, TILE_F)

    # ---- padded / fused / gated parameters (bf16 on every MXU operand) ------
    wcat = jnp.concatenate([_pad2(params["W1L"], FP, HP),
                            _pad2(params["W1H"], FP, HP),
                            _pad2(params["WX"],  FP, HP)], axis=1).astype(bf16)
    w2g = jnp.concatenate([s1[1] * _pad2(params["W2L"], HP, HP),
                           s2[1] * _pad2(params["W2H"], HP, HP)],
                          axis=0).astype(bf16)                    # [2HP, HP]
    lin_w = _pad2(params["lin_w"], HP, CP).astype(bf16)
    lin_b = _pad2(params["lin_b"], 1, CP).astype(f32)

    ccp = jnp.pad(cc_mask.astype(f32), (0, NP - N))
    lamx = (s1[0] * ccp + s2[0] * (1.0 - ccp)).reshape(NP, 1)

    xp = _pad2(x, NP, FP).astype(bf16)
    # Adjacencies dominate HBM traffic -> bf16 over the wire, f32 accumulation.
    # TODO(synk): on v7x, fp8(e4m3) adjacencies would halve the N^2 streams.
    alp = _pad2(A_l, NP, NP).astype(bf16)
    allp = _pad2(A_ll, NP, NP).astype(bf16)
    ahp = _pad2(A_h, NP, NP).astype(bf16)
    ahhp = _pad2(A_hh, NP, NP).astype(bf16)

    # ---- small-N fast path: one fused call, everything resident in VMEM -----
    if use_fused:
        out = pl.pallas_call(
            functools.partial(_fused_kernel, hp=HP),
            out_shape=jax.ShapeDtypeStruct((NP, CP), f32),
            compiler_params=pltpu.CompilerParams(vmem_limit_bytes=VMEM_LIMIT),
            cost_estimate=pl.CostEstimate(
                flops=(2 * NP * FP * 3 * HP + 8 * NP * NP * HP
                       + 4 * NP * HP * HP + 2 * NP * HP * CP),
                transcendentals=0,
                bytes_accessed=(4 * NP * NP * 2 + NP * FP * 2 + FP * 3 * HP * 2
                                + 2 * HP * HP * 2 + HP * CP * 2 + CP * 4
                                + NP * 4 + NP * CP * 4)),
        )(xp, alp, ahp, allp, ahhp, lamx, wcat, w2g, lin_w, lin_b)
        return out[:N, :C]

    # ---- tiled 3-stage path --------------------------------------------------
    # Keep NP//TILE_N >= 2 when possible so the "parallel" dst-row axis feeds
    # both v7x TensorCores.
    cparams = pltpu.CompilerParams(
        dimension_semantics=("parallel", "arbitrary"),
        vmem_limit_bytes=VMEM_LIMIT)

    # stage 1: fused projection  P = x @ [W1L|W1H|WX]
    p2, xx = pl.pallas_call(
        functools.partial(_proj_kernel, hp=HP),
        out_shape=(jax.ShapeDtypeStruct((NP, 2 * HP), bf16),
                   jax.ShapeDtypeStruct((NP, HP), bf16)),
        grid=(NP // TILE_N, FP // TILE_F),
        in_specs=[pl.BlockSpec((TILE_N, TILE_F), lambda i, k: (i, k)),
                  pl.BlockSpec((TILE_F, 3 * HP), lambda i, k: (k, 0)),
                  pl.BlockSpec((TILE_N, 1), lambda i, k: (i, 0))],
        out_specs=(pl.BlockSpec((TILE_N, 2 * HP), lambda i, k: (i, 0)),
                   pl.BlockSpec((TILE_N, HP), lambda i, k: (i, 0))),
        scratch_shapes=[pltpu.VMEM((TILE_N, 3 * HP), f32)],
        compiler_params=cparams,
        cost_estimate=pl.CostEstimate(
            flops=2 * NP * FP * 3 * HP, transcendentals=0,
            bytes_accessed=(NP * FP * 2
                            + (NP // TILE_N) * FP * 3 * HP * 2   # wcat per i-sweep
                            + NP * 4 + NP * 3 * HP * 2)),
    )(xp, wcat, lamx)

    # stage 2: first aggregation + relu, p2 resident in VMEM (fetched once)
    # TODO(synk): for graphs so large that [NP, 2*HP] bf16 exceeds VMEM, fall
    # back to a streamed p2 BlockSpec (dense adjacency is infeasible there anyway).
    zl, zh = pl.pallas_call(
        functools.partial(_hop1_kernel, hp=HP, tk=TILE_K),
        out_shape=(jax.ShapeDtypeStruct((NP, HP), bf16),
                   jax.ShapeDtypeStruct((NP, HP), bf16)),
        grid=(NP // TILE_N, NP // TILE_K),
        in_specs=[pl.BlockSpec((TILE_N, TILE_K), lambda i, k: (i, k)),
                  pl.BlockSpec((TILE_N, TILE_K), lambda i, k: (i, k)),
                  pl.BlockSpec((NP, 2 * HP), lambda i, k: (0, 0))],   # resident
        out_specs=(pl.BlockSpec((TILE_N, HP), lambda i, k: (i, 0)),
                   pl.BlockSpec((TILE_N, HP), lambda i, k: (i, 0))),
        scratch_shapes=[pltpu.VMEM((TILE_N, HP), f32),
                        pltpu.VMEM((TILE_N, HP), f32)],
        compiler_params=cparams,
        cost_estimate=pl.CostEstimate(
            flops=4 * NP * NP * HP, transcendentals=0,
            bytes_accessed=2 * NP * NP * 2 + NP * 2 * HP * 2 + 2 * NP * HP * 2),
    )(alp, ahp, p2)

    # stage 3: second aggregation + gated combine + classifier head
    out = pl.pallas_call(
        functools.partial(_hop2_kernel, hp=HP, tk=TILE_K),
        out_shape=jax.ShapeDtypeStruct((NP, CP), f32),
        grid=(NP // TILE_N, NP // TILE_K),
        in_specs=[pl.BlockSpec((TILE_N, TILE_K), lambda i, k: (i, k)),
                  pl.BlockSpec((TILE_N, TILE_K), lambda i, k: (i, k)),
                  pl.BlockSpec((NP, HP), lambda i, k: (0, 0)),        # resident ZL
                  pl.BlockSpec((NP, HP), lambda i, k: (0, 0)),        # resident ZH
                  pl.BlockSpec((TILE_N, HP), lambda i, k: (i, 0)),
                  pl.BlockSpec((2 * HP, HP), lambda i, k: (0, 0)),
                  pl.BlockSpec((HP, CP), lambda i, k: (0, 0)),
                  pl.BlockSpec((1, CP), lambda i, k: (0, 0))],
        out_specs=pl.BlockSpec((TILE_N, CP), lambda i, k: (i, 0)),
        scratch_shapes=[pltpu.VMEM((TILE_N, HP), f32),
                        pltpu.VMEM((TILE_N, HP), f32)],
        compiler_params=cparams,
        cost_estimate=pl.CostEstimate(
            flops=4 * NP * NP * HP + 4 * NP * HP * HP + 2 * NP * HP * CP,
            transcendentals=0,
            bytes_accessed=(2 * NP * NP * 2 + 3 * NP * HP * 2
                            + 2 * HP * HP * 2 + HP * CP * 2 + CP * 4
                            + NP * CP * 4)),
    )(allp, ahhp, zl, zh, xx, w2g, lin_w, lin_b)

    return out[:N, :C]


# --------------------------------------------------------- graph normalization
def agg_norm(A, mask, mtype, addself=True):
    """Dense equivalent of NCGCN.agg_norm (A is [dst, src])."""
    N = A.shape[0]
    if mtype == "target":
        A_t = A * mask[:, None]
    else:  # 'source'
        A_t = A * mask[None, :]
    eye = jnp.eye(N, dtype=A.dtype)
    A_t = A_t * (1.0 - eye)
    if addself:
        A_t = A_t + eye                         # fill_diag(A_tilde, 1.0)
    d = A_t.sum(axis=1)
    d_isqrt = jnp.where(d > 0.0, d ** -0.5, 0.0)
    return d_isqrt[:, None] * A_t * d_isqrt[None, :]


# --------------------------------------------------------------- param init
def xavier_uniform(key, shape, gain):
    fan_in, fan_out = shape[0], shape[1]
    bound = gain * math.sqrt(6.0 / (fan_in + fan_out))
    return jax.random.uniform(key, shape, jnp.float32, -bound, bound)


def init_params(key, num_features, hidden, num_classes):
    gain = math.sqrt(2.0)  # calculate_gain('relu')
    ks = jax.random.split(key, 7)
    lin_bound = 1.0 / math.sqrt(hidden)
    return {
        "W1L": xavier_uniform(ks[0], (num_features, hidden), gain),
        "W1H": xavier_uniform(ks[1], (num_features, hidden), gain),
        "W2L": xavier_uniform(ks[2], (hidden, hidden), gain),
        "W2H": xavier_uniform(ks[3], (hidden, hidden), gain),
        "WX":  xavier_uniform(ks[4], (num_features, hidden), gain),
        "lam1": jnp.zeros((2,), jnp.float32),   # constant_(lam1, 0)
        "lam2": jnp.zeros((2,), jnp.float32),   # constant_(lam2, 0)
        # lin1 weights stored transposed [hidden, num_classes] for x @ W
        "lin_w": jax.random.uniform(ks[5], (hidden, num_classes), jnp.float32,
                                    -lin_bound, lin_bound),
        "lin_b": jax.random.uniform(ks[6], (1, num_classes), jnp.float32,
                                    -lin_bound, lin_bound),
    }


# ---------------------------------------------------------- pure-JAX reference
def ncgcn_reference(x, cc_mask, A_l, A_ll, A_h, A_hh, params):
    relu = lambda v: jnp.maximum(v, 0.0)
    xl = relu(A_l @ x @ params["W1L"])
    xl = (A_ll @ xl) @ params["W2L"]
    xh = relu(A_h @ x @ params["W1H"])
    xh = (A_hh @ xh) @ params["W2H"]
    xx = x @ params["WX"]
    s1 = jax.nn.softmax(params["lam1"])
    s2 = jax.nn.softmax(params["lam2"])
    lamx = s1[0] * cc_mask + s2[0] * (1.0 - cc_mask)
    xf = relu(lamx[:, None] * xx + s1[1] * xl + s2[1] * xh)
    return xf @ params["lin_w"] + params["lin_b"]


# ----------------------------------------------------------------------- main
if __name__ == "__main__":
    # nodes, features, hidden, classes, edges (small; exercises both paths)
    N, F, H, C, E = 300, 48, 32, 4, 1500

    key = jax.random.PRNGKey(0)
    kx, ksrc, kdst, kcc, kp = jax.random.split(key, 5)

    x = jax.random.normal(kx, (N, F), jnp.float32)
    src = jax.random.randint(ksrc, (E,), 0, N)
    dst = jax.random.randint(kdst, (E,), 0, N)
    edge_index = jnp.stack([src, dst])                       # [2, E]
    cc_mask = (jax.random.uniform(kcc, (N,)) > 0.5).astype(jnp.float32)

    params = init_params(kp, F, H, C)

    # adj_t = SparseTensor(row=edge_index[1], col=edge_index[0]) -> dense A[dst, src]
    # TODO(synk): true sparse aggregation (SparseTensor matmul) has no direct
    # Pallas equivalent here; adjacencies are densified + normalized in JAX.
    A = jnp.zeros((N, N), jnp.float32).at[edge_index[1], edge_index[0]].set(1.0)
    rev = 1.0 - cc_mask
    A_l = agg_norm(A, cc_mask, "target", addself=True)
    A_ll = agg_norm(A, cc_mask, "source", addself=True)
    A_h = agg_norm(A, rev, "target", addself=True)
    A_hh = agg_norm(A, rev, "source", addself=True)

    ref = ncgcn_reference(x, cc_mask, A_l, A_ll, A_h, A_hh, params)

    # bf16 operands on every MXU path (x, W's, adjacencies, activations) with
    # f32 accumulation -> loosened tolerance vs the full-f32 reference.
    ATOL, RTOL = 1e-1, 5e-2

    # default dispatch -> fully fused small-N path
    out = ncgcn_forward(x, cc_mask, A_l, A_ll, A_h, A_hh, params)
    out = jax.block_until_ready(out)
    assert out.shape == (N, C)
    assert jnp.allclose(out, ref, atol=ATOL, rtol=RTOL), "fused path mismatch"

    # also exercise the tiled 3-stage path (what large graphs would run)
    out_t = ncgcn_forward(x, cc_mask, A_l, A_ll, A_h, A_hh, params,
                          force_tiled=True)
    out_t = jax.block_until_ready(out_t)
    assert out_t.shape == (N, C)
    assert jnp.allclose(out_t, ref, atol=ATOL, rtol=RTOL), "tiled path mismatch"

    print("KERNEL_OK")
</pallas_src>

<mosaic_0001>
module attributes {stable_mosaic.version = 11 : i64} {
  func.func @_fused_kernel(%arg0: memref<384x128xbf16, #tpu.memory_space<vmem>>, %arg1: memref<384x384xbf16, #tpu.memory_space<vmem>>, %arg2: memref<384x384xbf16, #tpu.memory_space<vmem>>, %arg3: memref<384x384xbf16, #tpu.memory_space<vmem>>, %arg4: memref<384x384xbf16, #tpu.memory_space<vmem>>, %arg5: memref<384x1xf32, #tpu.memory_space<vmem>>, %arg6: memref<128x384xbf16, #tpu.memory_space<vmem>>, %arg7: memref<256x128xbf16, #tpu.memory_space<vmem>>, %arg8: memref<128x128xbf16, #tpu.memory_space<vmem>>, %arg9: memref<1x128xf32, #tpu.memory_space<vmem>>, %arg10: memref<384x128xf32, #tpu.memory_space<vmem>>) attributes {dimension_semantics = [], scalar_prefetch = 0 : i64, scratch_operands = 0 : i64, tpu.core_type = #tpu.core_type<tc>} {
    %c0 = arith.constant 0 : index
    %c0_0 = arith.constant 0 : index
    %0 = vector.load %arg0[%c0, %c0_0] : memref<384x128xbf16, #tpu.memory_space<vmem>>, vector<384x128xbf16>
    %c0_1 = arith.constant 0 : index
    %c0_2 = arith.constant 0 : index
    %1 = vector.load %arg6[%c0_1, %c0_2] : memref<128x384xbf16, #tpu.memory_space<vmem>>, vector<128x384xbf16>
    %cst = arith.constant dense<0.000000e+00> : vector<384x384xf32>
    %2 = tpu.matmul %0, %1, %cst {dimension_numbers = #tpu.dot_dimension_numbers<[1], [0], [0], [1], [0, 0, 1, 1], [], []>} : vector<384x128xbf16>, vector<128x384xbf16>, vector<384x384xf32> -> vector<384x384xf32>
    %c0_3 = arith.constant 0 : index
    %c0_4 = arith.constant 0 : index
    %3 = vector.load %arg1[%c0_3, %c0_4] : memref<384x384xbf16, #tpu.memory_space<vmem>>, vector<384x384xbf16>
    %4 = vector.extract_strided_slice %2 {offsets = [0, 0], sizes = [384, 128], strides = [1, 1]} : vector<384x384xf32> to vector<384x128xf32>
    %5 = arith.truncf %4 : vector<384x128xf32> to vector<384x128xbf16>
    %cst_5 = arith.constant dense<0.000000e+00> : vector<384x128xf32>
    %6 = tpu.matmul %3, %5, %cst_5 {dimension_numbers = #tpu.dot_dimension_numbers<[1], [0], [0], [1], [0, 0, 1, 1], [], []>} : vector<384x384xbf16>, vector<384x128xbf16>, vector<384x128xf32> -> vector<384x128xf32>
    %cst_6 = arith.constant 0.000000e+00 : f32
    %7 = vector.broadcast %cst_6 : f32 to vector<384x128xf32>
    %8 = arith.maximumf %6, %7 : vector<384x128xf32>
    %c0_7 = arith.constant 0 : index
    %c0_8 = arith.constant 0 : index
    %9 = vector.load %arg2[%c0_7, %c0_8] : memref<384x384xbf16, #tpu.memory_space<vmem>>, vector<384x384xbf16>
    %10 = vector.extract_strided_slice %2 {offsets = [0, 128], sizes = [384, 128], strides = [1, 1]} : vector<384x384xf32> to vector<384x128xf32>
    %11 = arith.truncf %10 : vector<384x128xf32> to vector<384x128xbf16>
    %cst_9 = arith.constant dense<0.000000e+00> : vector<384x128xf32>
    %12 = tpu.matmul %9, %11, %cst_9 {dimension_numbers = #tpu.dot_dimension_numbers<[1], [0], [0], [1], [0, 0, 1, 1], [], []>} : vector<384x384xbf16>, vector<384x128xbf16>, vector<384x128xf32> -> vector<384x128xf32>
    %cst_10 = arith.constant 0.000000e+00 : f32
    %13 = vector.broadcast %cst_10 : f32 to vector<384x128xf32>
    %14 = arith.maximumf %12, %13 : vector<384x128xf32>
    %c0_11 = arith.constant 0 : index
    %c0_12 = arith.constant 0 : index
    %15 = vector.load %arg3[%c0_11, %c0_12] : memref<384x384xbf16, #tpu.memory_space<vmem>>, vector<384x384xbf16>
    %16 = arith.truncf %8 : vector<384x128xf32> to vector<384x128xbf16>
    %cst_13 = arith.constant dense<0.000000e+00> : vector<384x128xf32>
    %17 = tpu.matmul %15, %16, %cst_13 {dimension_numbers = #tpu.dot_dimension_numbers<[1], [0], [0], [1], [0, 0, 1, 1], [], []>} : vector<384x384xbf16>, vector<384x128xbf16>, vector<384x128xf32> -> vector<384x128xf32>
    %c0_14 = arith.constant 0 : index
    %c0_15 = arith.constant 0 : index
    %18 = vector.load %arg4[%c0_14, %c0_15] : memref<384x384xbf16, #tpu.memory_space<vmem>>, vector<384x384xbf16>
    %19 = arith.truncf %14 : vector<384x128xf32> to vector<384x128xbf16>
    %cst_16 = arith.constant dense<0.000000e+00> : vector<384x128xf32>
    %20 = tpu.matmul %18, %19, %cst_16 {dimension_numbers = #tpu.dot_dimension_numbers<[1], [0], [0], [1], [0, 0, 1, 1], [], []>} : vector<384x384xbf16>, vector<384x128xbf16>, vector<384x128xf32> -> vector<384x128xf32>
    %21 = arith.truncf %17 : vector<384x128xf32> to vector<384x128xbf16>
    %c0_17 = arith.constant 0 : index
    %c0_18 = arith.constant 0 : index
    %22 = vector.load %arg7[%c0_17, %c0_18] : memref<256x128xbf16, #tpu.memory_space<vmem>>, vector<128x128xbf16>
    %cst_19 = arith.constant dense<0.000000e+00> : vector<384x128xf32>
    %23 = tpu.matmul %21, %22, %cst_19 {dimension_numbers = #tpu.dot_dimension_numbers<[1], [0], [0], [1], [0, 0, 1, 1], [], []>} : vector<384x128xbf16>, vector<128x128xbf16>, vector<384x128xf32> -> vector<384x128xf32>
    %24 = arith.truncf %20 : vector<384x128xf32> to vector<384x128xbf16>
    %c128 = arith.constant 128 : index
    %c0_20 = arith.constant 0 : index
    %25 = vector.load %arg7[%c128, %c0_20] : memref<256x128xbf16, #tpu.memory_space<vmem>>, vector<128x128xbf16>
    %cst_21 = arith.constant dense<0.000000e+00> : vector<384x128xf32>
    %26 = tpu.matmul %24, %25, %cst_21 {dimension_numbers = #tpu.dot_dimension_numbers<[1], [0], [0], [1], [0, 0, 1, 1], [], []>} : vector<384x128xbf16>, vector<128x128xbf16>, vector<384x128xf32> -> vector<384x128xf32>
    %27 = arith.addf %23, %26 : vector<384x128xf32>
    %c0_22 = arith.constant 0 : index
    %c0_23 = arith.constant 0 : index
    %28 = vector.load %arg5[%c0_22, %c0_23] : memref<384x1xf32, #tpu.memory_space<vmem>>, vector<384x1xf32>
    %29 = vector.extract_strided_slice %2 {offsets = [0, 256], sizes = [384, 128], strides = [1, 1]} : vector<384x384xf32> to vector<384x128xf32>
    %30 = vector.broadcast %28 : vector<384x1xf32> to vector<384x128xf32>
    %31 = arith.mulf %30, %29 : vector<384x128xf32>
    %32 = arith.addf %31, %27 : vector<384x128xf32>
    %cst_24 = arith.constant 0.000000e+00 : f32
    %33 = vector.broadcast %cst_24 : f32 to vector<384x128xf32>
    %34 = arith.maximumf %32, %33 : vector<384x128xf32>
    %35 = arith.truncf %34 : vector<384x128xf32> to vector<384x128xbf16>
    %c0_25 = arith.constant 0 : index
    %c0_26 = arith.constant 0 : index
    %36 = vector.load %arg8[%c0_25, %c0_26] : memref<128x128xbf16, #tpu.memory_space<vmem>>, vector<128x128xbf16>
    %cst_27 = arith.constant dense<0.000000e+00> : vector<384x128xf32>
    %37 = tpu.matmul %35, %36, %cst_27 {dimension_numbers = #tpu.dot_dimension_numbers<[1], [0], [0], [1], [0, 0, 1, 1], [], []>} : vector<384x128xbf16>, vector<128x128xbf16>, vector<384x128xf32> -> vector<384x128xf32>
    %c0_28 = arith.constant 0 : index
    %c0_29 = arith.constant 0 : index
    %38 = vector.load %arg9[%c0_28, %c0_29] : memref<1x128xf32, #tpu.memory_space<vmem>>, vector<1x128xf32>
    %39 = vector.broadcast %38 : vector<1x128xf32> to vector<384x128xf32>
    %40 = arith.addf %37, %39 : vector<384x128xf32>
    %c0_30 = arith.constant 0 : index
    %c0_31 = arith.constant 0 : index
    %41 = vector.load %arg10[%c0_30, %c0_31] : memref<384x128xf32, #tpu.memory_space<vmem>>, vector<384x128xf32>
    tpu.vector_store %arg10[%c0_30, %c0_31], %40 {strides = array<i32>} : memref<384x128xf32, #tpu.memory_space<vmem>>, vector<384x128xf32>,
    return
  }
}

</mosaic_0001>

<bundles_post_ra>
// kernel: tpu_custom_call.1
= control target key start
LH: loop header
LB: loop body
LE: loop exit
PB: predicated region body
PF: predicated region fallthrough
CT: control target
= control target key end

     0   :  { %15 = vsyncpa [#allocation3], 0  ;;  %s9577_s0 = inlined_call_operand.vmem [shape: bf16[384,128], index: 0, kind: input, shape index: {}]   ;;  %s9578_s1 = inlined_call_operand.hbm [shape: bf16[384,384], index: 1, kind: input, shape index: {}]   ;;  %s9579_s2 = inlined_call_operand.hbm [shape: bf16[384,384], index: 2, kind: input, shape index: {}]   ;;  %s9580_s3 = inlined_call_operand.hbm [shape: bf16[384,384], index: 3, kind: input, shape index: {}]   ;;  %s9581_s4 = inlined_call_operand.hbm [shape: bf16[384,384], index: 4, kind: input, shape index: {}]   ;;  %s9582_s5 = inlined_call_operand.vmem [shape: f32[384,1], index: 5, kind: input, shape index: {}]   ;;  %s9583_s6 = inlined_call_operand.vmem [shape: bf16[128,384], index: 6, kind: input, shape index: {}]   ;;  %s9584_s7 = inlined_call_operand.hbm [shape: bf16[256,128], index: 7, kind: input, shape index: {}]   ;;  %s9585_s8 = inlined_call_operand.hbm [shape: bf16[128,128], index: 8, kind: input, shape index: {}]   ;;  %s9586_s9 = inlined_call_operand.vmem [shape: f32[1,128], index: 9, kind: input, shape index: {}]   ;;  %s9587_s10 = inlined_call_operand.hbm [shape: f32[384,128], index: 10, kind: output, shape index: {}]  }
   0x1   :  { %16 = vsyncpa [#allocation6], 0 }
   0x2   :  { %17 = vsyncpa [#allocation9], 0 }
   0x3   :  { %18 = vsyncpa [#allocation12], 0 }
   0x4   :  { %19 = vsyncpa [#allocation4], 0  ;;  %s8148_s13 = smov [#allocation5]   ;;  %s8149_s15 = smov [#allocation8]  }
   0x5   :  { %s39_s14 = sshll.u32 %s8148_s13, 4  ;;  %s63_s16 = sshll.u32 %s8149_s15, 4  ;;  %s40_s14 = int_to_ptr.vmem [resolvable:$true] %s39_s14  ;;  %s8217_s16 = int_to_ptr.vmem [resolvable:$true] %s63_s16 }
   0x6   :  { %s7984_s19 = scalar_lea.hbm %s9579_s2, 9216 }
   0x7   :  { %p7985_p0 = scmp.ne.s32.totalorder %s9579_s2, %s7984_s19  ;;  %p7988_p1 = scmp.lt.u32.totalorder %s7984_s19, %s9579_s2 }
   0x9   :  { %p7990_p2 = pnand %p7988_p1, %p7985_p0 }
   0xb   :  { %7993 = shalt.err (!%p7990_p2)
}
   0xc   :  { %s7994_s24 = scalar_lea.vmem %s40_s14, 9216  ;;  %p7999_p4 = scmp.lt.s32.totalorder %s40_s14, %s40_s14 }
   0xd   :  { %p7995_p3 = scmp.ne.s32.totalorder %s40_s14, %s7994_s24  ;;  %p8000_p5 = scmp.lt.s32.totalorder %s7994_s24, %s7994_s24 }
   0xf   :  { %p8001_p6 = por %p8000_p5, %p7999_p4 }
  0x11   :  { %p8002_p7 = pnand %p8001_p6, %p7995_p3 }
  0x13   :  { %8005 = shalt.err (!%p8002_p7)
}
  0x14   :  { %s8150_s25 = smov 192   ;;  %s8151_s26 = smov 12  }
  0x15   :  { %45 = dma.hbm_to_vmem [thread:$0]  %s9579_s2, 9216, %s40_s14, [#allocation6], %s8150_s25, %s8150_s25, %s8151_s26  }
  0x16   :  { %s8006_s11 = scalar_lea.hbm %s9581_s4, 9216 }
  0x17   :  { %p8007_p8 = scmp.ne.s32.totalorder %s9581_s4, %s8006_s11  ;;  %p8010_p9 = scmp.lt.u32.totalorder %s8006_s11, %s9581_s4 }
  0x19   :  { %p8012_p10 = pnand %p8010_p9, %p8007_p8 }
  0x1b   :  { %8015 = shalt.err (!%p8012_p10)
}
  0x1c   :  { %s8016_s18 = scalar_lea.vmem %s8217_s16, 9216  ;;  %p8021_p12 = scmp.lt.s32.totalorder %s8217_s16, %s8217_s16 }
  0x1d   :  { %p8017_p11 = scmp.ne.s32.totalorder %s8217_s16, %s8016_s18  ;;  %p8022_p13 = scmp.lt.s32.totalorder %s8016_s18, %s8016_s18 }
  0x1f   :  { %p8023_p0 = por %p8022_p13, %p8021_p12 }
  0x21   :  { %p8024_p1 = pnand %p8023_p0, %p8017_p11 }
  0x23   :  { %8027 = shalt.err (!%p8024_p1)
}
  0x24   :  { %69 = dma.hbm_to_vmem [thread:$0]  %s9581_s4, 9216, %s8217_s16, [#allocation9], %s8150_s25, %s8150_s25, %s8151_s26  }
  0x25   :  { %s8152_s19 = smov [#allocation2]   ;;  %s8153_s21 = smov [#allocation7]  }
  0x26   :  { %s27_s20 = sshll.u32 %s8152_s19, 4  ;;  %s51_s22 = sshll.u32 %s8153_s21, 4  ;;  %s28_s20 = int_to_ptr.vmem [resolvable:$true] %s27_s20  ;;  %s8254_s22 = int_to_ptr.vmem [resolvable:$true] %s51_s22 }
  0x27   :  { %s8028_s27 = scalar_lea.hbm %s9578_s1, 9216 }
  0x28   :  { %p8029_p2 = scmp.ne.s32.totalorder %s9578_s1, %s8028_s27  ;;  %p8032_p3 = scmp.lt.u32.totalorder %s8028_s27, %s9578_s1 }
  0x2a   :  { %p8034_p4 = pnand %p8032_p3, %p8029_p2 }
  0x2c   :  { %8037 = shalt.err (!%p8034_p4)
}
  0x2d   :  { %s8038_s4 = scalar_lea.vmem %s28_s20, 9216  ;;  %p8043_p6 = scmp.lt.s32.totalorder %s28_s20, %s28_s20 }
  0x2e   :  { %p8039_p5 = scmp.ne.s32.totalorder %s28_s20, %s8038_s4  ;;  %p8044_p7 = scmp.lt.s32.totalorder %s8038_s4, %s8038_s4 }
  0x30   :  { %p8045_p8 = por %p8044_p7, %p8043_p6 }
  0x32   :  { %p8046_p9 = pnand %p8045_p8, %p8039_p5 }
  0x34   :  { %8049 = shalt.err (!%p8046_p9)
}
  0x35   :  { %33 = dma.hbm_to_vmem [thread:$0]  %s9578_s1, 9216, %s28_s20, [#allocation3], %s8150_s25, %s8150_s25, %s8151_s26  }
  0x36   :  { %s8050_s17 = scalar_lea.hbm %s9580_s3, 9216 }
  0x37   :  { %p8051_p10 = scmp.ne.s32.totalorder %s9580_s3, %s8050_s17  ;;  %p8054_p11 = scmp.lt.u32.totalorder %s8050_s17, %s9580_s3 }
  0x39   :  { %p8056_p12 = pnand %p8054_p11, %p8051_p10 }
  0x3b   :  { %8059 = shalt.err (!%p8056_p12)
}
  0x3c   :  { %s8060_s21 = scalar_lea.vmem %s8254_s22, 9216  ;;  %p8065_p0 = scmp.lt.s32.totalorder %s8254_s22, %s8254_s22 }
  0x3d   :  { %p8061_p13 = scmp.ne.s32.totalorder %s8254_s22, %s8060_s21  ;;  %p8066_p1 = scmp.lt.s32.totalorder %s8060_s21, %s8060_s21 }
  0x3f   :  { %p8067_p2 = por %p8066_p1, %p8065_p0 }
  0x41   :  { %p8068_p3 = pnand %p8067_p2, %p8061_p13 }
  0x43   :  { %8071 = shalt.err (!%p8068_p3)
}
  0x44   :  { %57 = dma.hbm_to_vmem [thread:$0]  %s9580_s3, 9216, %s8254_s22, [#allocation6], %s8150_s25, %s8150_s25, %s8151_s26  }
  0x45   :  { %s8154_s23 = smov [#allocation10]   ;;  %s8072_s29 = scalar_lea.hbm %s9584_s7, 2048 }
  0x46   :  { %s79_s24 = sshll.u32 %s8154_s23, 4  ;;  %p8073_p4 = scmp.ne.s32.totalorder %s9584_s7, %s8072_s29  ;;  %s80_s24 = int_to_ptr.vmem [resolvable:$true] %s79_s24 }
  0x47   :  { %p8076_p5 = scmp.lt.u32.totalorder %s8072_s29, %s9584_s7 }
  0x49   :  { %p8078_p6 = pnand %p8076_p5, %p8073_p4 }
  0x4b   :  { %8081 = shalt.err (!%p8078_p6)
}
  0x4c   :  { %s8082_s12 = scalar_lea.vmem %s80_s24, 2048  ;;  %p8087_p8 = scmp.lt.s32.totalorder %s80_s24, %s80_s24 }
  0x4d   :  { %p8083_p7 = scmp.ne.s32.totalorder %s80_s24, %s8082_s12  ;;  %p8088_p9 = scmp.lt.s32.totalorder %s8082_s12, %s8082_s12 }
  0x4f   :  { %p8089_p10 = por %p8088_p9, %p8087_p8 }
  0x51   :  { %p8090_p11 = pnand %p8089_p10, %p8083_p7 }
  0x53   :  { %8093 = shalt.err (!%p8090_p11)
}
  0x54   :  { %s8155_s3 = smov 64   ;;  %s8156_s25 = smov 4  }
  0x55   :  { %85 = dma.hbm_to_vmem [thread:$0]  %s9584_s7, 2048, %s80_s24, [#allocation9], %s8155_s3, %s8155_s3, %s8156_s25  }
  0x56   :  { %s8157_s13 = smov [#allocation11]   ;;  %s8094_s2 = scalar_lea.hbm %s9585_s8, 1024 }
  0x57   :  { %s91_s15 = sshll.u32 %s8157_s13, 4  ;;  %p8095_p12 = scmp.ne.s32.totalorder %s9585_s8, %s8094_s2  ;;  %s92_s15 = int_to_ptr.vmem [resolvable:$true] %s91_s15 }
  0x58   :  { %p8098_p13 = scmp.lt.u32.totalorder %s8094_s2, %s9585_s8 }
  0x5a   :  { %p8100_p0 = pnand %p8098_p13, %p8095_p12 }
  0x5c   :  { %8103 = shalt.err (!%p8100_p0)
}
  0x5d   :  { %s8104_s20 = scalar_lea.vmem %s92_s15, 1024  ;;  %p8109_p2 = scmp.lt.s32.totalorder %s92_s15, %s92_s15 }
  0x5e   :  { %p8105_p1 = scmp.ne.s32.totalorder %s92_s15, %s8104_s20  ;;  %p8110_p3 = scmp.lt.s32.totalorder %s8104_s20, %s8104_s20 }
  0x60   :  { %p8111_p4 = por %p8110_p3, %p8109_p2 }
  0x62   :  { %p8112_p5 = pnand %p8111_p4, %p8105_p1 }
  0x64   :  { %8115 = shalt.err (!%p8112_p5)
}
  0x65   :  { %97 = dma.hbm_to_vmem [thread:$0]  %s9585_s8, 1024, %s92_s15, [#allocation12], %s8155_s3, %s8155_s3, %s8156_s25  }
  0x66   :  { %8138 = dma.done.wait [#allocation3], 9216  }
  0x67   :  { %8139 = vsyncadd [#allocation3], 4294958080 }
  0x68   :  { %8140 = dma.done.wait [#allocation6], 18432  }
  0x69   :  { %8141 = vsyncadd [#allocation6], 4294948864 }
  0x6a   :  { %8142 = dma.done.wait [#allocation9], 11264  }
  0x6b   :  { %8143 = vsyncadd [#allocation9], 4294956032 }
  0x6c   :  { %8144 = dma.done.wait [#allocation12], 1024  }
  0x6d   :  { %8145 = vsyncadd [#allocation12], 4294966272  ;;  %v9588_v0 = vmov 0   ;;  %v7520_v1 = vld [vmem:[%s9583_s6 + $0x4] ss:$12 sps:$4 sm:$0xff]   ;;  %v7545_v18 = vld [vmem:[%s9577_s0 + $0x8] sm:$0xff]  }
  0x6e   :  { %503 = vmatprep.mubr.bf16.mxu0 %v9588_v0  ;;  %7519 = vset.pattern.permute.xlu1 %v9588_v0  ;;  %v7522_v2 = vld [vmem:[%s9583_s6] ss:$12 sps:$4 sm:$0xff]   ;;  %v7523_v3 = vld [vmem:[%s9583_s6 + $0x1c] ss:$12 sps:$4 sm:$0xff]   ;;  %v7525_v4 = vld [vmem:[%s9583_s6 + $0x18] ss:$12 sps:$4 sm:$0xff]  }
  0x6f   :  { %7518 = vset.pattern.permute.xlu0 %v9588_v0  ;;  %471 = vmatprep.subr.bf16.mxu0 %v7520_v1  ;;  %v7526_v5 = vld [vmem:[%s9583_s6 + $0x34] ss:$12 sps:$4 sm:$0xff]   ;;  %v7528_v6 = vld [vmem:[%s9583_s6 + $0x30] ss:$12 sps:$4 sm:$0xff]   ;;  %v7529_v7 = vld [vmem:[%s9583_s6 + $0x4c] ss:$12 sps:$4 sm:$0xff]  }
  0x70   :  { %472 = vmatpush1.bf16.msra.mxu0 %v7522_v2  ;;  %v7531_v8 = vld [vmem:[%s9583_s6 + $0x48] ss:$12 sps:$4 sm:$0xff]   ;;  %v7544_v9 = vld [vmem:[%s9577_s0] sm:$0xff]   ;;  %v7540_v15 = vld [vmem:[%s9583_s6 + $0x90] ss:$12 sps:$4 sm:$0xff]  }
  0x71   :  { %473 = vmatprep.subr.bf16.mxu0 %v7523_v3  ;;  %v7532_v10 = vld [vmem:[%s9583_s6 + $0x64] ss:$12 sps:$4 sm:$0xff]   ;;  %6960 = vmatprep.mubr.bf16.mxu1 %v7544_v9  ;;  %v7534_v11 = vld [vmem:[%s9583_s6 + $0x60] ss:$12 sps:$4 sm:$0xff]   ;;  %v7535_v12 = vld [vmem:[%s9583_s6 + $0x7c] ss:$12 sps:$4 sm:$0xff]  }
  0x72   :  { %v7537_v13 = vld [vmem:[%s9583_s6 + $0x78] ss:$12 sps:$4 sm:$0xff]   ;;  %v7538_v14 = vld [vmem:[%s9583_s6 + $0x94] ss:$12 sps:$4 sm:$0xff]   ;;  %v7549_v22 = vld [vmem:[%s9577_s0 + $0x28] sm:$0xff]  }
  0x73   :  { %v7541_v16 = vld [vmem:[%s9583_s6 + $0xac] ss:$12 sps:$4 sm:$0xff]   ;;  %v7543_v17 = vld [vmem:[%s9583_s6 + $0xa8] ss:$12 sps:$4 sm:$0xff]   ;;  %v7548_v21 = vld [vmem:[%s9577_s0 + $0x20] sm:$0xff]  }
  0x74   :  { %474 = vmatpush1.bf16.msra.mxu0 %v7525_v4  ;;  %v7546_v19 = vld [vmem:[%s9577_s0 + $0x10] sm:$0xff]   ;;  %v7547_v20 = vld [vmem:[%s9577_s0 + $0x18] sm:$0xff]   ;;  %v7569_v26 = vld [vmem:[%s9583_s6 + $0x20] ss:$12 sps:$4 sm:$0xff]  }
  0x75   :  { %475 = vmatprep.subr.bf16.mxu0 %v7526_v5  ;;  %v7550_v23 = vld [vmem:[%s9577_s0 + $0x30] sm:$0xff]   ;;  %v7551_v25 = vld [vmem:[%s9577_s0 + $0x38] sm:$0xff]   ;;  %v7552_v28 = vld [vmem:[%s9577_s0 + $0x40] sm:$0xff]  }
  0x76   :  { %v7567_v24 = vld [vmem:[%s9583_s6 + $0x8] ss:$12 sps:$4 sm:$0xff]   ;;  %v7570_v27 = vld [vmem:[%s9583_s6 + $0x38] ss:$12 sps:$4 sm:$0xff]   ;;  %v7571_v29 = vld [vmem:[%s9583_s6 + $0x50] ss:$12 sps:$4 sm:$0xff]  }
  0x77   :  { %6944 = vmatprep.subr.bf16.mxu1 %v7567_v24  ;;  %v7572_v30 = vld [vmem:[%s9583_s6 + $0x68] ss:$12 sps:$4 sm:$0xff]   ;;  %v7573_v32 = vld [vmem:[%s9583_s6 + $0x80] ss:$12 sps:$4 sm:$0xff]   ;;  %v7574_v33 = vld [vmem:[%s9583_s6 + $0x98] ss:$12 sps:$4 sm:$0xff]  }
  0x78   :  { %476 = vmatpush1.bf16.msra.mxu0 %v7528_v6  ;;  %6945 = vmatpush3.bf16.msra.mxu1 %v7567_v24  ;;  %v7553_v31 = vld [vmem:[%s9577_s0 + $0x48] sm:$0xff]   ;;  %v7554_v34 = vld [vmem:[%s9577_s0 + $0x50] sm:$0xff]   ;;  %v7555_v36 = vld [vmem:[%s9577_s0 + $0x58] sm:$0xff]  }
  0x79   :  { %477 = vmatprep.subr.bf16.mxu0 %v7529_v7  ;;  %6946 = vmatprep.subr.bf16.mxu1 %v7569_v26  ;;  %v7575_v35 = vld [vmem:[%s9583_s6 + $0xb0] ss:$12 sps:$4 sm:$0xff]   ;;  %v7556_v37 = vld [vmem:[%s9577_s0 + $0x60] sm:$0xff]   ;;  %v7557_v38 = vld [vmem:[%s9577_s0 + $0x68] sm:$0xff]  }
  0x7a   :  { %v7558_v39 = vld [vmem:[%s9577_s0 + $0x70] sm:$0xff]   ;;  %v7559_v40 = vld [vmem:[%s9577_s0 + $0x78] sm:$0xff]   ;;  %v7560_v41 = vld [vmem:[%s9577_s0 + $0x80] sm:$0xff]  }
  0x7b   :  { %v7561_v42 = vld [vmem:[%s9577_s0 + $0x88] sm:$0xff]   ;;  %v7562_v43 = vld [vmem:[%s9577_s0 + $0x90] sm:$0xff]   ;;  %v7563_v44 = vld [vmem:[%s9577_s0 + $0x98] sm:$0xff]  }
  0x7c   :  { %478 = vmatpush1.bf16.msra.mxu0 %v7531_v8  ;;  %6947 = vmatpush3.bf16.msra.mxu1 %v7569_v26  ;;  %v7564_v45 = vld [vmem:[%s9577_s0 + $0xa0] sm:$0xff]   ;;  %v7565_v46 = vld [vmem:[%s9577_s0 + $0xa8] sm:$0xff]   ;;  %v7566_v47 = vld [vmem:[%s9577_s0 + $0xb0] sm:$0xff]  }
  0x7d   :  { %479 = vmatprep.subr.bf16.mxu0 %v7532_v10  ;;  %6948 = vmatprep.subr.bf16.mxu1 %v7570_v27  ;;  %v7568_v48 = vld [vmem:[%s9577_s0 + $0xb8] sm:$0xff]   ;;  %v5509_v49 = vld [vmem:[%s9582_s5 + $0x10] sm:$0xff]  ;;  %v5507_v50 = vld [vmem:[%s9582_s5] sm:$0xff] }
  0x7e   :  { %5567 = vperm.xlu1 %7519, %v5509_v49   ;;  %5557 = vperm.xlu0 %7518, %v5507_v50   ;;  %v5510_v51 = vld [vmem:[%s9582_s5 + $0x18] sm:$0xff]  ;;  %v5508_v52 = vld [vmem:[%s9582_s5 + $0x8] sm:$0xff]  ;;  %v5511_v54 = vld [vmem:[%s9582_s5 + $0x20] sm:$0xff] }
  0x7f   :  { %v5512_v53 = vld [vmem:[%s9582_s5 + $0x28] sm:$0xff]  ;;  %v5514_v55 = vld [vmem:[%s9582_s5 + $0x38] sm:$0xff]  ;;  %v5513_v56 = vld [vmem:[%s9582_s5 + $0x30] sm:$0xff] }
  0x80   :  { %480 = vmatpush1.bf16.msra.mxu0 %v7534_v11  ;;  %6949 = vmatpush3.bf16.msra.mxu1 %v7570_v27  ;;  %v7578_v57 = vld [vmem:[#allocation2 + $0x4] ss:$12 sps:$4 sm:$0xff]   ;;  %v5516_v58 = vld [vmem:[%s9582_s5 + $0x48] sm:$0xff]  ;;  %v5518_v2 = vld [vmem:[%s9582_s5 + $0x58] sm:$0xff] }
  0x81   :  { %481 = vmatprep.subr.bf16.mxu0 %v7535_v12  ;;  %6950 = vmatprep.subr.bf16.mxu1 %v7571_v29  ;;  %v5515_v59 = vld [vmem:[%s9582_s5 + $0x40] sm:$0xff]  ;;  %v5517_v3 = vld [vmem:[%s9582_s5 + $0x50] sm:$0xff]  ;;  %v5520_v5 = vld [vmem:[%s9582_s5 + $0x68] sm:$0xff] }
  0x82   :  { %5572 = vperm.xlu1 %7519, %v5510_v51   ;;  %5562 = vperm.xlu0 %7518, %v5508_v52   ;;  %v5519_v6 = vld [vmem:[%s9582_s5 + $0x60] sm:$0xff]  ;;  %v5522_v12 = vld [vmem:[%s9582_s5 + $0x78] sm:$0xff]  ;;  %v7587_v24 = vld [vmem:[#allocation2 + $0x48] ss:$12 sps:$4 sm:$0xff]  }
  0x83   :  { %v5527_v26 = vld [vmem:[%s9582_s5 + $0xa0] sm:$0xff]  ;;  %v5538_v52 = vld [vmem:[%s9582_s5 + $0xf8] sm:$0xff] }
  0x84   :  { %482 = vmatpush1.bf16.msra.mxu0 %v7537_v13  ;;  %6951 = vmatpush3.bf16.msra.mxu1 %v7571_v29  ;;  %v5521_v13 = vld [vmem:[%s9582_s5 + $0x70] sm:$0xff] }
  0x85   :  { %483 = vmatprep.subr.bf16.mxu0 %v7538_v14  ;;  %6952 = vmatprep.subr.bf16.mxu1 %v7572_v30  ;;  %v7588_v4 = vld [vmem:[#allocation2 + $0x64] ss:$12 sps:$4 sm:$0xff]  }
  0x86   :  { %5582 = vperm.xlu1 %7519, %v5512_v53   ;;  %5577 = vperm.xlu0 %7518, %v5511_v54   ;;  %v5537_v53 = vld [vmem:[%s9582_s5 + $0xf0] sm:$0xff] }
  0x88   :  { %484 = vmatpush1.bf16.msra.mxu0 %v7540_v15  ;;  %6953 = vmatpush3.bf16.msra.mxu1 %v7572_v30  ;;  %v5524_v15 = vld [vmem:[%s9582_s5 + $0x88] sm:$0xff] }
  0x89   :  { %485 = vmatprep.subr.bf16.mxu0 %v7541_v16  ;;  %6954 = vmatprep.subr.bf16.mxu1 %v7573_v32  ;;  %v5523_v16 = vld [vmem:[%s9582_s5 + $0x80] sm:$0xff] }
  0x8a   :  { %5592 = vperm.xlu1 %7519, %v5514_v55   ;;  %5587 = vperm.xlu0 %7518, %v5513_v56   ;;  %v5540_v55 = vld [vmem:[%s9582_s5 + $0x108] sm:$0xff]  ;;  %v5539_v56 = vld [vmem:[%s9582_s5 + $0x100] sm:$0xff] }
  0x8c   :  { %486 = vmatpush1.bf16.msra.mxu0 %v7543_v17  ;;  %6955 = vmatpush3.bf16.msra.mxu1 %v7573_v32  ;;  %v5530_v32 = vld [vmem:[%s9582_s5 + $0xb8] sm:$0xff] }
  0x8d   :  { %6956 = vmatprep.subr.bf16.mxu1 %v7574_v33 }
  0x8e   :  { %5602 = vperm.xlu1 %7519, %v5516_v58   ;;  %5597 = vperm.xlu0 %7518, %v5515_v59  }
  0x8f   :  { %504 = vmatmul.mubr.bf16.vlgmr.msra.gmra.mrb[0].mxu0 %v7544_v9 }
  0x90   :  { %513 = vmatprep.mubr.bf16.mxu0 %v9588_v0  ;;  %6957 = vmatpush3.bf16.msra.mxu1 %v7574_v33  ;;  %v5529_v33 = vld [vmem:[%s9582_s5 + $0xb0] sm:$0xff] }
  0x91   :  { %6958 = vmatprep.subr.bf16.mxu1 %v7575_v35 }
  0x92   :  { %5612 = vperm.xlu1 %7519, %v5518_v2   ;;  %5607 = vperm.xlu0 %7518, %v5517_v3   ;;  %v5541_v2 = vld [vmem:[%s9582_s5 + $0x110] sm:$0xff] }
  0x93   :  { %v7584_v3 = vld [vmem:[#allocation2 + $0x30] ss:$12 sps:$4 sm:$0xff]  }
  0x94   :  { %6959 = vmatpush3.bf16.msra.mxu1 %v7575_v35  ;;  %v5532_v35 = vld [vmem:[%s9582_s5 + $0xc8] sm:$0xff] }
  0x95   :  { %1473 = vmatprep.subr.bf16.mxu1 %v9588_v0 }
  0x96   :  { %5622 = vperm.xlu1 %7519, %v5520_v5   ;;  %5617 = vperm.xlu0 %7518, %v5519_v6   ;;  %v5544_v5 = vld [vmem:[%s9582_s5 + $0x128] sm:$0xff]  ;;  %v5543_v6 = vld [vmem:[%s9582_s5 + $0x120] sm:$0xff] }
  0x97   :  { %514 = vmatmul.mubr.bf16.gmra.mrb[4].mxu0 %v7545_v18  ;;  %6961 = vmatmul.mubr.bf16.vlgmr.msra.gmra.mrb[0].mxu1 %v7545_v18 }
  0x98   :  { %523 = vmatprep.mubr.bf16.mxu0 %v9588_v0  ;;  %6964 = vmatprep.mubr.bf16.mxu1 %v7546_v19 }
  0x9a   :  { %5632 = vperm.xlu1 %7519, %v5522_v12   ;;  %5627 = vperm.xlu0 %7518, %v5521_v13  }
  0x9e   :  { %5642 = vperm.xlu1 %7519, %v5524_v15   ;;  %5637 = vperm.xlu0 %7518, %v5523_v16   ;;  %v5546_v15 = vld [vmem:[%s9582_s5 + $0x138] sm:$0xff]  ;;  %v5545_v16 = vld [vmem:[%s9582_s5 + $0x130] sm:$0xff] }
  0x9f   :  { %524 = vmatmul.mubr.bf16.gmra.mrb[8].mxu0 %v7546_v19  ;;  %6965 = vmatmul.mubr.bf16.gmra.mrb[4].mxu1 %v7547_v20 }
  0xa0   :  { %533 = vmatprep.mubr.bf16.mxu0 %v9588_v0  ;;  %6968 = vmatprep.mubr.bf16.mxu1 %v7548_v21 }
  0xa7   :  { %534 = vmatmul.mubr.bf16.gmra.mrb[12].mxu0 %v7547_v20  ;;  %6969 = vmatmul.mubr.bf16.gmra.mrb[8].mxu1 %v7549_v22 }
  0xa8   :  { %543 = vmatprep.mubr.bf16.mxu0 %v9588_v0  ;;  %6972 = vmatprep.mubr.bf16.mxu1 %v7550_v23 }
  0xaf   :  { %544 = vmatmul.mubr.bf16.gmra.mrb[16].mxu0 %v7548_v21  ;;  %6973 = vmatmul.mubr.bf16.gmra.mrb[12].mxu1 %v7551_v25 }
  0xb0   :  { %553 = vmatprep.mubr.bf16.mxu0 %v9588_v0  ;;  %6976 = vmatprep.mubr.bf16.mxu1 %v7552_v28 }
  0xb7   :  { %554 = vmatmul.mubr.bf16.gmra.mrb[20].mxu0 %v7549_v22  ;;  %6977 = vmatmul.mubr.bf16.gmra.mrb[16].mxu1 %v7553_v31  ;;  %v5526_v22 = vld [vmem:[%s9582_s5 + $0x98] sm:$0xff] }
  0xb8   :  { %563 = vmatprep.mubr.bf16.mxu0 %v9588_v0  ;;  %6980 = vmatprep.mubr.bf16.mxu1 %v7554_v34 }
  0xb9   :  { %5652 = vperm.xlu1 %7519, %v5526_v22   ;;  %v5547_v22 = vld [vmem:[%s9582_s5 + $0x140] sm:$0xff] }
  0xbf   :  { %564 = vmatmul.mubr.bf16.gmra.mrb[24].mxu0 %v7550_v23  ;;  %6981 = vmatmul.mubr.bf16.gmra.mrb[20].mxu1 %v7555_v36  ;;  %v5525_v23 = vld [vmem:[%s9582_s5 + $0x90] sm:$0xff] }
  0xc0   :  { %573 = vmatprep.mubr.bf16.mxu0 %v9588_v0  ;;  %6984 = vmatprep.mubr.bf16.mxu1 %v7556_v37 }
  0xc1   :  { %5647 = vperm.xlu0 %7518, %v5525_v23  }
  0xc5   :  { %5657 = vperm.xlu0 %7518, %v5527_v26  }
  0xc7   :  { %574 = vmatmul.mubr.bf16.gmra.mrb[28].mxu0 %v7551_v25  ;;  %6985 = vmatmul.mubr.bf16.gmra.mrb[24].mxu1 %v7557_v38  ;;  %v5528_v25 = vld [vmem:[%s9582_s5 + $0xa8] sm:$0xff] }
  0xc8   :  { %583 = vmatprep.mubr.bf16.mxu0 %v9588_v0  ;;  %6988 = vmatprep.mubr.bf16.mxu1 %v7558_v39 }
  0xc9   :  { %5662 = vperm.xlu1 %7519, %v5528_v25   ;;  %5667 = vperm.xlu0 %7518, %v5529_v33  }
  0xcd   :  { %5672 = vperm.xlu1 %7519, %v5530_v32   ;;  %v5549_v32 = vld [vmem:[%s9582_s5 + $0x150] sm:$0xff] }
  0xcf   :  { %584 = vmatmul.mubr.bf16.gmra.mrb[32].mxu0 %v7552_v28  ;;  %6989 = vmatmul.mubr.bf16.gmra.mrb[28].mxu1 %v7559_v40 }
  0xd0   :  { %593 = vmatprep.mubr.bf16.mxu0 %v9588_v0  ;;  %6992 = vmatprep.mubr.bf16.mxu1 %v7560_v41 }
  0xd1   :  { %5682 = vperm.xlu1 %7519, %v5532_v35   ;;  %v5552_v35 = vld [vmem:[%s9582_s5 + $0x168] sm:$0xff] }
  0xd7   :  { %594 = vmatmul.mubr.bf16.gmra.mrb[36].mxu0 %v7553_v31  ;;  %6993 = vmatmul.mubr.bf16.gmra.mrb[32].mxu1 %v7561_v42 }
  0xd8   :  { %603 = vmatprep.mubr.bf16.mxu0 %v9588_v0  ;;  %6996 = vmatprep.mubr.bf16.mxu1 %v7562_v43 }
  0xdf   :  { %604 = vmatmul.mubr.bf16.gmra.mrb[40].mxu0 %v7554_v34  ;;  %6997 = vmatmul.mubr.bf16.gmra.mrb[36].mxu1 %v7563_v44 }
  0xe0   :  { %613 = vmatprep.mubr.bf16.mxu0 %v9588_v0  ;;  %7000 = vmatprep.mubr.bf16.mxu1 %v7564_v45 }
  0xe7   :  { %614 = vmatmul.mubr.bf16.gmra.mrb[44].mxu0 %v7555_v36  ;;  %7001 = vmatmul.mubr.bf16.gmra.mrb[40].mxu1 %v7565_v46  ;;  %v5531_v36 = vld [vmem:[%s9582_s5 + $0xc0] sm:$0xff] }
  0xe8   :  { %623 = vmatprep.mubr.bf16.mxu0 %v9588_v0  ;;  %7004 = vmatprep.mubr.bf16.mxu1 %v7566_v47 }
  0xe9   :  { %5677 = vperm.xlu0 %7518, %v5531_v36   ;;  %v5551_v36 = vld [vmem:[%s9582_s5 + $0x160] sm:$0xff] }
  0xef   :  { %624 = vmatmul.mubr.bf16.gmra.mrb[48].mxu0 %v7556_v37  ;;  %7005 = vmatmul.mubr.bf16.gmra.mrb[44].mxu1 %v7568_v48 }
  0xf0   :  { %633 = vmatprep.mubr.bf16.mxu0 %v9588_v0  ;;  %1505 = vmatprep.mubr.bf16.mxu1 %v7578_v57 }
  0xf7   :  { %634 = vmatmul.mubr.bf16.gmra.mrb[52].mxu0 %v7557_v38 }
  0xf8   :  { %643 = vmatprep.mubr.bf16.mxu0 %v9588_v0 }
  0xff   :  { %644 = vmatmul.mubr.bf16.gmra.mrb[56].mxu0 %v7558_v39 }
 0x100   :  { %653 = vmatprep.mubr.bf16.mxu0 %v9588_v0 }
 0x107   :  { %654 = vmatmul.mubr.bf16.gmra.mrb[60].mxu0 %v7559_v40 }
 0x108   :  { %663 = vmatprep.mubr.bf16.mxu0 %v9588_v0 }
 0x10f   :  { %664 = vmatmul.mubr.bf16.gmra.mrb[64].mxu0 %v7560_v41 }
 0x110   :  { %673 = vmatprep.mubr.bf16.mxu0 %v9588_v0 }
 0x117   :  { %674 = vmatmul.mubr.bf16.gmra.mrb[68].mxu0 %v7561_v42  ;;  %v5534_v42 = vld [vmem:[%s9582_s5 + $0xd8] sm:$0xff] }
 0x118   :  { %683 = vmatprep.mubr.bf16.mxu0 %v9588_v0  ;;  %5692 = vperm.xlu1 %7519, %v5534_v42  }
 0x11f   :  { %684 = vmatmul.mubr.bf16.gmra.mrb[72].mxu0 %v7562_v43  ;;  %v5533_v43 = vld [vmem:[%s9582_s5 + $0xd0] sm:$0xff] }
 0x120   :  { %693 = vmatprep.mubr.bf16.mxu0 %v9588_v0  ;;  %5687 = vperm.xlu0 %7518, %v5533_v43  }
 0x127   :  { %694 = vmatmul.mubr.bf16.gmra.mrb[76].mxu0 %v7563_v44  ;;  %v7585_v44 = vld [vmem:[#allocation2 + $0x4c] ss:$12 sps:$4 sm:$0xff]  }
 0x128   :  { %703 = vmatprep.mubr.bf16.mxu0 %v9588_v0 }
 0x12f   :  { %704 = vmatmul.mubr.bf16.gmra.mrb[80].mxu0 %v7564_v45  ;;  %v5536_v45 = vld [vmem:[%s9582_s5 + $0xe8] sm:$0xff] }
 0x130   :  { %713 = vmatprep.mubr.bf16.mxu0 %v9588_v0  ;;  %5702 = vperm.xlu1 %7519, %v5536_v45   ;;  %v5554_v45 = vld [vmem:[%s9582_s5 + $0x178] sm:$0xff] }
 0x134   :  { %5712 = vperm.xlu1 %7519, %v5538_v52  }
 0x137   :  { %714 = vmatmul.mubr.bf16.gmra.mrb[84].mxu0 %v7565_v46  ;;  %v5535_v46 = vld [vmem:[%s9582_s5 + $0xe0] sm:$0xff] }
 0x138   :  { %723 = vmatprep.mubr.bf16.mxu0 %v9588_v0  ;;  %5697 = vperm.xlu0 %7518, %v5535_v46   ;;  %v5553_v46 = vld [vmem:[%s9582_s5 + $0x170] sm:$0xff] }
 0x139   :  { %5722 = vperm.xlu1 %7519, %v5540_v55  }
 0x13c   :  { %5707 = vperm.xlu0 %7518, %v5537_v53  }
 0x13f   :  { %724 = vmatmul.mubr.bf16.gmra.mrb[88].mxu0 %v7566_v47 }
 0x140   :  { %733 = vmatprep.mubr.bf16.mxu0 %v9588_v0  ;;  %5717 = vperm.xlu0 %7518, %v5539_v56   ;;  %v7581_v56 = vld [vmem:[#allocation2 + $0x18] ss:$12 sps:$4 sm:$0xff]  }
 0x144   :  { %5727 = vperm.xlu0 %7518, %v5541_v2  }
 0x147   :  { %734 = vmatmul.mubr.bf16.gmra.mrb[92].mxu0 %v7568_v48 }
 0x148   :  { %5737 = vperm.xlu0 %7518, %v5543_v6  }
 0x14c   :  { %5747 = vperm.xlu0 %7518, %v5545_v16  }
 0x150   :  { %5757 = vperm.xlu0 %7518, %v5547_v22  }
 0x154   :  { %5767 = vperm.xlu0 %7518, %v5549_v32  }
 0x158   :  { %5777 = vperm.xlu0 %7518, %v5551_v36  }
 0x15c   :  { %5787 = vperm.xlu0 %7518, %v5553_v46  }
 0x162   :  { %v505_v60 = vpop.f32.mrb[0].mxu0 }
 0x163   :  { %v8516_v61 = vpop.f32.mrb[1].mxu0 }
 0x164   :  { %v509_v62 = vpop.f32.mrb[2].mxu0 }
 0x165   :  { %v1065_v63 = vpack.c.bf16 %v509_v62, %v505_v60  ;;  %v8518_v1 = vpop.f32.mrb[3].mxu0 }
 0x167   :  { %1474 = vmatpush1.bf16.msra.mxu1 %v1065_v63  ;;  %v5542_v63 = vld [vmem:[%s9582_s5 + $0x118] sm:$0xff] }
 0x168   :  { %1475 = vmatprep.subr.bf16.mxu1 %v9588_v0  ;;  %5732 = vperm.xlu1 %7519, %v5542_v63  }
 0x16a   :  { %v515_v7 = vpop.f32.mrb[4].mxu0  ;;  %v8728_v32 = vpop.f32.mrb[0].mxu1 }
 0x16b   :  { %v8535_v8 = vpop.f32.mrb[5].mxu0  ;;  %9609 = vst [vmem:[#allocation19_spill] sm:$0xff] %v8728_v32  ;;  %v8732_v36 = vpop.f32.mrb[1].mxu1 }
 0x16c   :  { %v519_v9 = vpop.f32.mrb[6].mxu0  ;;  %5742 = vperm.xlu1 %7519, %v5544_v5   ;;  %9610 = vst [vmem:[#allocation20_spill] sm:$0xff] %v8732_v36 }
 0x16d   :  { %v1066_v10 = vpack.c.bf16 %v519_v9, %v515_v7  ;;  %v8537_v11 = vpop.f32.mrb[7].mxu0 }
 0x16f   :  { %1476 = vmatpush1.bf16.msra.mxu1 %v1066_v10 }
 0x170   :  { %1477 = vmatprep.subr.bf16.mxu1 %v9588_v0  ;;  %5752 = vperm.xlu1 %7519, %v5546_v15  }
 0x172   :  { %v525_v17 = vpop.f32.mrb[8].mxu0 }
 0x173   :  { %v8554_v18 = vpop.f32.mrb[9].mxu0 }
 0x174   :  { %v529_v19 = vpop.f32.mrb[10].mxu0 }
 0x175   :  { %v1067_v20 = vpack.c.bf16 %v529_v19, %v525_v17  ;;  %v8556_v21 = vpop.f32.mrb[11].mxu0  ;;  %v7603_v19 = vld [vmem:[#allocation2 + $0x8] ss:$12 sps:$4 sm:$0xff]  }
 0x176   :  { %7024 = vmatprep.mubr.bf16.mxu0 %v7603_v19 }
 0x177   :  { %1478 = vmatpush1.bf16.msra.mxu1 %v1067_v20  ;;  %v5548_v20 = vld [vmem:[%s9582_s5 + $0x148] sm:$0xff] }
 0x178   :  { %1479 = vmatprep.subr.bf16.mxu1 %v9588_v0  ;;  %5762 = vperm.xlu1 %7519, %v5548_v20  }
 0x17a   :  { %v535_v27 = vpop.f32.mrb[12].mxu0 }
 0x17b   :  { %v8573_v28 = vpop.f32.mrb[13].mxu0 }
 0x17c   :  { %v539_v29 = vpop.f32.mrb[14].mxu0 }
 0x17d   :  { %v1068_v30 = vpack.c.bf16 %v539_v29, %v535_v27  ;;  %v8575_v31 = vpop.f32.mrb[15].mxu0 }
 0x17f   :  { %1480 = vmatpush1.bf16.msra.mxu1 %v1068_v30  ;;  %v5550_v30 = vld [vmem:[%s9582_s5 + $0x158] sm:$0xff] }
 0x180   :  { %1481 = vmatprep.subr.bf16.mxu1 %v9588_v0  ;;  %5772 = vperm.xlu1 %7519, %v5550_v30  }
 0x182   :  { %v545_v37 = vpop.f32.mrb[16].mxu0 }
 0x183   :  { %v8592_v38 = vpop.f32.mrb[17].mxu0 }
 0x184   :  { %v549_v39 = vpop.f32.mrb[18].mxu0  ;;  %5782 = vperm.xlu1 %7519, %v5552_v35  }
 0x185   :  { %v1069_v40 = vpack.c.bf16 %v549_v39, %v545_v37  ;;  %v8594_v41 = vpop.f32.mrb[19].mxu0 }
 0x187   :  { %1482 = vmatpush1.bf16.msra.mxu1 %v1069_v40 }
 0x188   :  { %1483 = vmatprep.subr.bf16.mxu1 %v9588_v0  ;;  %5792 = vperm.xlu1 %7519, %v5554_v45  }
 0x18a   :  { %v555_v47 = vpop.f32.mrb[20].mxu0 }
 0x18b   :  { %v8611_v48 = vpop.f32.mrb[21].mxu0 }
 0x18c   :  { %v559_v49 = vpop.f32.mrb[22].mxu0 }
 0x18d   :  { %v1070_v50 = vpack.c.bf16 %v559_v49, %v555_v47  ;;  %v8613_v51 = vpop.f32.mrb[23].mxu0 }
 0x18f   :  { %1484 = vmatpush1.bf16.msra.mxu1 %v1070_v50 }
 0x190   :  { %1485 = vmatprep.subr.bf16.mxu1 %v9588_v0 }
 0x192   :  { %v565_v57 = vpop.f32.mrb[24].mxu0 }
 0x193   :  { %v8630_v58 = vpop.f32.mrb[25].mxu0 }
 0x194   :  { %v569_v59 = vpop.f32.mrb[26].mxu0 }
 0x195   :  { %v1071_v60 = vpack.c.bf16 %v569_v59, %v565_v57  ;;  %v8632_v62 = vpop.f32.mrb[27].mxu0 }
 0x197   :  { %1486 = vmatpush1.bf16.msra.mxu1 %v1071_v60 }
 0x198   :  { %1487 = vmatprep.subr.bf16.mxu1 %v9588_v0 }
 0x19a   :  { %v575_v7 = vpop.f32.mrb[28].mxu0 }
 0x19b   :  { %v8649_v9 = vpop.f32.mrb[29].mxu0 }
 0x19c   :  { %v579_v10 = vpop.f32.mrb[30].mxu0 }
 0x19d   :  { %v1072_v12 = vpack.c.bf16 %v579_v10, %v575_v7  ;;  %v8651_v13 = vpop.f32.mrb[31].mxu0 }
 0x19f   :  { %1488 = vmatpush1.bf16.msra.mxu1 %v1072_v12 }
 0x1a0   :  { %1489 = vmatprep.subr.bf16.mxu1 %v9588_v0 }
 0x1a2   :  { %v585_v23 = vpop.f32.mrb[32].mxu0 }
 0x1a3   :  { %v8668_v25 = vpop.f32.mrb[33].mxu0 }
 0x1a4   :  { %v589_v26 = vpop.f32.mrb[34].mxu0 }
 0x1a5   :  { %v1073_v27 = vpack.c.bf16 %v589_v26, %v585_v23  ;;  %v8670_v29 = vpop.f32.mrb[35].mxu0 }
 0x1a7   :  { %1490 = vmatpush1.bf16.msra.mxu1 %v1073_v27 }
 0x1a8   :  { %1491 = vmatprep.subr.bf16.mxu1 %v9588_v0 }
 0x1aa   :  { %v595_v37 = vpop.f32.mrb[36].mxu0 }
 0x1ab   :  { %v8687_v39 = vpop.f32.mrb[37].mxu0 }
 0x1ac   :  { %v599_v40 = vpop.f32.mrb[38].mxu0 }
 0x1ad   :  { %v1074_v42 = vpack.c.bf16 %v599_v40, %v595_v37  ;;  %v8689_v43 = vpop.f32.mrb[39].mxu0  ;;  %v8734_v40 = vpop.f32.mrb[2].mxu1 }
 0x1ae   :  { %9611 = vst [vmem:[#allocation21_spill] sm:$0xff] %v8734_v40 }
 0x1af   :  { %1492 = vmatpush1.bf16.msra.mxu1 %v1074_v42 }
 0x1b0   :  { %1493 = vmatprep.subr.bf16.mxu1 %v9588_v0 }
 0x1b2   :  { %v605_v49 = vpop.f32.mrb[40].mxu0 }
 0x1b3   :  { %v8700_v50 = vpop.f32.mrb[41].mxu0 }
 0x1b4   :  { %v609_v52 = vpop.f32.mrb[42].mxu0 }
 0x1b5   :  { %v1075_v53 = vpack.c.bf16 %v609_v52, %v605_v49  ;;  %v8702_v55 = vpop.f32.mrb[43].mxu0  ;;  %v8740_v49 = vpop.f32.mrb[3].mxu1 }
 0x1b6   :  { %9612 = vst [vmem:[#allocation22_spill] sm:$0xff] %v8740_v49 }
 0x1b7   :  { %1494 = vmatpush1.bf16.msra.mxu1 %v1075_v53 }
 0x1b8   :  { %1495 = vmatprep.subr.bf16.mxu1 %v9588_v0 }
 0x1ba   :  { %v615_v57 = vpop.f32.mrb[44].mxu0 }
 0x1bb   :  { %v8707_v59 = vpop.f32.mrb[45].mxu0 }
 0x1bc   :  { %v619_v60 = vpop.f32.mrb[46].mxu0 }
 0x1bd   :  { %v1076_v63 = vpack.c.bf16 %v619_v60, %v615_v57  ;;  %v8709_v2 = vpop.f32.mrb[47].mxu0  ;;  %v8745_v57 = vpop.f32.mrb[4].mxu1 }
 0x1be   :  { %9613 = vst [vmem:[#allocation23_spill] sm:$0xff] %v8745_v57 }
 0x1bf   :  { %1496 = vmatpush1.bf16.msra.mxu1 %v1076_v63  ;;  %v8747_v63 = vpop.f32.mrb[5].mxu1 }
 0x1c0   :  { %1497 = vmatprep.subr.bf16.mxu1 %v9588_v0  ;;  %9614 = vst [vmem:[#allocation24_spill] sm:$0xff] %v8747_v63 }
 0x1c2   :  { %v625_v6 = vpop.f32.mrb[48].mxu0 }
 0x1c3   :  { %v8714_v7 = vpop.f32.mrb[49].mxu0 }
 0x1c4   :  { %v629_v10 = vpop.f32.mrb[50].mxu0 }
 0x1c5   :  { %v1077_v12 = vpack.c.bf16 %v629_v10, %v625_v6  ;;  %v8716_v15 = vpop.f32.mrb[51].mxu0 }
 0x1c7   :  { %1498 = vmatpush1.bf16.msra.mxu1 %v1077_v12  ;;  %v8751_v12 = vpop.f32.mrb[6].mxu1 }
 0x1c8   :  { %1499 = vmatprep.subr.bf16.mxu1 %v9588_v0  ;;  %9615 = vst [vmem:[#allocation25_spill] sm:$0xff] %v8751_v12 }
 0x1ca   :  { %v635_v19 = vpop.f32.mrb[52].mxu0 }
 0x1cb   :  { %v8721_v20 = vpop.f32.mrb[53].mxu0 }
 0x1cc   :  { %v639_v22 = vpop.f32.mrb[54].mxu0 }
 0x1cd   :  { %v1078_v23 = vpack.c.bf16 %v639_v22, %v635_v19  ;;  %v8723_v26 = vpop.f32.mrb[55].mxu0  ;;  %v7576_v22 = vld [vmem:[#allocation2] ss:$12 sps:$4 sm:$0xff]  }
 0x1cf   :  { %1500 = vmatpush1.bf16.msra.mxu1 %v1078_v23  ;;  %v7579_v23 = vld [vmem:[#allocation2 + $0x1c] ss:$12 sps:$4 sm:$0xff]  }
 0x1d0   :  { %1501 = vmatprep.subr.bf16.mxu1 %v9588_v0 }
 0x1d2   :  { %v645_v30 = vpop.f32.mrb[56].mxu0 }
 0x1d3   :  { %v8730_v35 = vpop.f32.mrb[57].mxu0 }
 0x1d4   :  { %v649_v37 = vpop.f32.mrb[58].mxu0 }
 0x1d5   :  { %v1079_v42 = vpack.c.bf16 %v649_v37, %v645_v30  ;;  %v8736_v45 = vpop.f32.mrb[59].mxu0  ;;  %v8755_v30 = vpop.f32.mrb[7].mxu1 }
 0x1d6   :  { %9616 = vst [vmem:[#allocation26_spill] sm:$0xff] %v8755_v30  ;;  %v8757_v27 = vpop.f32.mrb[8].mxu1 }
 0x1d7   :  { %1502 = vmatpush1.bf16.msra.mxu1 %v1079_v42  ;;  %9617 = vst [vmem:[#allocation27_spill] sm:$0xff] %v8757_v27  ;;  %v8759_v16 = vpop.f32.mrb[9].mxu1 }
 0x1d8   :  { %1503 = vmatprep.subr.bf16.mxu1 %v9588_v0  ;;  %9618 = vst [vmem:[#allocation28_spill] sm:$0xff] %v8759_v16  ;;  %v8761_v47 = vpop.f32.mrb[10].mxu1 }
 0x1d9   :  { %9619 = vst [vmem:[#allocation29_spill] sm:$0xff] %v8761_v47  ;;  %v8763_v19 = vpop.f32.mrb[11].mxu1 }
 0x1da   :  { %v655_v52 = vpop.f32.mrb[60].mxu0  ;;  %9620 = vst [vmem:[#allocation30_spill] sm:$0xff] %v8763_v19 }
 0x1db   :  { %v8743_v53 = vpop.f32.mrb[61].mxu0 }
 0x1dc   :  { %v659_v60 = vpop.f32.mrb[62].mxu0 }
 0x1dd   :  { %v1080_v6 = vpack.c.bf16 %v659_v60, %v655_v52  ;;  %v8749_v10 = vpop.f32.mrb[63].mxu0 }
 0x1df   :  { %1504 = vmatpush1.bf16.msra.mxu1 %v1080_v6  ;;  %v7582_v6 = vld [vmem:[#allocation2 + $0x34] ss:$12 sps:$4 sm:$0xff]  }
 0x1e2   :  { %v665_v37 = vpop.f32.mrb[64].mxu0  ;;  %1506 = vmatmul.mubr.bf16.vlgmr.msra.gmra.mrb[48].mxu1 %v7576_v22 }
 0x1e3   :  { %v667_v42 = vpop.f32.mrb[65].mxu0  ;;  %1513 = vmatprep.mubr.bf16.mxu1 %v7579_v23 }
 0x1e4   :  { %v669_v46 = vpop.f32.mrb[66].mxu0 }
 0x1e5   :  { %v1081_v52 = vpack.c.bf16 %v669_v46, %v665_v37  ;;  %v671_v60 = vpop.f32.mrb[67].mxu0  ;;  %v8765_v46 = vpop.f32.mrb[12].mxu1 }
 0x1e6   :  { %v2083_v5 = vpack.c.bf16 %v671_v60, %v667_v42  ;;  %9621 = vst [vmem:[#allocation31_spill] sm:$0xff] %v8765_v46  ;;  %v8767_v42 = vpop.f32.mrb[13].mxu1 }
 0x1e7   :  { %7008 = vmatprep.subr.bf16.mxu0 %v1081_v52  ;;  %9622 = vst [vmem:[#allocation32_spill] sm:$0xff] %v8767_v42  ;;  %v8769_v54 = vpop.f32.mrb[14].mxu1 }
 0x1e8   :  { %7009 = vmatpush3.bf16.msra.mxu0 %v1081_v52  ;;  %7072 = vmatprep.subr.bf16.mxu1 %v2083_v5  ;;  %9623 = vst [vmem:[#allocation33_spill] sm:$0xff] %v8769_v54  ;;  %v8771_v52 = vpop.f32.mrb[15].mxu1 }
 0x1e9   :  { %7073 = vmatpush3.bf16.msra.mxu1 %v2083_v5  ;;  %9624 = vst [vmem:[#allocation34_spill] sm:$0xff] %v8771_v52 }
 0x1ea   :  { %v675_v22 = vpop.f32.mrb[68].mxu0  ;;  %1514 = vmatmul.mubr.bf16.gmra.mrb[52].mxu1 %v7581_v56 }
 0x1eb   :  { %v677_v23 = vpop.f32.mrb[69].mxu0  ;;  %1521 = vmatprep.mubr.bf16.mxu1 %v7582_v6 }
 0x1ec   :  { %v679_v33 = vpop.f32.mrb[70].mxu0 }
 0x1ed   :  { %v1082_v37 = vpack.c.bf16 %v679_v33, %v675_v22  ;;  %v681_v17 = vpop.f32.mrb[71].mxu0  ;;  %v8773_v33 = vpop.f32.mrb[16].mxu1 }
 0x1ee   :  { %v2084_v60 = vpack.c.bf16 %v681_v17, %v677_v23  ;;  %9625 = vst [vmem:[#allocation35_spill] sm:$0xff] %v8773_v33  ;;  %v8775_v17 = vpop.f32.mrb[17].mxu1 }
 0x1ef   :  { %7010 = vmatprep.subr.bf16.mxu0 %v1082_v37  ;;  %9626 = vst [vmem:[#allocation36_spill] sm:$0xff] %v8775_v17  ;;  %v8777_v14 = vpop.f32.mrb[18].mxu1 }
 0x1f0   :  { %7011 = vmatpush3.bf16.msra.mxu0 %v1082_v37  ;;  %7074 = vmatprep.subr.bf16.mxu1 %v2084_v60  ;;  %9627 = vst [vmem:[#allocation37_spill] sm:$0xff] %v8777_v14  ;;  %v8779_v37 = vpop.f32.mrb[19].mxu1  ;;  %v7590_v14 = vld [vmem:[#allocation2 + $0x60] ss:$12 sps:$4 sm:$0xff]  }
 0x1f1   :  { %7075 = vmatpush3.bf16.msra.mxu1 %v2084_v60  ;;  %9628 = vst [vmem:[#allocation38_spill] sm:$0xff] %v8779_v37  ;;  %v7591_v37 = vld [vmem:[#allocation2 + $0x7c] ss:$12 sps:$4 sm:$0xff]  }
 0x1f2   :  { %v685_v56 = vpop.f32.mrb[72].mxu0  ;;  %1522 = vmatmul.mubr.bf16.gmra.mrb[56].mxu1 %v7584_v3 }
 0x1f3   :  { %v687_v5 = vpop.f32.mrb[73].mxu0  ;;  %1529 = vmatprep.mubr.bf16.mxu1 %v7585_v44 }
 0x1f4   :  { %v689_v6 = vpop.f32.mrb[74].mxu0 }
 0x1f5   :  { %v1083_v22 = vpack.c.bf16 %v689_v6, %v685_v56  ;;  %v691_v34 = vpop.f32.mrb[75].mxu0  ;;  %v8781_v56 = vpop.f32.mrb[20].mxu1 }
 0x1f6   :  { %v2085_v23 = vpack.c.bf16 %v691_v34, %v687_v5  ;;  %9629 = vst [vmem:[#allocation39_spill] sm:$0xff] %v8781_v56  ;;  %v8783_v34 = vpop.f32.mrb[21].mxu1 }
 0x1f7   :  { %7012 = vmatprep.subr.bf16.mxu0 %v1083_v22  ;;  %9630 = vst [vmem:[#allocation40_spill] sm:$0xff] %v8783_v34  ;;  %v8785_v17 = vpop.f32.mrb[22].mxu1 }
 0x1f8   :  { %7013 = vmatpush3.bf16.msra.mxu0 %v1083_v22  ;;  %7076 = vmatprep.subr.bf16.mxu1 %v2085_v23  ;;  %9631 = vst [vmem:[#allocation41_spill] sm:$0xff] %v8785_v17  ;;  %v8787_v22 = vpop.f32.mrb[23].mxu1  ;;  %v7593_v17 = vld [vmem:[#allocation2 + $0x78] ss:$12 sps:$4 sm:$0xff]  }
 0x1f9   :  { %7077 = vmatpush3.bf16.msra.mxu1 %v2085_v23  ;;  %9632 = vst [vmem:[#allocation42_spill] sm:$0xff] %v8787_v22  ;;  %v7594_v22 = vld [vmem:[#allocation2 + $0x94] ss:$12 sps:$4 sm:$0xff]  }
 0x1fa   :  { %v695_v3 = vpop.f32.mrb[76].mxu0  ;;  %1530 = vmatmul.mubr.bf16.gmra.mrb[60].mxu1 %v7587_v24 }
 0x1fb   :  { %v697_v44 = vpop.f32.mrb[77].mxu0  ;;  %1537 = vmatprep.mubr.bf16.mxu1 %v7588_v4 }
 0x1fc   :  { %v699_v60 = vpop.f32.mrb[78].mxu0 }
 0x1fd   :  { %v1084_v6 = vpack.c.bf16 %v699_v60, %v695_v3  ;;  %v701_v0 = vpop.f32.mrb[79].mxu0  ;;  %v8789_v3 = vpop.f32.mrb[24].mxu1 }
 0x1fe   :  { %v2086_v5 = vpack.c.bf16 %v701_v0, %v697_v44  ;;  %9633 = vst [vmem:[#allocation43_spill] sm:$0xff] %v8789_v3  ;;  %v8791_v0 = vpop.f32.mrb[25].mxu1 }
 0x1ff   :  { %7014 = vmatprep.subr.bf16.mxu0 %v1084_v6  ;;  %9634 = vst [vmem:[#allocation44_spill] sm:$0xff] %v8791_v0  ;;  %v8793_v56 = vpop.f32.mrb[26].mxu1 }
 0x200   :  { %7015 = vmatpush3.bf16.msra.mxu0 %v1084_v6  ;;  %7078 = vmatprep.subr.bf16.mxu1 %v2086_v5  ;;  %9635 = vst [vmem:[#allocation45_spill] sm:$0xff] %v8793_v56  ;;  %v8795_v6 = vpop.f32.mrb[27].mxu1  ;;  %v7596_v56 = vld [vmem:[#allocation2 + $0x90] ss:$12 sps:$4 sm:$0xff]  }
 0x201   :  { %7079 = vmatpush3.bf16.msra.mxu1 %v2086_v5  ;;  %9636 = vst [vmem:[#allocation46_spill] sm:$0xff] %v8795_v6  ;;  %v7597_v6 = vld [vmem:[#allocation2 + $0xac] ss:$12 sps:$4 sm:$0xff]  }
 0x202   :  { %v705_v24 = vpop.f32.mrb[80].mxu0  ;;  %1538 = vmatmul.mubr.bf16.gmra.mrb[64].mxu1 %v7590_v14 }
 0x203   :  { %v707_v4 = vpop.f32.mrb[81].mxu0  ;;  %1545 = vmatprep.mubr.bf16.mxu1 %v7591_v37 }
 0x204   :  { %v709_v23 = vpop.f32.mrb[82].mxu0 }
 0x205   :  { %v1085_v60 = vpack.c.bf16 %v709_v23, %v705_v24  ;;  %v711_v34 = vpop.f32.mrb[83].mxu0  ;;  %v8797_v24 = vpop.f32.mrb[28].mxu1 }
 0x206   :  { %v2087_v44 = vpack.c.bf16 %v711_v34, %v707_v4  ;;  %9637 = vst [vmem:[#allocation47_spill] sm:$0xff] %v8797_v24  ;;  %v8799_v34 = vpop.f32.mrb[29].mxu1 }
 0x207   :  { %7016 = vmatprep.subr.bf16.mxu0 %v1085_v60  ;;  %9638 = vst [vmem:[#allocation48_spill] sm:$0xff] %v8799_v34  ;;  %v8801_v3 = vpop.f32.mrb[30].mxu1 }
 0x208   :  { %7017 = vmatpush3.bf16.msra.mxu0 %v1085_v60  ;;  %7080 = vmatprep.subr.bf16.mxu1 %v2087_v44  ;;  %9639 = vst [vmem:[#allocation49_spill] sm:$0xff] %v8801_v3  ;;  %v8803_v60 = vpop.f32.mrb[31].mxu1  ;;  %v7599_v3 = vld [vmem:[#allocation2 + $0xa8] ss:$12 sps:$4 sm:$0xff]  }
 0x209   :  { %7081 = vmatpush3.bf16.msra.mxu1 %v2087_v44  ;;  %9640 = vst [vmem:[#allocation50_spill] sm:$0xff] %v8803_v60  ;;  %v7600_v60 = vld [vmem:[#allocation2 + $0xc4] ss:$12 sps:$4 sm:$0xff]  }
 0x20a   :  { %v715_v14 = vpop.f32.mrb[84].mxu0  ;;  %1546 = vmatmul.mubr.bf16.gmra.mrb[68].mxu1 %v7593_v17 }
 0x20b   :  { %v717_v37 = vpop.f32.mrb[85].mxu0  ;;  %1553 = vmatprep.mubr.bf16.mxu1 %v7594_v22 }
 0x20c   :  { %v719_v5 = vpop.f32.mrb[86].mxu0 }
 0x20d   :  { %v1086_v23 = vpack.c.bf16 %v719_v5, %v715_v14  ;;  %v721_v0 = vpop.f32.mrb[87].mxu0  ;;  %v8805_v14 = vpop.f32.mrb[32].mxu1 }
 0x20e   :  { %v2088_v4 = vpack.c.bf16 %v721_v0, %v717_v37  ;;  %9641 = vst [vmem:[#allocation51_spill] sm:$0xff] %v8805_v14  ;;  %v8807_v0 = vpop.f32.mrb[33].mxu1 }
 0x20f   :  { %7018 = vmatprep.subr.bf16.mxu0 %v1086_v23  ;;  %9642 = vst [vmem:[#allocation52_spill] sm:$0xff] %v8807_v0  ;;  %v8809_v24 = vpop.f32.mrb[34].mxu1 }
 0x210   :  { %7019 = vmatpush3.bf16.msra.mxu0 %v1086_v23  ;;  %7082 = vmatprep.subr.bf16.mxu1 %v2088_v4  ;;  %9643 = vst [vmem:[#allocation53_spill] sm:$0xff] %v8809_v24  ;;  %v8811_v23 = vpop.f32.mrb[35].mxu1  ;;  %v7602_v24 = vld [vmem:[#allocation2 + $0xc0] ss:$12 sps:$4 sm:$0xff]  }
 0x211   :  { %7083 = vmatpush3.bf16.msra.mxu1 %v2088_v4  ;;  %9644 = vst [vmem:[#allocation54_spill] sm:$0xff] %v8811_v23  ;;  %v7604_v23 = vld [vmem:[#allocation2 + $0x20] ss:$12 sps:$4 sm:$0xff]  }
 0x212   :  { %v725_v17 = vpop.f32.mrb[88].mxu0  ;;  %1554 = vmatmul.mubr.bf16.gmra.mrb[72].mxu1 %v7596_v56 }
 0x213   :  { %v727_v22 = vpop.f32.mrb[89].mxu0  ;;  %1561 = vmatprep.mubr.bf16.mxu1 %v7597_v6 }
 0x214   :  { %v729_v44 = vpop.f32.mrb[90].mxu0 }
 0x215   :  { %v1087_v5 = vpack.c.bf16 %v729_v44, %v725_v17  ;;  %v731_v34 = vpop.f32.mrb[91].mxu0  ;;  %v8813_v17 = vpop.f32.mrb[36].mxu1 }
 0x216   :  { %v2089_v37 = vpack.c.bf16 %v731_v34, %v727_v22  ;;  %9645 = vst [vmem:[#allocation55_spill] sm:$0xff] %v8813_v17  ;;  %v8815_v34 = vpop.f32.mrb[37].mxu1 }
 0x217   :  { %7020 = vmatprep.subr.bf16.mxu0 %v1087_v5  ;;  %9646 = vst [vmem:[#allocation56_spill] sm:$0xff] %v8815_v34  ;;  %v8817_v14 = vpop.f32.mrb[38].mxu1 }
 0x218   :  { %7021 = vmatpush3.bf16.msra.mxu0 %v1087_v5  ;;  %7084 = vmatprep.subr.bf16.mxu1 %v2089_v37  ;;  %9647 = vst [vmem:[#allocation57_spill] sm:$0xff] %v8817_v14  ;;  %v7605_v5 = vld [vmem:[#allocation2 + $0xdc] ss:$12 sps:$4 sm:$0xff]   ;;  %v8819_v33 = vpop.f32.mrb[39].mxu1 }
 0x219   :  { %7085 = vmatpush3.bf16.msra.mxu1 %v2089_v37  ;;  %9648 = vst [vmem:[#allocation58_spill] sm:$0xff] %v8819_v33  ;;  %v8822_v37 = vpop.f32.mrb[40].mxu1 }
 0x21a   :  { %v735_v56 = vpop.f32.mrb[92].mxu0  ;;  %1562 = vmatmul.mubr.bf16.gmra.mrb[76].mxu1 %v7599_v3  ;;  %v7608_v3 = vld [vmem:[#allocation2 + $0x38] ss:$12 sps:$4 sm:$0xff]   ;;  %9650 = vst [vmem:[#allocation59_spill] sm:$0xff] %v8822_v37 }
 0x21b   :  { %v737_v6 = vpop.f32.mrb[93].mxu0  ;;  %1569 = vmatprep.mubr.bf16.mxu1 %v7600_v60  ;;  %v9649_v60 = vmov 0  }
 0x21c   :  { %v739_v4 = vpop.f32.mrb[94].mxu0 }
 0x21d   :  { %v1088_v44 = vpack.c.bf16 %v739_v4, %v735_v56  ;;  %v741_v0 = vpop.f32.mrb[95].mxu0  ;;  %v9652_v56 = vpack.c.bf16 %v8518_v1, %v8516_v61 }
 0x21e   :  { %v2090_v22 = vpack.c.bf16 %v741_v0, %v737_v6  ;;  %v8825_v0 = vpop.f32.mrb[41].mxu1 }
 0x21f   :  { %7022 = vmatprep.subr.bf16.mxu0 %v1088_v44  ;;  %9651 = vst [vmem:[#allocation60_spill] sm:$0xff] %v8825_v0  ;;  %v8830_v6 = vpop.f32.mrb[42].mxu1 }
 0x220   :  { %7023 = vmatpush3.bf16.msra.mxu0 %v1088_v44  ;;  %7086 = vmatprep.subr.bf16.mxu1 %v2090_v22  ;;  %9653 = vst [vmem:[#allocation61_spill] sm:$0xff] %v8830_v6  ;;  %v8833_v4 = vpop.f32.mrb[43].mxu1  ;;  %v7609_v44 = vld [vmem:[#allocation2 + $0x50] ss:$12 sps:$4 sm:$0xff]  }
 0x221   :  { %7087 = vmatpush3.bf16.msra.mxu1 %v2090_v22  ;;  %2475 = vmatprep.subr.bf16.mxu0 %v9649_v60  ;;  %9654 = vst [vmem:[#allocation62_spill] sm:$0xff] %v8833_v4  ;;  %v7610_v22 = vld [vmem:[#allocation2 + $0xf4] ss:$12 sps:$4 sm:$0xff]   ;;  %v8839_v61 = vpop.f32.mrb[44].mxu1 }
 0x222   :  { %1570 = vmatmul.mubr.bf16.gmra.mrb[80].mxu1 %v7602_v24  ;;  %3477 = vmatprep.subr.bf16.mxu1 %v9649_v60  ;;  %v7607_v24 = vld [vmem:[#allocation2 + $0xd8] ss:$12 sps:$4 sm:$0xff]   ;;  %9656 = vst [vmem:[#allocation63_spill] sm:$0xff] %v8839_v61  ;;  %v8841_v1 = vpop.f32.mrb[45].mxu1 }
 0x223   :  { %7025 = vmatmul.mubr.bf16.vlgmr.msra.gmra.mrb[96].mxu0 %v7604_v23  ;;  %1577 = vmatprep.mubr.bf16.mxu1 %v7605_v5  ;;  %v9655_v23 = vpack.c.bf16 %v8537_v11, %v8535_v8  ;;  %v7613_v5 = vld [vmem:[#allocation2 + $0x68] ss:$12 sps:$4 sm:$0xff]   ;;  %9657 = vst [vmem:[#allocation64_spill] sm:$0xff] %v8841_v1  ;;  %v7612_v11 = vld [vmem:[#allocation2 + $0xf0] ss:$12 sps:$4 sm:$0xff]  }
 0x224   :  { %2476 = vmatpush1.bf16.msra.mxu0 %v9652_v56  ;;  %7028 = vmatprep.mubr.bf16.mxu0 %v7608_v3  ;;  %v9658_v3 = vpack.c.bf16 %v8556_v21, %v8554_v18  ;;  %v8846_v56 = vpop.f32.mrb[46].mxu1  ;;  %v9662_v18 = vpack.c.bf16 %v8594_v41, %v8592_v38  ;;  %v7617_v21 = vld [vmem:[#allocation2 + $0x108] ss:$12 sps:$4 sm:$0xff]   ;;  %v9664_v38 = vpack.c.bf16 %v8632_v62, %v8630_v58  ;;  %v7622_v41 = vld [vmem:[#allocation2 + $0x120] ss:$12 sps:$4 sm:$0xff]  }
 0x225   :  { %2477 = vmatprep.subr.bf16.mxu0 %v9649_v60  ;;  %9659 = vst [vmem:[#allocation65_spill] sm:$0xff] %v8846_v56  ;;  %v8849_v8 = vpop.f32.mrb[47].mxu1  ;;  %v9666_v58 = vpack.c.bf16 %v8670_v29, %v8668_v25  ;;  %v7627_v62 = vld [vmem:[#allocation2 + $0x138] ss:$12 sps:$4 sm:$0xff]   ;;  %v9668_v25 = vpack.c.bf16 %v8702_v55, %v8700_v50  ;;  %v7632_v29 = vld [vmem:[#allocation2 + $0x150] ss:$12 sps:$4 sm:$0xff]   ;;  %v9670_v50 = vpack.c.bf16 %v8716_v15, %v8714_v7 }
 0x226   :  { %9660 = vst [vmem:[#allocation66_spill] sm:$0xff] %v8849_v8  ;;  %v7637_v55 = vld [vmem:[#allocation2 + $0x168] ss:$12 sps:$4 sm:$0xff]   ;;  %v9672_v7 = vpack.c.bf16 %v8736_v45, %v8730_v35  ;;  %v7642_v15 = vld [vmem:[#allocation2 + $0x180] ss:$12 sps:$4 sm:$0xff]  }
 0x227   :  { %v7653_v35 = vld [vmem:[#allocation2 + $0x1e8] ss:$12 sps:$4 sm:$0xff]   ;;  %v7652_v45 = vld [vmem:[#allocation2 + $0x1b0] ss:$12 sps:$4 sm:$0xff]  }
 0x228   :  { %2478 = vmatpush1.bf16.msra.mxu0 %v9655_v23  ;;  %v7614_v23 = vld [vmem:[#allocation2 + $0x80] ss:$12 sps:$4 sm:$0xff]  }
 0x229   :  { %2479 = vmatprep.subr.bf16.mxu0 %v9649_v60 }
 0x22a   :  { %1578 = vmatmul.mubr.bf16.gmra.mrb[84].mxu1 %v7607_v24  ;;  %v7615_v24 = vld [vmem:[#allocation2 + $0x10c] ss:$12 sps:$4 sm:$0xff]  }
 0x22b   :  { %7029 = vmatmul.mubr.bf16.gmra.mrb[100].mxu0 %v7609_v44  ;;  %1585 = vmatprep.mubr.bf16.mxu1 %v7610_v22  ;;  %v9661_v44 = vpack.c.bf16 %v8575_v31, %v8573_v28  ;;  %v7618_v22 = vld [vmem:[#allocation2 + $0x98] ss:$12 sps:$4 sm:$0xff]   ;;  %v9663_v28 = vpack.c.bf16 %v8613_v51, %v8611_v48  ;;  %v7623_v31 = vld [vmem:[#allocation2 + $0xc8] ss:$12 sps:$4 sm:$0xff]   ;;  %v9665_v48 = vpack.c.bf16 %v8651_v13, %v8649_v9 }
 0x22c   :  { %2480 = vmatpush1.bf16.msra.mxu0 %v9658_v3  ;;  %7032 = vmatprep.mubr.bf16.mxu0 %v7613_v5  ;;  %v7619_v5 = vld [vmem:[#allocation2 + $0xb0] ss:$12 sps:$4 sm:$0xff]   ;;  %v7628_v51 = vld [vmem:[#allocation2 + $0xf8] ss:$12 sps:$4 sm:$0xff]   ;;  %v9667_v9 = vpack.c.bf16 %v8689_v43, %v8687_v39  ;;  %v7633_v13 = vld [vmem:[#allocation2 + $0x128] ss:$12 sps:$4 sm:$0xff]   ;;  %v9669_v39 = vpack.c.bf16 %v8709_v2, %v8707_v59  ;;  %v9671_v59 = vpack.c.bf16 %v8723_v26, %v8721_v20 }
 0x22d   :  { %2481 = vmatprep.subr.bf16.mxu0 %v9649_v60  ;;  %v7620_v3 = vld [vmem:[#allocation2 + $0x124] ss:$12 sps:$4 sm:$0xff]   ;;  %v7643_v2 = vld [vmem:[#allocation2 + $0x188] ss:$12 sps:$4 sm:$0xff]   ;;  %v9673_v20 = vpack.c.bf16 %v8749_v10, %v8743_v53 }
 0x22e   :  { %v7638_v43 = vld [vmem:[#allocation2 + $0x158] ss:$12 sps:$4 sm:$0xff]   ;;  %v7657_v53 = vld [vmem:[#allocation2 + $0x1c8] ss:$12 sps:$4 sm:$0xff]   ;;  %v7659_v10 = vld [vmem:[#allocation2 + $0x230] ss:$12 sps:$4 sm:$0xff]  }
 0x22f   :  { %v7648_v26 = vld [vmem:[#allocation2 + $0x1b8] ss:$12 sps:$4 sm:$0xff]  }
 0x230   :  { %2482 = vmatpush1.bf16.msra.mxu0 %v9661_v44  ;;  %v7630_v44 = vld [vmem:[#allocation2 + $0x154] ss:$12 sps:$4 sm:$0xff]  }
 0x231   :  { %2483 = vmatprep.subr.bf16.mxu0 %v9649_v60 }
 0x232   :  { %1586 = vmatmul.mubr.bf16.gmra.mrb[88].mxu1 %v7612_v11  ;;  %v7624_v11 = vld [vmem:[#allocation2 + $0xe0] ss:$12 sps:$4 sm:$0xff]  }
 0x233   :  { %7033 = vmatmul.mubr.bf16.gmra.mrb[104].mxu0 %v7614_v23  ;;  %1593 = vmatprep.mubr.bf16.mxu1 %v7615_v24  ;;  %v7625_v23 = vld [vmem:[#allocation2 + $0x13c] ss:$12 sps:$4 sm:$0xff]  }
 0x234   :  { %2484 = vmatpush1.bf16.msra.mxu0 %v9662_v18  ;;  %7036 = vmatprep.mubr.bf16.mxu0 %v7618_v22  ;;  %v7629_v24 = vld [vmem:[#allocation2 + $0x110] ss:$12 sps:$4 sm:$0xff]   ;;  %v7634_v22 = vld [vmem:[#allocation2 + $0x140] ss:$12 sps:$4 sm:$0xff]  }
 0x235   :  { %2485 = vmatprep.subr.bf16.mxu0 %v9649_v60  ;;  %v7635_v18 = vld [vmem:[#allocation2 + $0x16c] ss:$12 sps:$4 sm:$0xff]  }
 0x238   :  { %2486 = vmatpush1.bf16.msra.mxu0 %v9663_v28  ;;  %v7645_v28 = vld [vmem:[#allocation2 + $0x19c] ss:$12 sps:$4 sm:$0xff]  }
 0x239   :  { %2487 = vmatprep.subr.bf16.mxu0 %v9649_v60 }
 0x23a   :  { %1594 = vmatmul.mubr.bf16.gmra.mrb[92].mxu1 %v7617_v21  ;;  %v7639_v21 = vld [vmem:[#allocation2 + $0x170] ss:$12 sps:$4 sm:$0xff]  }
 0x23b   :  { %7037 = vmatmul.mubr.bf16.gmra.mrb[108].mxu0 %v7619_v5  ;;  %1601 = vmatprep.mubr.bf16.mxu1 %v7620_v3  ;;  %v7640_v5 = vld [vmem:[#allocation2 + $0x184] ss:$12 sps:$4 sm:$0xff]   ;;  %v7644_v3 = vld [vmem:[#allocation2 + $0x1a0] ss:$12 sps:$4 sm:$0xff]  }
 0x23c   :  { %2488 = vmatpush1.bf16.msra.mxu0 %v9664_v38  ;;  %7040 = vmatprep.mubr.bf16.mxu0 %v7623_v31  ;;  %v7647_v31 = vld [vmem:[#allocation2 + $0x198] ss:$12 sps:$4 sm:$0xff]   ;;  %v7649_v38 = vld [vmem:[#allocation2 + $0x1d0] ss:$12 sps:$4 sm:$0xff]  }
 0x23d   :  { %2489 = vmatprep.subr.bf16.mxu0 %v9649_v60 }
 0x240   :  { %2490 = vmatpush1.bf16.msra.mxu0 %v9665_v48  ;;  %v7658_v48 = vld [vmem:[#allocation2 + $0x218] ss:$12 sps:$4 sm:$0xff]  }
 0x241   :  { %2491 = vmatprep.subr.bf16.mxu0 %v9649_v60 }
 0x242   :  { %1602 = vmatmul.mubr.bf16.gmra.mrb[96].mxu1 %v7622_v41  ;;  %v7650_v41 = vld [vmem:[#allocation2 + $0x1b4] ss:$12 sps:$4 sm:$0xff]  }
 0x243   :  { %7041 = vmatmul.mubr.bf16.gmra.mrb[112].mxu0 %v7624_v11  ;;  %1609 = vmatprep.mubr.bf16.mxu1 %v7625_v23  ;;  %v7654_v11 = vld [vmem:[#allocation2 + $0x200] ss:$12 sps:$4 sm:$0xff]  }
 0x244   :  { %2492 = vmatpush1.bf16.msra.mxu0 %v9666_v58  ;;  %7044 = vmatprep.mubr.bf16.mxu0 %v7628_v51  ;;  %v7655_v23 = vld [vmem:[#allocation2 + $0x1cc] ss:$12 sps:$4 sm:$0xff]   ;;  %v7660_v51 = vld [vmem:[#allocation2 + $0x1e4] ss:$12 sps:$4 sm:$0xff]  }
 0x245   :  { %2493 = vmatprep.subr.bf16.mxu0 %v9649_v60  ;;  %v7665_v58 = vld [vmem:[#allocation5 + $0x4] ss:$12 sps:$4 sm:$0xff]  }
 0x248   :  { %2494 = vmatpush1.bf16.msra.mxu0 %v9667_v9  ;;  %v7669_v9 = vld [vmem:[#allocation5 + $0x1c] ss:$12 sps:$4 sm:$0xff]  }
 0x249   :  { %2495 = vmatprep.subr.bf16.mxu0 %v9649_v60 }
 0x24a   :  { %1610 = vmatmul.mubr.bf16.gmra.mrb[100].mxu1 %v7627_v62  ;;  %v7662_v62 = vld [vmem:[#allocation2 + $0x1e0] ss:$12 sps:$4 sm:$0xff]  }
 0x24b   :  { %7045 = vmatmul.mubr.bf16.gmra.mrb[116].mxu0 %v7629_v24  ;;  %1617 = vmatprep.mubr.bf16.mxu1 %v7630_v44  ;;  %v7663_v24 = vld [vmem:[#allocation5] ss:$12 sps:$4 sm:$0xff]   ;;  %v7666_v44 = vld [vmem:[#allocation2 + $0x1fc] ss:$12 sps:$4 sm:$0xff]  }
 0x24c   :  { %2496 = vmatpush1.bf16.msra.mxu0 %v9668_v25  ;;  %7048 = vmatprep.mubr.bf16.mxu0 %v7633_v13  ;;  %v7668_v13 = vld [vmem:[#allocation2 + $0x1f8] ss:$12 sps:$4 sm:$0xff]  }
 0x24d   :  { %2497 = vmatprep.subr.bf16.mxu0 %v9649_v60  ;;  %v7671_v25 = vld [vmem:[#allocation5 + $0x18] ss:$12 sps:$4 sm:$0xff]  }
 0x250   :  { %2498 = vmatpush1.bf16.msra.mxu0 %v9669_v39  ;;  %v7677_v39 = vld [vmem:[#allocation5 + $0x30] ss:$12 sps:$4 sm:$0xff]  }
 0x251   :  { %2499 = vmatprep.subr.bf16.mxu0 %v9649_v60 }
 0x252   :  { %1618 = vmatmul.mubr.bf16.gmra.mrb[104].mxu1 %v7632_v29  ;;  %v7672_v29 = vld [vmem:[#allocation2 + $0x214] ss:$12 sps:$4 sm:$0xff]  }
 0x253   :  { %7049 = vmatmul.mubr.bf16.gmra.mrb[120].mxu0 %v7634_v22  ;;  %1625 = vmatprep.mubr.bf16.mxu1 %v7635_v18  ;;  %v7675_v22 = vld [vmem:[#allocation5 + $0x34] ss:$12 sps:$4 sm:$0xff]   ;;  %v7674_v18 = vld [vmem:[#allocation2 + $0x210] ss:$12 sps:$4 sm:$0xff]  }
 0x254   :  { %2500 = vmatpush1.bf16.msra.mxu0 %v9670_v50  ;;  %7052 = vmatprep.mubr.bf16.mxu0 %v7638_v43  ;;  %v7678_v43 = vld [vmem:[#allocation2 + $0x22c] ss:$12 sps:$4 sm:$0xff]  }
 0x255   :  { %2501 = vmatprep.subr.bf16.mxu0 %v9649_v60  ;;  %v7681_v50 = vld [vmem:[#allocation5 + $0x4c] ss:$12 sps:$4 sm:$0xff]  }
 0x258   :  { %2502 = vmatpush1.bf16.msra.mxu0 %v9671_v59  ;;  %v7685_v59 = vld [vmem:[#allocation5 + $0x64] ss:$12 sps:$4 sm:$0xff]  }
 0x259   :  { %2503 = vmatprep.subr.bf16.mxu0 %v9649_v60 }
 0x25a   :  { %1626 = vmatmul.mubr.bf16.gmra.mrb[108].mxu1 %v7637_v55  ;;  %v7680_v55 = vld [vmem:[#allocation2 + $0x228] ss:$12 sps:$4 sm:$0xff]  }
 0x25b   :  { %7053 = vmatmul.mubr.bf16.gmra.mrb[124].mxu0 %v7639_v21  ;;  %1633 = vmatprep.mubr.bf16.mxu1 %v7640_v5  ;;  %v7683_v21 = vld [vmem:[#allocation5 + $0x48] ss:$12 sps:$4 sm:$0xff]  }
 0x25c   :  { %2504 = vmatpush1.bf16.msra.mxu0 %v9672_v7  ;;  %7056 = vmatprep.mubr.bf16.mxu0 %v7643_v2  ;;  %v7684_v5 = vld [vmem:[#allocation5 + $0x8] ss:$12 sps:$4 sm:$0xff]   ;;  %v7687_v2 = vld [vmem:[#allocation5 + $0x20] ss:$12 sps:$4 sm:$0xff]  }
 0x25d   :  { %2505 = vmatprep.subr.bf16.mxu0 %v9649_v60  ;;  %v7688_v7 = vld [vmem:[#allocation5 + $0x60] ss:$12 sps:$4 sm:$0xff]  }
 0x260   :  { %2506 = vmatpush1.bf16.msra.mxu0 %v9673_v20  ;;  %v7691_v20 = vld [vmem:[#allocation5 + $0x78] ss:$12 sps:$4 sm:$0xff]  }
 0x262   :  { %1634 = vmatmul.mubr.bf16.gmra.mrb[112].mxu1 %v7642_v15  ;;  %v7692_v15 = vld [vmem:[#allocation5 + $0x38] ss:$12 sps:$4 sm:$0xff]  }
 0x263   :  { %7057 = vmatmul.mubr.bf16.gmra.mrb[128].mxu0 %v7644_v3  ;;  %1641 = vmatprep.mubr.bf16.mxu1 %v7645_v28  ;;  %v7689_v3 = vld [vmem:[#allocation5 + $0x7c] ss:$12 sps:$4 sm:$0xff]  }
 0x264   :  { %7060 = vmatprep.mubr.bf16.mxu0 %v7648_v26  ;;  %v7693_v28 = vld [vmem:[#allocation5 + $0x50] ss:$12 sps:$4 sm:$0xff]   ;;  %v7700_v26 = vld [vmem:[#allocation5 + $0x68] ss:$12 sps:$4 sm:$0xff]  }
 0x26a   :  { %1642 = vmatmul.mubr.bf16.gmra.mrb[116].mxu1 %v7647_v31  ;;  %v7694_v31 = vld [vmem:[#allocation5 + $0x94] ss:$12 sps:$4 sm:$0xff]  }
 0x26b   :  { %7061 = vmatmul.mubr.bf16.gmra.mrb[132].mxu0 %v7649_v38  ;;  %1649 = vmatprep.mubr.bf16.mxu1 %v7650_v41  ;;  %v7701_v38 = vld [vmem:[#allocation5 + $0x80] ss:$12 sps:$4 sm:$0xff]   ;;  %v7696_v41 = vld [vmem:[#allocation5 + $0x90] ss:$12 sps:$4 sm:$0xff]  }
 0x26c   :  { %7064 = vmatprep.mubr.bf16.mxu0 %v7653_v35  ;;  %v7708_v35 = vld [vmem:[#allocation5 + $0x98] ss:$12 sps:$4 sm:$0xff]  }
 0x272   :  { %1650 = vmatmul.mubr.bf16.gmra.mrb[120].mxu1 %v7652_v45  ;;  %v7697_v45 = vld [vmem:[#allocation5 + $0xac] ss:$12 sps:$4 sm:$0xff]  }
 0x273   :  { %7065 = vmatmul.mubr.bf16.gmra.mrb[136].mxu0 %v7654_v11  ;;  %1657 = vmatprep.mubr.bf16.mxu1 %v7655_v23 }
 0x274   :  { %7068 = vmatprep.mubr.bf16.mxu0 %v7658_v48  ;;  %v7709_v48 = vld [vmem:[#allocation5 + $0xb0] ss:$12 sps:$4 sm:$0xff]  }
 0x27a   :  { %1658 = vmatmul.mubr.bf16.gmra.mrb[124].mxu1 %v7657_v53 }
 0x27b   :  { %7069 = vmatmul.mubr.bf16.gmra.mrb[140].mxu0 %v7659_v10  ;;  %1665 = vmatprep.mubr.bf16.mxu1 %v7660_v51  ;;  %v7699_v10 = vld [vmem:[#allocation5 + $0xa8] ss:$12 sps:$4 sm:$0xff]  }
 0x27c   :  { %2507 = vmatprep.mubr.bf16.mxu0 %v7665_v58  ;;  %v7716_v51 = vld [vmem:[#allocation5 + $0xc8] ss:$12 sps:$4 sm:$0xff]  }
 0x282   :  { %1666 = vmatmul.mubr.bf16.gmra.mrb[128].mxu1 %v7662_v62  ;;  %v7702_v62 = vld [vmem:[#allocation5 + $0xc4] ss:$12 sps:$4 sm:$0xff]  }
 0x283   :  { %2508 = vmatmul.mubr.bf16.vlgmr.msra.gmra.mrb[144].mxu0 %v7663_v24  ;;  %1673 = vmatprep.mubr.bf16.mxu1 %v7666_v44 }
 0x284   :  { %2515 = vmatprep.mubr.bf16.mxu0 %v7669_v9  ;;  %v7717_v9 = vld [vmem:[#allocation5 + $0xe0] ss:$12 sps:$4 sm:$0xff]  }
 0x28a   :  { %1674 = vmatmul.mubr.bf16.gmra.mrb[132].mxu1 %v7668_v13 }
 0x28b   :  { %2516 = vmatmul.mubr.bf16.gmra.mrb[148].mxu0 %v7671_v25  ;;  %1681 = vmatprep.mubr.bf16.mxu1 %v7672_v29  ;;  %v7704_v25 = vld [vmem:[#allocation5 + $0xc0] ss:$12 sps:$4 sm:$0xff]   ;;  %v7721_v29 = vld [vmem:[#allocation5 + $0xf8] ss:$12 sps:$4 sm:$0xff]  }
 0x28c   :  { %2523 = vmatprep.mubr.bf16.mxu0 %v7675_v22 }
 0x292   :  { %1682 = vmatmul.mubr.bf16.gmra.mrb[136].mxu1 %v7674_v18  ;;  %v7705_v18 = vld [vmem:[#allocation5 + $0xdc] ss:$12 sps:$4 sm:$0xff]  }
 0x293   :  { %2524 = vmatmul.mubr.bf16.gmra.mrb[152].mxu0 %v7677_v39  ;;  %1689 = vmatprep.mubr.bf16.mxu1 %v7678_v43 }
 0x294   :  { %2531 = vmatprep.mubr.bf16.mxu0 %v7681_v50  ;;  %v7722_v50 = vld [vmem:[#allocation5 + $0x110] ss:$12 sps:$4 sm:$0xff]  }
 0x29a   :  { %1690 = vmatmul.mubr.bf16.gmra.mrb[140].mxu1 %v7680_v55 }
 0x29b   :  { %2532 = vmatmul.mubr.bf16.gmra.mrb[156].mxu0 %v7683_v21  ;;  %7088 = vmatprep.mubr.bf16.mxu1 %v7684_v5  ;;  %v7707_v21 = vld [vmem:[#allocation5 + $0xd8] ss:$12 sps:$4 sm:$0xff]   ;;  %v7726_v5 = vld [vmem:[#allocation5 + $0x128] ss:$12 sps:$4 sm:$0xff]  }
 0x29c   :  { %2539 = vmatprep.mubr.bf16.mxu0 %v7685_v59 }
 0x2a2   :  { %7089 = vmatmul.mubr.bf16.vlgmr.msra.gmra.mrb[144].mxu1 %v7687_v2  ;;  %v7710_v2 = vld [vmem:[#allocation5 + $0xf4] ss:$12 sps:$4 sm:$0xff]  }
 0x2a3   :  { %2540 = vmatmul.mubr.bf16.gmra.mrb[160].mxu0 %v7688_v7  ;;  %7092 = vmatprep.mubr.bf16.mxu1 %v7692_v15 }
 0x2a4   :  { %2547 = vmatprep.mubr.bf16.mxu0 %v7689_v3  ;;  %v7727_v3 = vld [vmem:[#allocation5 + $0x140] ss:$12 sps:$4 sm:$0xff]  }
 0x2aa   :  { %7093 = vmatmul.mubr.bf16.gmra.mrb[148].mxu1 %v7693_v28 }
 0x2ab   :  { %2548 = vmatmul.mubr.bf16.gmra.mrb[164].mxu0 %v7691_v20  ;;  %7096 = vmatprep.mubr.bf16.mxu1 %v7700_v26  ;;  %v7712_v20 = vld [vmem:[#allocation5 + $0xf0] ss:$12 sps:$4 sm:$0xff]   ;;  %v7731_v26 = vld [vmem:[#allocation5 + $0x158] ss:$12 sps:$4 sm:$0xff]  }
 0x2ac   :  { %2555 = vmatprep.mubr.bf16.mxu0 %v7694_v31 }
 0x2b2   :  { %7097 = vmatmul.mubr.bf16.gmra.mrb[152].mxu1 %v7701_v38  ;;  %v7713_v38 = vld [vmem:[#allocation5 + $0x10c] ss:$12 sps:$4 sm:$0xff]  }
 0x2b3   :  { %2556 = vmatmul.mubr.bf16.gmra.mrb[168].mxu0 %v7696_v41  ;;  %7100 = vmatprep.mubr.bf16.mxu1 %v7708_v35 }
 0x2b4   :  { %2563 = vmatprep.mubr.bf16.mxu0 %v7697_v45  ;;  %v7732_v45 = vld [vmem:[#allocation5 + $0x170] ss:$12 sps:$4 sm:$0xff]  }
 0x2b5   :  { %v8902_v11 = vpop.f32.mrb[48].mxu1 }
 0x2b6   :  { %v1509_v23 = vpop.f32.mrb[49].mxu1 }
 0x2b7   :  { %v8904_v53 = vpop.f32.mrb[50].mxu1 }
 0x2b8   :  { %v1512_v58 = vpop.f32.mrb[51].mxu1 }
 0x2b9   :  { %v7718_v58 = vld [vmem:[#allocation5 + $0x124] ss:$12 sps:$4 sm:$0xff]  }
 0x2ba   :  { %7101 = vmatmul.mubr.bf16.gmra.mrb[156].mxu1 %v7709_v48  ;;  %v7715_v48 = vld [vmem:[#allocation5 + $0x108] ss:$12 sps:$4 sm:$0xff]  }
 0x2bb   :  { %2564 = vmatmul.mubr.bf16.gmra.mrb[172].mxu0 %v7699_v10  ;;  %7104 = vmatprep.mubr.bf16.mxu1 %v7716_v51  ;;  %v7739_v10 = vld [vmem:[#allocation5 + $0x188] ss:$12 sps:$4 sm:$0xff]  }
 0x2bc   :  { %2571 = vmatprep.mubr.bf16.mxu0 %v7702_v62 }
 0x2bd   :  { %v8906_v24 = vpop.f32.mrb[52].mxu1 }
 0x2be   :  { %v1517_v44 = vpop.f32.mrb[53].mxu1 }
 0x2bf   :  { %v8908_v13 = vpop.f32.mrb[54].mxu1 }
 0x2c0   :  { %v1520_v22 = vpop.f32.mrb[55].mxu1 }
 0x2c1   :  { %v7753_v22 = vld [vmem:[#allocation5 + $0x1b8] ss:$12 sps:$4 sm:$0xff]  }
 0x2c2   :  { %7105 = vmatmul.mubr.bf16.gmra.mrb[160].mxu1 %v7717_v9  ;;  %v7740_v9 = vld [vmem:[#allocation5 + $0x1a0] ss:$12 sps:$4 sm:$0xff]  }
 0x2c3   :  { %2572 = vmatmul.mubr.bf16.gmra.mrb[176].mxu0 %v7704_v25  ;;  %7108 = vmatprep.mubr.bf16.mxu1 %v7721_v29  ;;  %v7720_v29 = vld [vmem:[#allocation5 + $0x120] ss:$12 sps:$4 sm:$0xff]  }
 0x2c4   :  { %2579 = vmatprep.mubr.bf16.mxu0 %v7705_v18 }
 0x2c5   :  { %v8910_v39 = vpop.f32.mrb[56].mxu1 }
 0x2c6   :  { %v1525_v43 = vpop.f32.mrb[57].mxu1 }
 0x2c7   :  { %v8912_v55 = vpop.f32.mrb[58].mxu1  ;;  %v7723_v43 = vld [vmem:[#allocation5 + $0x13c] ss:$12 sps:$4 sm:$0xff]  }
 0x2c8   :  { %v1528_v59 = vpop.f32.mrb[59].mxu1 }
 0x2ca   :  { %7109 = vmatmul.mubr.bf16.gmra.mrb[164].mxu1 %v7722_v50 }
 0x2cb   :  { %2580 = vmatmul.mubr.bf16.gmra.mrb[180].mxu0 %v7707_v21  ;;  %7112 = vmatprep.mubr.bf16.mxu1 %v7726_v5  ;;  %v7754_v5 = vld [vmem:[#allocation5 + $0x1d0] ss:$12 sps:$4 sm:$0xff]  }
 0x2cc   :  { %2587 = vmatprep.mubr.bf16.mxu0 %v7710_v2  ;;  %v7725_v2 = vld [vmem:[#allocation5 + $0x138] ss:$12 sps:$4 sm:$0xff]  }
 0x2cd   :  { %v8914_v7 = vpop.f32.mrb[60].mxu1 }
 0x2ce   :  { %v1533_v15 = vpop.f32.mrb[61].mxu1 }
 0x2cf   :  { %v8916_v28 = vpop.f32.mrb[62].mxu1  ;;  %v7758_v15 = vld [vmem:[#allocation5 + $0x1e8] ss:$12 sps:$4 sm:$0xff]  }
 0x2d0   :  { %v1536_v31 = vpop.f32.mrb[63].mxu1 }
 0x2d2   :  { %7113 = vmatmul.mubr.bf16.gmra.mrb[168].mxu1 %v7727_v3 }
 0x2d3   :  { %2588 = vmatmul.mubr.bf16.gmra.mrb[184].mxu0 %v7712_v20  ;;  %7116 = vmatprep.mubr.bf16.mxu1 %v7731_v26  ;;  %v7728_v20 = vld [vmem:[#allocation5 + $0x154] ss:$12 sps:$4 sm:$0xff]  }
 0x2d4   :  { %2595 = vmatprep.mubr.bf16.mxu0 %v7713_v38  ;;  %v7759_v38 = vld [vmem:[#allocation5 + $0x200] ss:$12 sps:$4 sm:$0xff]  }
 0x2d5   :  { %v8918_v41 = vpop.f32.mrb[64].mxu1 }
 0x2d6   :  { %v1541_v35 = vpop.f32.mrb[65].mxu1 }
 0x2d7   :  { %v8920_v23 = vpop.f32.mrb[66].mxu1 }
 0x2d8   :  { %v1544_v51 = vpop.f32.mrb[67].mxu1 }
 0x2d9   :  { %v7733_v51 = vld [vmem:[#allocation5 + $0x16c] ss:$12 sps:$4 sm:$0xff]  }
 0x2da   :  { %7117 = vmatmul.mubr.bf16.gmra.mrb[172].mxu1 %v7732_v45  ;;  %v7730_v45 = vld [vmem:[#allocation5 + $0x150] ss:$12 sps:$4 sm:$0xff]  }
 0x2db   :  { %2596 = vmatmul.mubr.bf16.gmra.mrb[188].mxu0 %v7715_v48  ;;  %7120 = vmatprep.mubr.bf16.mxu1 %v7739_v10  ;;  %v7763_v48 = vld [vmem:[#allocation5 + $0x218] ss:$12 sps:$4 sm:$0xff]  }
 0x2dc   :  { %2603 = vmatprep.mubr.bf16.mxu0 %v7718_v58 }
 0x2dd   :  { %v8922_v62 = vpop.f32.mrb[68].mxu1 }
 0x2de   :  { %v1549_v44 = vpop.f32.mrb[69].mxu1 }
 0x2df   :  { %v8924_v25 = vpop.f32.mrb[70].mxu1 }
 0x2e0   :  { %v1552_v18 = vpop.f32.mrb[71].mxu1 }
 0x2e2   :  { %7121 = vmatmul.mubr.bf16.gmra.mrb[176].mxu1 %v7740_v9 }
 0x2e3   :  { %2604 = vmatmul.mubr.bf16.gmra.mrb[192].mxu0 %v7720_v29  ;;  %7124 = vmatprep.mubr.bf16.mxu1 %v7753_v22  ;;  %v7764_v29 = vld [vmem:[#allocation5 + $0x230] ss:$12 sps:$4 sm:$0xff]  }
 0x2e4   :  { %2611 = vmatprep.mubr.bf16.mxu0 %v7723_v43 }
 0x2e5   :  { %v8926_v50 = vpop.f32.mrb[72].mxu1 }
 0x2e6   :  { %v1557_v21 = vpop.f32.mrb[73].mxu1 }
 0x2e7   :  { %v8928_v59 = vpop.f32.mrb[74].mxu1  ;;  %v7735_v21 = vld [vmem:[#allocation5 + $0x168] ss:$12 sps:$4 sm:$0xff]  }
 0x2e8   :  { %v1560_v3 = vpop.f32.mrb[75].mxu1 }
 0x2ea   :  { %7125 = vmatmul.mubr.bf16.gmra.mrb[180].mxu1 %v7754_v5  ;;  %v7770_v5 = vld [vmem:[#allocation7 + $0x4] ss:$12 sps:$4 sm:$0xff]  }
 0x2eb   :  { %2612 = vmatmul.mubr.bf16.gmra.mrb[196].mxu0 %v7725_v2  ;;  %7128 = vmatprep.mubr.bf16.mxu1 %v7758_v15 }
 0x2ec   :  { %2619 = vmatprep.mubr.bf16.mxu0 %v7728_v20  ;;  %v7736_v20 = vld [vmem:[#allocation5 + $0x184] ss:$12 sps:$4 sm:$0xff]  }
 0x2ed   :  { %v8930_v26 = vpop.f32.mrb[76].mxu1 }
 0x2ee   :  { %v1565_v31 = vpop.f32.mrb[77].mxu1 }
 0x2ef   :  { %v8932_v35 = vpop.f32.mrb[78].mxu1 }
 0x2f0   :  { %v1568_v10 = vpop.f32.mrb[79].mxu1 }
 0x2f2   :  { %7129 = vmatmul.mubr.bf16.gmra.mrb[184].mxu1 %v7759_v38 }
 0x2f3   :  { %2620 = vmatmul.mubr.bf16.gmra.mrb[200].mxu0 %v7730_v45  ;;  %7132 = vmatprep.mubr.bf16.mxu1 %v7763_v48 }
 0x2f4   :  { %2627 = vmatprep.mubr.bf16.mxu0 %v7733_v51 }
 0x2f5   :  { %v8934_v58 = vpop.f32.mrb[80].mxu1 }
 0x2f6   :  { %v1573_v44 = vpop.f32.mrb[81].mxu1  ;;  %v7026_v9 = vpop.f32.mrb[96].mxu0 }
 0x2f7   :  { %v1741_v22 = vadd.f32 %v7026_v9, %v8906_v24  ;;  %v8937_v18 = vpop.f32.mrb[82].mxu1  ;;  %v1732_v43 = vpop.f32.mrb[97].mxu0 }
 0x2f8   :  { %v1733_v2 = vadd.f32 %v1732_v43, %v8902_v11  ;;  %v1576_v15 = vpop.f32.mrb[83].mxu1  ;;  %v7027_v3 = vpop.f32.mrb[98].mxu0 }
 0x2f9   :  { %v1744_v31 = vadd.f32 %v7027_v3, %v8908_v13  ;;  %v1735_v38 = vpop.f32.mrb[99].mxu0  ;;  %v1925_v48 = vmax.f32 %v1741_v22, 0.0 }
 0x2fa   :  { %v1736_v45 = vadd.f32 %v1735_v38, %v8904_v53  ;;  %7133 = vmatmul.mubr.bf16.gmra.mrb[188].mxu1 %v7764_v29  ;;  %v1923_v24 = vmax.f32 %v1733_v2, 0.0  ;;  %v7738_v53 = vld [vmem:[#allocation5 + $0x180] ss:$12 sps:$4 sm:$0xff]  }
 0x2fb   :  { %v1926_v10 = vmax.f32 %v1744_v31, 0.0  ;;  %2628 = vmatmul.mubr.bf16.gmra.mrb[204].mxu0 %v7735_v21  ;;  %3509 = vmatprep.mubr.bf16.mxu1 %v7770_v5  ;;  %v7741_v5 = vld [vmem:[#allocation5 + $0x19c] ss:$12 sps:$4 sm:$0xff]  }
 0x2fc   :  { %v1924_v51 = vmax.f32 %v1736_v45, 0.0  ;;  %2635 = vmatprep.mubr.bf16.mxu0 %v7736_v20 }
 0x2fd   :  { %v3070_v44 = vpack.c.bf16 %v1926_v10, %v1925_v48  ;;  %v8942_v9 = vpop.f32.mrb[84].mxu1 }
 0x2fe   :  { %v3069_v11 = vpack.c.bf16 %v1924_v51, %v1923_v24  ;;  %v1581_v43 = vpop.f32.mrb[85].mxu1  ;;  %v7030_v15 = vpop.f32.mrb[100].mxu0 }
 0x2ff   :  { %v1757_v8 = vadd.f32 %v7030_v15, %v8914_v7  ;;  %v8945_v13 = vpop.f32.mrb[86].mxu1  ;;  %v1748_v3 = vpop.f32.mrb[101].mxu0 }
 0x300   :  { %v1749_v29 = vadd.f32 %v1748_v3, %v8910_v39  ;;  %v1584_v22 = vpop.f32.mrb[87].mxu1  ;;  %v7031_v21 = vpop.f32.mrb[102].mxu0  ;;  %3478 = vmatpush1.bf16.msra.mxu1 %v3069_v11 }
 0x301   :  { %v1760_v2 = vadd.f32 %v7031_v21, %v8916_v28  ;;  %v1751_v20 = vpop.f32.mrb[103].mxu0  ;;  %3479 = vmatprep.subr.bf16.mxu1 %v9649_v60  ;;  %v1929_v38 = vmax.f32 %v1757_v8, 0.0  ;;  %v7743_v8 = vld [vmem:[#allocation5 + $0x198] ss:$12 sps:$4 sm:$0xff]  }
 0x302   :  { %v1752_v31 = vadd.f32 %v1751_v20, %v8912_v55  ;;  %v1927_v7 = vmax.f32 %v1749_v29, 0.0 }
 0x303   :  { %v1930_v45 = vmax.f32 %v1760_v2, 0.0  ;;  %2636 = vmatmul.mubr.bf16.gmra.mrb[208].mxu0 %v7738_v53 }
 0x304   :  { %v1928_v48 = vmax.f32 %v1752_v31, 0.0  ;;  %3480 = vmatpush1.bf16.msra.mxu1 %v3070_v44  ;;  %2643 = vmatprep.mubr.bf16.mxu0 %v7741_v5  ;;  %v7744_v44 = vld [vmem:[#allocation5 + $0x1b4] ss:$12 sps:$4 sm:$0xff]  }
 0x305   :  { %v3072_v10 = vpack.c.bf16 %v1930_v45, %v1929_v38  ;;  %v8951_v39 = vpop.f32.mrb[88].mxu1  ;;  %3481 = vmatprep.subr.bf16.mxu1 %v9649_v60 }
 0x306   :  { %v3071_v24 = vpack.c.bf16 %v1928_v48, %v1927_v7  ;;  %v1589_v51 = vpop.f32.mrb[89].mxu1  ;;  %v7034_v28 = vpop.f32.mrb[104].mxu0 }
 0x307   :  { %v1773_v11 = vadd.f32 %v7034_v28, %v8922_v62  ;;  %v8955_v43 = vpop.f32.mrb[90].mxu1  ;;  %v1764_v55 = vpop.f32.mrb[105].mxu0  ;;  %v7746_v51 = vld [vmem:[#allocation5 + $0x1b0] ss:$12 sps:$4 sm:$0xff]  }
 0x308   :  { %v1765_v15 = vadd.f32 %v1764_v55, %v8918_v41  ;;  %v1592_v3 = vpop.f32.mrb[91].mxu1  ;;  %v7035_v53 = vpop.f32.mrb[106].mxu0  ;;  %3482 = vmatpush1.bf16.msra.mxu1 %v3071_v24  ;;  %v7747_v55 = vld [vmem:[#allocation5 + $0x1cc] ss:$12 sps:$4 sm:$0xff]  }
 0x309   :  { %v1776_v29 = vadd.f32 %v7035_v53, %v8924_v25  ;;  %v1767_v22 = vpop.f32.mrb[107].mxu0  ;;  %3483 = vmatprep.subr.bf16.mxu1 %v9649_v60  ;;  %v1933_v5 = vmax.f32 %v1773_v11, 0.0 }
 0x30a   :  { %v1768_v21 = vadd.f32 %v1767_v22, %v8920_v23  ;;  %v1931_v62 = vmax.f32 %v1765_v15, 0.0 }
 0x30b   :  { %v1934_v2 = vmax.f32 %v1776_v29, 0.0  ;;  %2644 = vmatmul.mubr.bf16.gmra.mrb[212].mxu0 %v7743_v8 }
 0x30c   :  { %v1932_v20 = vmax.f32 %v1768_v21, 0.0  ;;  %3484 = vmatpush1.bf16.msra.mxu1 %v3072_v10  ;;  %2651 = vmatprep.mubr.bf16.mxu0 %v7744_v44 }
 0x30d   :  { %v3074_v31 = vpack.c.bf16 %v1934_v2, %v1933_v5  ;;  %v1595_v41 = vpop.f32.mrb[92].mxu1  ;;  %3485 = vmatprep.subr.bf16.mxu1 %v9649_v60 }
 0x30e   :  { %v3073_v38 = vpack.c.bf16 %v1932_v20, %v1931_v62  ;;  %v1597_v45 = vpop.f32.mrb[93].mxu1  ;;  %v7038_v7 = vpop.f32.mrb[108].mxu0 }
 0x30f   :  { %v1789_v25 = vadd.f32 %v7038_v7, %v8930_v26  ;;  %v1598_v48 = vpop.f32.mrb[94].mxu1  ;;  %v1780_v24 = vpop.f32.mrb[109].mxu0 }
 0x310   :  { %v1781_v23 = vadd.f32 %v1780_v24, %v8926_v50  ;;  %v1600_v28 = vpop.f32.mrb[95].mxu1  ;;  %v7039_v11 = vpop.f32.mrb[110].mxu0  ;;  %3486 = vmatpush1.bf16.msra.mxu1 %v3073_v38 }
 0x311   :  { %v1792_v10 = vadd.f32 %v7039_v11, %v8932_v35  ;;  %v1783_v8 = vpop.f32.mrb[111].mxu0  ;;  %3487 = vmatprep.subr.bf16.mxu1 %v9649_v60  ;;  %v1937_v3 = vmax.f32 %v1789_v25, 0.0 }
 0x312   :  { %v1784_v15 = vadd.f32 %v1783_v8, %v8928_v59  ;;  %v1935_v26 = vmax.f32 %v1781_v23, 0.0  ;;  %v7749_v59 = vld [vmem:[#allocation5 + $0x1c8] ss:$12 sps:$4 sm:$0xff]  }
 0x313   :  { %v1938_v53 = vmax.f32 %v1792_v10, 0.0  ;;  %2652 = vmatmul.mubr.bf16.gmra.mrb[216].mxu0 %v7746_v51 }
 0x314   :  { %v1936_v44 = vmax.f32 %v1784_v15, 0.0  ;;  %3488 = vmatpush1.bf16.msra.mxu1 %v3074_v31  ;;  %2659 = vmatprep.mubr.bf16.mxu0 %v7747_v55  ;;  %v7750_v31 = vld [vmem:[#allocation5 + $0x1e4] ss:$12 sps:$4 sm:$0xff]  }
 0x315   :  { %v3076_v29 = vpack.c.bf16 %v1938_v53, %v1937_v3  ;;  %v1603_v50 = vpop.f32.mrb[96].mxu1  ;;  %3489 = vmatprep.subr.bf16.mxu1 %v9649_v60  ;;  %v7752_v53 = vld [vmem:[#allocation5 + $0x1e0] ss:$12 sps:$4 sm:$0xff]  }
 0x316   :  { %v3075_v22 = vpack.c.bf16 %v1936_v44, %v1935_v26  ;;  %v1605_v21 = vpop.f32.mrb[97].mxu1  ;;  %v7042_v5 = vpop.f32.mrb[112].mxu0 }
 0x317   :  { %v1805_v35 = vadd.f32 %v7042_v5, %v8942_v9  ;;  %v8969_v2 = vpop.f32.mrb[98].mxu1  ;;  %v1796_v62 = vpop.f32.mrb[113].mxu0 }
 0x318   :  { %v1797_v20 = vadd.f32 %v1796_v62, %v8934_v58  ;;  %v1608_v38 = vpop.f32.mrb[99].mxu1  ;;  %v7043_v45 = vpop.f32.mrb[114].mxu0  ;;  %3490 = vmatpush1.bf16.msra.mxu1 %v3075_v22  ;;  %v7755_v22 = vld [vmem:[#allocation5 + $0x1fc] ss:$12 sps:$4 sm:$0xff]  }
 0x319   :  { %v1808_v7 = vadd.f32 %v7043_v45, %v8945_v13  ;;  %v1799_v25 = vpop.f32.mrb[115].mxu0  ;;  %3491 = vmatprep.subr.bf16.mxu1 %v9649_v60  ;;  %v1941_v51 = vmax.f32 %v1805_v35, 0.0 }
 0x31a   :  { %v1800_v24 = vadd.f32 %v1799_v25, %v8937_v18  ;;  %v1939_v9 = vmax.f32 %v1797_v20, 0.0 }
 0x31b   :  { %v1942_v23 = vmax.f32 %v1808_v7, 0.0  ;;  %2660 = vmatmul.mubr.bf16.gmra.mrb[220].mxu0 %v7749_v59 }
 0x31c   :  { %v1940_v28 = vmax.f32 %v1800_v24, 0.0  ;;  %3492 = vmatpush1.bf16.msra.mxu1 %v3076_v29  ;;  %2667 = vmatprep.mubr.bf16.mxu0 %v7750_v31  ;;  %v7757_v24 = vld [vmem:[#allocation5 + $0x1f8] ss:$12 sps:$4 sm:$0xff]  }
 0x31d   :  { %v3078_v11 = vpack.c.bf16 %v1942_v23, %v1941_v51  ;;  %v1611_v58 = vpop.f32.mrb[100].mxu1  ;;  %3493 = vmatprep.subr.bf16.mxu1 %v9649_v60 }
 0x31e   :  { %v3077_v55 = vpack.c.bf16 %v1940_v28, %v1939_v9  ;;  %v1613_v10 = vpop.f32.mrb[101].mxu1  ;;  %v7046_v8 = vpop.f32.mrb[116].mxu0  ;;  %v7760_v9 = vld [vmem:[#allocation5 + $0x214] ss:$12 sps:$4 sm:$0xff]  }
 0x31f   :  { %v1821_v13 = vadd.f32 %v7046_v8, %v1595_v41  ;;  %v1614_v15 = vpop.f32.mrb[102].mxu1  ;;  %v1812_v3 = vpop.f32.mrb[117].mxu0 }
 0x320   :  { %v1813_v18 = vadd.f32 %v1812_v3, %v8951_v39  ;;  %v1616_v26 = vpop.f32.mrb[103].mxu1  ;;  %v7047_v44 = vpop.f32.mrb[118].mxu0  ;;  %3494 = vmatpush1.bf16.msra.mxu1 %v3077_v55 }
 0x321   :  { %v1824_v21 = vadd.f32 %v7047_v44, %v1598_v48  ;;  %v1815_v29 = vpop.f32.mrb[119].mxu0  ;;  %3495 = vmatprep.subr.bf16.mxu1 %v9649_v60  ;;  %v1945_v35 = vmax.f32 %v1821_v13, 0.0 }
 0x322   :  { %v1816_v5 = vadd.f32 %v1815_v29, %v8955_v43  ;;  %v1943_v59 = vmax.f32 %v1813_v18, 0.0 }
 0x323   :  { %v1946_v62 = vmax.f32 %v1824_v21, 0.0  ;;  %2668 = vmatmul.mubr.bf16.gmra.mrb[224].mxu0 %v7752_v53  ;;  %v7762_v21 = vld [vmem:[#allocation5 + $0x210] ss:$12 sps:$4 sm:$0xff]  }
 0x324   :  { %v1944_v41 = vmax.f32 %v1816_v5, 0.0  ;;  %3496 = vmatpush1.bf16.msra.mxu1 %v3078_v11  ;;  %2675 = vmatprep.mubr.bf16.mxu0 %v7755_v22 }
 0x325   :  { %v3080_v20 = vpack.c.bf16 %v1946_v62, %v1945_v35  ;;  %v1619_v38 = vpop.f32.mrb[104].mxu1  ;;  %3497 = vmatprep.subr.bf16.mxu1 %v9649_v60  ;;  %v7765_v35 = vld [vmem:[#allocation5 + $0x22c] ss:$12 sps:$4 sm:$0xff]  }
 0x326   :  { %v3079_v39 = vpack.c.bf16 %v1944_v41, %v1943_v59  ;;  %v1621_v45 = vpop.f32.mrb[105].mxu1  ;;  %v7050_v31 = vpop.f32.mrb[120].mxu0 }
 0x327   :  { %v1837_v48 = vadd.f32 %v7050_v31, %v1611_v58  ;;  %v1622_v7 = vpop.f32.mrb[106].mxu1  ;;  %v1828_v25 = vpop.f32.mrb[121].mxu0 }
 0x328   :  { %v1829_v51 = vadd.f32 %v1828_v25, %v1603_v50  ;;  %v1624_v43 = vpop.f32.mrb[107].mxu1  ;;  %v7051_v23 = vpop.f32.mrb[122].mxu0  ;;  %3498 = vmatpush1.bf16.msra.mxu1 %v3079_v39 }
 0x329   :  { %v1840_v28 = vadd.f32 %v7051_v23, %v1614_v15  ;;  %v1831_v55 = vpop.f32.mrb[123].mxu0  ;;  %3499 = vmatprep.subr.bf16.mxu1 %v9649_v60  ;;  %v1949_v10 = vmax.f32 %v1837_v48, 0.0 }
 0x32a   :  { %v1832_v11 = vadd.f32 %v1831_v55, %v8969_v2  ;;  %v1947_v13 = vmax.f32 %v1829_v51, 0.0 }
 0x32b   :  { %v1950_v8 = vmax.f32 %v1840_v28, 0.0  ;;  %2676 = vmatmul.mubr.bf16.gmra.mrb[228].mxu0 %v7757_v24 }
 0x32c   :  { %v1948_v3 = vmax.f32 %v1832_v11, 0.0  ;;  %3500 = vmatpush1.bf16.msra.mxu1 %v3080_v20  ;;  %2683 = vmatprep.mubr.bf16.mxu0 %v7760_v9  ;;  %v7767_v9 = vld [vmem:[#allocation5 + $0x228] ss:$12 sps:$4 sm:$0xff]  }
 0x32d   :  { %v3082_v58 = vpack.c.bf16 %v1950_v8, %v1949_v10  ;;  %v1627_v53 = vpop.f32.mrb[108].mxu1  ;;  %3501 = vmatprep.subr.bf16.mxu1 %v9649_v60  ;;  %v7771_v11 = vld [vmem:[#allocation7 + $0x8] ss:$12 sps:$4 sm:$0xff]  }
 0x32e   :  { %v3081_v50 = vpack.c.bf16 %v1948_v3, %v1947_v13  ;;  %v1629_v18 = vpop.f32.mrb[109].mxu1  ;;  %v7054_v26 = vpop.f32.mrb[124].mxu0  ;;  %v7768_v13 = vld [vmem:[#allocation7] ss:$12 sps:$4 sm:$0xff]  }
 0x32f   :  { %v1853_v15 = vadd.f32 %v7054_v26, %v1627_v53  ;;  %v1630_v44 = vpop.f32.mrb[110].mxu1  ;;  %v1844_v22 = vpop.f32.mrb[125].mxu0  ;;  %v7773_v53 = vld [vmem:[#allocation7 + $0x1c] ss:$12 sps:$4 sm:$0xff]  }
 0x330   :  { %v1845_v29 = vadd.f32 %v1844_v22, %v1619_v38  ;;  %v1632_v2 = vpop.f32.mrb[111].mxu1  ;;  %v7055_v5 = vpop.f32.mrb[126].mxu0  ;;  %3502 = vmatpush1.bf16.msra.mxu1 %v3081_v50 }
 0x331   :  { %v1856_v62 = vadd.f32 %v7055_v5, %v1630_v44  ;;  %v1847_v59 = vpop.f32.mrb[127].mxu0  ;;  %3503 = vmatprep.subr.bf16.mxu1 %v9649_v60  ;;  %v1953_v20 = vmax.f32 %v1853_v15, 0.0 }
 0x332   :  { %v1848_v41 = vadd.f32 %v1847_v59, %v1622_v7  ;;  %v1951_v45 = vmax.f32 %v1845_v29, 0.0 }
 0x333   :  { %v1954_v39 = vmax.f32 %v1856_v62, 0.0  ;;  %2684 = vmatmul.mubr.bf16.gmra.mrb[232].mxu0 %v7762_v21 }
 0x334   :  { %v1952_v31 = vmax.f32 %v1848_v41, 0.0  ;;  %3504 = vmatpush1.bf16.msra.mxu1 %v3082_v58  ;;  %2691 = vmatprep.mubr.bf16.mxu0 %v7765_v35  ;;  %v7775_v41 = vld [vmem:[#allocation7 + $0x18] ss:$12 sps:$4 sm:$0xff]  }
 0x335   :  { %v3084_v48 = vpack.c.bf16 %v1954_v39, %v1953_v20  ;;  %v1635_v25 = vpop.f32.mrb[112].mxu1  ;;  %3505 = vmatprep.subr.bf16.mxu1 %v9649_v60  ;;  %v7778_v39 = vld [vmem:[#allocation7 + $0x34] ss:$12 sps:$4 sm:$0xff]  }
 0x336   :  { %v3083_v38 = vpack.c.bf16 %v1952_v31, %v1951_v45  ;;  %v1637_v24 = vpop.f32.mrb[113].mxu1  ;;  %v7058_v51 = vpop.f32.mrb[128].mxu0 }
 0x337   :  { %v1638_v43 = vpop.f32.mrb[114].mxu1  ;;  %v1860_v23 = vpop.f32.mrb[129].mxu0 }
 0x338   :  { %v1861_v28 = vadd.f32 %v1860_v23, %v1635_v25  ;;  %v1640_v55 = vpop.f32.mrb[115].mxu1  ;;  %v7059_v7 = vpop.f32.mrb[130].mxu0  ;;  %3506 = vmatpush1.bf16.msra.mxu1 %v3083_v38 }
 0x339   :  { %v1863_v10 = vpop.f32.mrb[131].mxu0  ;;  %3507 = vmatprep.subr.bf16.mxu1 %v9649_v60 }
 0x33a   :  { %v1864_v8 = vadd.f32 %v1863_v10, %v1638_v43  ;;  %v1955_v3 = vmax.f32 %v1861_v28, 0.0  ;;  %v7783_v10 = vld [vmem:[#allocation7 + $0x4c] ss:$12 sps:$4 sm:$0xff]  }
 0x33b   :  { %2692 = vmatmul.mubr.bf16.gmra.mrb[236].mxu0 %v7767_v9 }
 0x33c   :  { %v1956_v58 = vmax.f32 %v1864_v8, 0.0  ;;  %3508 = vmatpush1.bf16.msra.mxu1 %v3084_v48  ;;  %7152 = vmatprep.mubr.bf16.mxu0 %v7771_v11 }
 0x33d   :  { %v1643_v50 = vpop.f32.mrb[116].mxu1 }
 0x33e   :  { %v1869_v18 = vadd.f32 %v7058_v51, %v1643_v50  ;;  %v1645_v26 = vpop.f32.mrb[117].mxu1  ;;  %v3085_v15 = vpack.c.bf16 %v1956_v58, %v1955_v3  ;;  %v7062_v44 = vpop.f32.mrb[132].mxu0 }
 0x33f   :  { %v1646_v22 = vpop.f32.mrb[118].mxu1  ;;  %v1876_v21 = vpop.f32.mrb[133].mxu0  ;;  %3510 = vmatmul.mubr.bf16.vlgmr.msra.gmra.mrb[192].mxu1 %v7768_v13 }
 0x340   :  { %v1872_v29 = vadd.f32 %v7059_v7, %v1646_v22  ;;  %7136 = vmatprep.subr.bf16.mxu0 %v3085_v15  ;;  %v1648_v2 = vpop.f32.mrb[119].mxu1  ;;  %v7063_v5 = vpop.f32.mrb[134].mxu0  ;;  %3517 = vmatprep.mubr.bf16.mxu1 %v7773_v53  ;;  %v1957_v62 = vmax.f32 %v1869_v18, 0.0  ;;  %v7780_v7 = vld [vmem:[#allocation7 + $0x30] ss:$12 sps:$4 sm:$0xff]  }
 0x341   :  { %7137 = vmatpush3.bf16.msra.mxu0 %v3085_v15  ;;  %v1879_v35 = vpop.f32.mrb[135].mxu0  ;;  %v7785_v2 = vld [vmem:[#allocation7 + $0x48] ss:$12 sps:$4 sm:$0xff]  }
 0x342   :  { %v1958_v59 = vmax.f32 %v1872_v29, 0.0 }
 0x344   :  { %v3086_v20 = vpack.c.bf16 %v1958_v59, %v1957_v62  ;;  %v7788_v62 = vld [vmem:[#allocation7 + $0x64] ss:$12 sps:$4 sm:$0xff]  }
 0x345   :  { %v1651_v45 = vpop.f32.mrb[120].mxu1 }
 0x346   :  { %7138 = vmatprep.subr.bf16.mxu0 %v3086_v20  ;;  %v1877_v31 = vadd.f32 %v1876_v21, %v1651_v45  ;;  %v1653_v48 = vpop.f32.mrb[121].mxu1  ;;  %v7066_v25 = vpop.f32.mrb[136].mxu0 }
 0x347   :  { %7139 = vmatpush3.bf16.msra.mxu0 %v3086_v20  ;;  %v1654_v38 = vpop.f32.mrb[122].mxu1  ;;  %v1892_v24 = vpop.f32.mrb[137].mxu0  ;;  %3518 = vmatmul.mubr.bf16.gmra.mrb[196].mxu1 %v7775_v41 }
 0x348   :  { %v1880_v51 = vadd.f32 %v1879_v35, %v1654_v38  ;;  %v1656_v43 = vpop.f32.mrb[123].mxu1  ;;  %v7067_v23 = vpop.f32.mrb[138].mxu0  ;;  %3525 = vmatprep.mubr.bf16.mxu1 %v7778_v39  ;;  %v1959_v28 = vmax.f32 %v1877_v31, 0.0 }
 0x349   :  { %v1895_v9 = vpop.f32.mrb[139].mxu0 }
 0x34a   :  { %v1960_v55 = vmax.f32 %v1880_v51, 0.0 }
 0x34c   :  { %v3087_v11 = vpack.c.bf16 %v1960_v55, %v1959_v28  ;;  %v7790_v28 = vld [vmem:[#allocation7 + $0x60] ss:$12 sps:$4 sm:$0xff]  }
 0x34d   :  { %v1659_v8 = vpop.f32.mrb[124].mxu1 }
 0x34e   :  { %v1885_v13 = vadd.f32 %v7062_v44, %v1659_v8  ;;  %v1661_v3 = vpop.f32.mrb[125].mxu1  ;;  %7140 = vmatprep.subr.bf16.mxu0 %v3087_v11  ;;  %v8986_v58 = vpop.f32.mrb[140].mxu0 }
 0x34f   :  { %v1662_v53 = vpop.f32.mrb[126].mxu1  ;;  %7141 = vmatpush3.bf16.msra.mxu0 %v3087_v11  ;;  %v1908_v50 = vpop.f32.mrb[141].mxu0  ;;  %3526 = vmatmul.mubr.bf16.gmra.mrb[200].mxu1 %v7780_v7  ;;  %v7793_v7 = vld [vmem:[#allocation7 + $0x7c] ss:$12 sps:$4 sm:$0xff]  }
 0x350   :  { %v1888_v18 = vadd.f32 %v7063_v5, %v1662_v53  ;;  %v1664_v26 = vpop.f32.mrb[127].mxu1  ;;  %v8988_v15 = vpop.f32.mrb[142].mxu0  ;;  %3533 = vmatprep.mubr.bf16.mxu1 %v7783_v10  ;;  %v1961_v21 = vmax.f32 %v1885_v13, 0.0 }
 0x351   :  { %v1911_v22 = vpop.f32.mrb[143].mxu0 }
 0x352   :  { %v1962_v29 = vmax.f32 %v1888_v18, 0.0 }
 0x354   :  { %v3088_v35 = vpack.c.bf16 %v1962_v29, %v1961_v21 }
 0x355   :  { %v1667_v44 = vpop.f32.mrb[128].mxu1 }
 0x356   :  { %v1893_v59 = vadd.f32 %v1892_v24, %v1667_v44  ;;  %v1669_v41 = vpop.f32.mrb[129].mxu1  ;;  %7142 = vmatprep.subr.bf16.mxu0 %v3088_v35  ;;  %v8990_v20 = vpop.f32.mrb[144].mxu0 }
 0x357   :  { %v1670_v39 = vpop.f32.mrb[130].mxu1  ;;  %7143 = vmatpush3.bf16.msra.mxu0 %v3088_v35  ;;  %v2511_v45 = vpop.f32.mrb[145].mxu0  ;;  %3534 = vmatmul.mubr.bf16.gmra.mrb[204].mxu1 %v7785_v2  ;;  %v7795_v2 = vld [vmem:[#allocation7 + $0x78] ss:$12 sps:$4 sm:$0xff]  }
 0x358   :  { %v1896_v5 = vadd.f32 %v1895_v9, %v1670_v39  ;;  %v1672_v31 = vpop.f32.mrb[131].mxu1  ;;  %v8992_v48 = vpop.f32.mrb[146].mxu0  ;;  %3541 = vmatprep.mubr.bf16.mxu1 %v7788_v62  ;;  %v1963_v51 = vmax.f32 %v1893_v59, 0.0  ;;  %v7798_v62 = vld [vmem:[#allocation7 + $0x94] ss:$12 sps:$4 sm:$0xff]  }
 0x359   :  { %v2514_v38 = vpop.f32.mrb[147].mxu0 }
 0x35a   :  { %v1964_v43 = vmax.f32 %v1896_v5, 0.0 }
 0x35c   :  { %v3089_v55 = vpack.c.bf16 %v1964_v43, %v1963_v51 }
 0x35d   :  { %v1675_v24 = vpop.f32.mrb[132].mxu1 }
 0x35e   :  { %v1901_v11 = vadd.f32 %v7066_v25, %v1675_v24  ;;  %v1677_v10 = vpop.f32.mrb[133].mxu1  ;;  %7144 = vmatprep.subr.bf16.mxu0 %v3089_v55  ;;  %v2517_v8 = vpop.f32.mrb[148].mxu0 }
 0x35f   :  { %v1678_v13 = vpop.f32.mrb[134].mxu1  ;;  %7145 = vmatpush3.bf16.msra.mxu0 %v3089_v55  ;;  %v2519_v3 = vpop.f32.mrb[149].mxu0  ;;  %3542 = vmatmul.mubr.bf16.gmra.mrb[208].mxu1 %v7790_v28  ;;  %v7800_v28 = vld [vmem:[#allocation7 + $0x90] ss:$12 sps:$4 sm:$0xff]  }
 0x360   :  { %v1904_v9 = vadd.f32 %v7067_v23, %v1678_v13  ;;  %v1680_v53 = vpop.f32.mrb[135].mxu1  ;;  %v2520_v18 = vpop.f32.mrb[150].mxu0  ;;  %3549 = vmatprep.mubr.bf16.mxu1 %v7793_v7  ;;  %v1965_v21 = vmax.f32 %v1901_v11, 0.0  ;;  %v7803_v7 = vld [vmem:[#allocation7 + $0xac] ss:$12 sps:$4 sm:$0xff]  }
 0x361   :  { %v2522_v26 = vpop.f32.mrb[151].mxu0 }
 0x362   :  { %v1966_v29 = vmax.f32 %v1904_v9, 0.0 }
 0x364   :  { %v3090_v35 = vpack.c.bf16 %v1966_v29, %v1965_v21 }
 0x365   :  { %v1683_v44 = vpop.f32.mrb[136].mxu1 }
 0x366   :  { %v1909_v59 = vadd.f32 %v1908_v50, %v1683_v44  ;;  %v1685_v25 = vpop.f32.mrb[137].mxu1  ;;  %7146 = vmatprep.subr.bf16.mxu0 %v3090_v35  ;;  %v8994_v41 = vpop.f32.mrb[152].mxu0 }
 0x367   :  { %v1686_v39 = vpop.f32.mrb[138].mxu1  ;;  %7147 = vmatpush3.bf16.msra.mxu0 %v3090_v35  ;;  %v2527_v45 = vpop.f32.mrb[153].mxu0  ;;  %3550 = vmatmul.mubr.bf16.gmra.mrb[212].mxu1 %v7795_v2  ;;  %v7805_v2 = vld [vmem:[#allocation7 + $0xa8] ss:$12 sps:$4 sm:$0xff]   ;;  %v7772_v25 = vld [vmem:[#allocation7 + $0x20] ss:$12 sps:$4 sm:$0xff]  }
 0x368   :  { %v1912_v23 = vadd.f32 %v1911_v22, %v1686_v39  ;;  %v1688_v5 = vpop.f32.mrb[139].mxu1  ;;  %v8996_v31 = vpop.f32.mrb[154].mxu0  ;;  %3557 = vmatprep.mubr.bf16.mxu1 %v7798_v62  ;;  %v1967_v51 = vmax.f32 %v1909_v59, 0.0  ;;  %v7808_v62 = vld [vmem:[#allocation7 + $0xc4] ss:$12 sps:$4 sm:$0xff]  }
 0x369   :  { %v2530_v38 = vpop.f32.mrb[155].mxu0 }
 0x36a   :  { %v1968_v43 = vmax.f32 %v1912_v23, 0.0 }
 0x36c   :  { %v3091_v55 = vpack.c.bf16 %v1968_v43, %v1967_v51 }
 0x36d   :  { %v1691_v50 = vpop.f32.mrb[140].mxu1 }
 0x36e   :  { %v1917_v24 = vadd.f32 %v8986_v58, %v1691_v50  ;;  %v1693_v11 = vpop.f32.mrb[141].mxu1  ;;  %7148 = vmatprep.subr.bf16.mxu0 %v3091_v55  ;;  %v2533_v10 = vpop.f32.mrb[156].mxu0 }
 0x36f   :  { %v1694_v13 = vpop.f32.mrb[142].mxu1  ;;  %7149 = vmatpush3.bf16.msra.mxu0 %v3091_v55  ;;  %v2535_v3 = vpop.f32.mrb[157].mxu0  ;;  %3558 = vmatmul.mubr.bf16.gmra.mrb[216].mxu1 %v7800_v28 }
 0x370   :  { %v1920_v22 = vadd.f32 %v8988_v15, %v1694_v13  ;;  %v1696_v9 = vpop.f32.mrb[143].mxu1  ;;  %v2536_v53 = vpop.f32.mrb[158].mxu0  ;;  %3565 = vmatprep.mubr.bf16.mxu1 %v7803_v7  ;;  %v1969_v21 = vmax.f32 %v1917_v24, 0.0  ;;  %v7776_v15 = vld [vmem:[#allocation7 + $0x38] ss:$12 sps:$4 sm:$0xff]  }
 0x371   :  { %v2538_v26 = vpop.f32.mrb[159].mxu0  ;;  %v7813_v13 = vld [vmem:[#allocation7 + $0xdc] ss:$12 sps:$4 sm:$0xff]  }
 0x372   :  { %v1970_v29 = vmax.f32 %v1920_v22, 0.0  ;;  %v7777_v9 = vld [vmem:[#allocation7 + $0x50] ss:$12 sps:$4 sm:$0xff]  }
 0x374   :  { %v3092_v35 = vpack.c.bf16 %v1970_v29, %v1969_v21 }
 0x375   :  { %v7090_v44 = vpop.f32.mrb[144].mxu1 }
 0x376   :  { %v2734_v58 = vpop.f32.mrb[145].mxu1  ;;  %7150 = vmatprep.subr.bf16.mxu0 %v3092_v35  ;;  %v2743_v59 = vadd.f32 %v7090_v44, %v2517_v8  ;;  %v2541_v39 = vpop.f32.mrb[160].mxu0 }
 0x377   :  { %v2735_v45 = vadd.f32 %v2734_v58, %v8990_v20  ;;  %v7091_v23 = vpop.f32.mrb[146].mxu1  ;;  %7151 = vmatpush3.bf16.msra.mxu0 %v3092_v35  ;;  %v2543_v5 = vpop.f32.mrb[161].mxu0  ;;  %3566 = vmatmul.mubr.bf16.gmra.mrb[220].mxu1 %v7805_v2  ;;  %v7810_v20 = vld [vmem:[#allocation7 + $0xc0] ss:$12 sps:$4 sm:$0xff]   ;;  %v7781_v2 = vld [vmem:[#allocation7 + $0x68] ss:$12 sps:$4 sm:$0xff]  }
 0x378   :  { %v2737_v38 = vpop.f32.mrb[147].mxu1  ;;  %v2746_v51 = vadd.f32 %v7091_v23, %v2520_v18  ;;  %4431 = vmatprep.subr.bf16.mxu0 %v9649_v60  ;;  %v2544_v43 = vpop.f32.mrb[162].mxu0  ;;  %3573 = vmatprep.mubr.bf16.mxu1 %v7808_v62  ;;  %v2927_v7 = vmax.f32 %v2743_v59, 0.0 }
 0x379   :  { %v2738_v28 = vadd.f32 %v2737_v38, %v8992_v48  ;;  %v2546_v55 = vpop.f32.mrb[163].mxu0  ;;  %v2925_v50 = vmax.f32 %v2735_v45, 0.0  ;;  %v7818_v38 = vld [vmem:[#allocation7 + $0xf4] ss:$12 sps:$4 sm:$0xff]  }
 0x37a   :  { %7153 = vmatmul.mubr.bf16.vlgmr.msra.gmra.mrb[240].mxu0 %v7772_v25  ;;  %v2928_v8 = vmax.f32 %v2746_v51, 0.0 }
 0x37b   :  { %v2926_v24 = vmax.f32 %v2738_v28, 0.0  ;;  %7156 = vmatprep.mubr.bf16.mxu0 %v7776_v15 }
 0x37c   :  { %v4024_v11 = vpack.c.bf16 %v2928_v8, %v2927_v7 }
 0x37d   :  { %v4023_v3 = vpack.c.bf16 %v2926_v24, %v2925_v50  ;;  %v7094_v22 = vpop.f32.mrb[148].mxu1 }
 0x37e   :  { %v2750_v18 = vpop.f32.mrb[149].mxu1  ;;  %v2759_v26 = vadd.f32 %v7094_v22, %v2533_v10  ;;  %v2549_v21 = vpop.f32.mrb[164].mxu0 }
 0x37f   :  { %4432 = vmatpush1.bf16.msra.mxu0 %v4023_v3  ;;  %v2751_v29 = vadd.f32 %v2750_v18, %v8994_v41  ;;  %v7095_v48 = vpop.f32.mrb[150].mxu1  ;;  %v2551_v35 = vpop.f32.mrb[165].mxu0  ;;  %3574 = vmatmul.mubr.bf16.gmra.mrb[224].mxu1 %v7810_v20  ;;  %v7815_v41 = vld [vmem:[#allocation7 + $0xd8] ss:$12 sps:$4 sm:$0xff]  }
 0x380   :  { %4433 = vmatprep.subr.bf16.mxu0 %v9649_v60  ;;  %v2753_v62 = vpop.f32.mrb[151].mxu1  ;;  %v2762_v44 = vadd.f32 %v7095_v48, %v2536_v53  ;;  %v2552_v58 = vpop.f32.mrb[166].mxu0  ;;  %3581 = vmatprep.mubr.bf16.mxu1 %v7813_v13  ;;  %v2931_v45 = vmax.f32 %v2759_v26, 0.0  ;;  %v7782_v53 = vld [vmem:[#allocation7 + $0x80] ss:$12 sps:$4 sm:$0xff]  }
 0x381   :  { %v2754_v59 = vadd.f32 %v2753_v62, %v8996_v31  ;;  %v2554_v25 = vpop.f32.mrb[167].mxu0  ;;  %v2929_v23 = vmax.f32 %v2751_v29, 0.0  ;;  %v7786_v31 = vld [vmem:[#allocation7 + $0x98] ss:$12 sps:$4 sm:$0xff]   ;;  %v7820_v48 = vld [vmem:[#allocation7 + $0xf0] ss:$12 sps:$4 sm:$0xff]  }
 0x382   :  { %7157 = vmatmul.mubr.bf16.gmra.mrb[244].mxu0 %v7777_v9  ;;  %v2932_v10 = vmax.f32 %v2762_v44, 0.0  ;;  %v7787_v44 = vld [vmem:[#allocation7 + $0xb0] ss:$12 sps:$4 sm:$0xff]   ;;  %v7791_v25 = vld [vmem:[#allocation7 + $0xc8] ss:$12 sps:$4 sm:$0xff]  }
 0x383   :  { %4434 = vmatpush1.bf16.msra.mxu0 %v4024_v11  ;;  %v2930_v15 = vmax.f32 %v2754_v59, 0.0  ;;  %7160 = vmatprep.mubr.bf16.mxu0 %v7781_v2  ;;  %v7823_v2 = vld [vmem:[#allocation7 + $0x10c] ss:$12 sps:$4 sm:$0xff]  }
 0x384   :  { %4435 = vmatprep.subr.bf16.mxu0 %v9649_v60  ;;  %v4026_v5 = vpack.c.bf16 %v2932_v10, %v2931_v45 }
 0x385   :  { %v4025_v51 = vpack.c.bf16 %v2930_v15, %v2929_v23  ;;  %v7098_v28 = vpop.f32.mrb[152].mxu1 }
 0x386   :  { %v2766_v55 = vpop.f32.mrb[153].mxu1  ;;  %v2775_v7 = vadd.f32 %v7098_v28, %v2549_v21  ;;  %v2557_v8 = vpop.f32.mrb[168].mxu0 }
 0x387   :  { %4436 = vmatpush1.bf16.msra.mxu0 %v4025_v51  ;;  %v2767_v50 = vadd.f32 %v2766_v55, %v2541_v39  ;;  %v7099_v24 = vpop.f32.mrb[154].mxu1  ;;  %v2559_v20 = vpop.f32.mrb[169].mxu0  ;;  %3582 = vmatmul.mubr.bf16.gmra.mrb[228].mxu1 %v7815_v41 }
 0x388   :  { %4437 = vmatprep.subr.bf16.mxu0 %v9649_v60  ;;  %v2769_v11 = vpop.f32.mrb[155].mxu1  ;;  %v2778_v13 = vadd.f32 %v7099_v24, %v2552_v58  ;;  %v2560_v3 = vpop.f32.mrb[170].mxu0  ;;  %3589 = vmatprep.mubr.bf16.mxu1 %v7818_v38  ;;  %v2935_v18 = vmax.f32 %v2775_v7, 0.0 }
 0x389   :  { %v2770_v22 = vadd.f32 %v2769_v11, %v2544_v43  ;;  %v2562_v9 = vpop.f32.mrb[171].mxu0  ;;  %v2933_v21 = vmax.f32 %v2767_v50, 0.0  ;;  %v7792_v11 = vld [vmem:[#allocation7 + $0xe0] ss:$12 sps:$4 sm:$0xff]  }
 0x38a   :  { %7161 = vmatmul.mubr.bf16.gmra.mrb[248].mxu0 %v7782_v53  ;;  %v2936_v26 = vmax.f32 %v2778_v13, 0.0 }
 0x38b   :  { %7164 = vmatprep.mubr.bf16.mxu0 %v7786_v31  ;;  %4438 = vmatpush1.bf16.msra.mxu0 %v4026_v5  ;;  %v2934_v29 = vmax.f32 %v2770_v22, 0.0  ;;  %v7828_v31 = vld [vmem:[#allocation7 + $0x124] ss:$12 sps:$4 sm:$0xff]  }
 0x38c   :  { %4439 = vmatprep.subr.bf16.mxu0 %v9649_v60  ;;  %v4028_v39 = vpack.c.bf16 %v2936_v26, %v2935_v18 }
 0x38d   :  { %v4027_v35 = vpack.c.bf16 %v2934_v29, %v2933_v21  ;;  %v7102_v62 = vpop.f32.mrb[156].mxu1 }
 0x38e   :  { %v2782_v58 = vpop.f32.mrb[157].mxu1  ;;  %v2565_v59 = vpop.f32.mrb[172].mxu0 }
 0x38f   :  { %4440 = vmatpush1.bf16.msra.mxu0 %v4027_v35  ;;  %v2783_v43 = vadd.f32 %v2782_v58, %v2557_v8  ;;  %v7103_v45 = vpop.f32.mrb[158].mxu1  ;;  %v2791_v10 = vadd.f32 %v7102_v62, %v2565_v59  ;;  %v2567_v23 = vpop.f32.mrb[173].mxu0  ;;  %3590 = vmatmul.mubr.bf16.gmra.mrb[232].mxu1 %v7820_v48  ;;  %v7825_v8 = vld [vmem:[#allocation7 + $0x108] ss:$12 sps:$4 sm:$0xff]   ;;  %v7830_v62 = vld [vmem:[#allocation7 + $0x120] ss:$12 sps:$4 sm:$0xff]  }
 0x390   :  { %4441 = vmatprep.subr.bf16.mxu0 %v9649_v60  ;;  %v2785_v15 = vpop.f32.mrb[159].mxu1  ;;  %v2568_v41 = vpop.f32.mrb[174].mxu0  ;;  %3597 = vmatprep.mubr.bf16.mxu1 %v7823_v2 }
 0x391   :  { %v2786_v5 = vadd.f32 %v2785_v15, %v2560_v3  ;;  %v2794_v38 = vadd.f32 %v7103_v45, %v2568_v41  ;;  %v2570_v51 = vpop.f32.mrb[175].mxu0  ;;  %v2937_v28 = vmax.f32 %v2783_v43, 0.0  ;;  %v2939_v55 = vmax.f32 %v2791_v10, 0.0  ;;  %v7796_v3 = vld [vmem:[#allocation7 + $0xf8] ss:$12 sps:$4 sm:$0xff]  }
 0x392   :  { %7165 = vmatmul.mubr.bf16.gmra.mrb[252].mxu0 %v7787_v44  ;;  %v7834_v44 = vld [vmem:[#allocation7 + $0x13c] ss:$12 sps:$4 sm:$0xff]  }
 0x393   :  { %7168 = vmatprep.mubr.bf16.mxu0 %v7791_v25  ;;  %4442 = vmatpush1.bf16.msra.mxu0 %v4028_v39  ;;  %v2938_v53 = vmax.f32 %v2786_v5, 0.0  ;;  %v2940_v7 = vmax.f32 %v2794_v38, 0.0  ;;  %v7797_v25 = vld [vmem:[#allocation7 + $0x110] ss:$12 sps:$4 sm:$0xff]   ;;  %v7801_v10 = vld [vmem:[#allocation7 + $0x128] ss:$12 sps:$4 sm:$0xff]  }
 0x394   :  { %4443 = vmatprep.subr.bf16.mxu0 %v9649_v60 }
 0x395   :  { %v4029_v50 = vpack.c.bf16 %v2938_v53, %v2937_v28  ;;  %v4030_v24 = vpack.c.bf16 %v2940_v7, %v2939_v55  ;;  %v7106_v20 = vpop.f32.mrb[160].mxu1  ;;  %v7836_v7 = vld [vmem:[#allocation7 + $0x138] ss:$12 sps:$4 sm:$0xff]  }
 0x396   :  { %v2573_v13 = vpop.f32.mrb[176].mxu0  ;;  %v2798_v22 = vpop.f32.mrb[161].mxu1 }
 0x397   :  { %4444 = vmatpush1.bf16.msra.mxu0 %v4029_v50  ;;  %v2799_v9 = vadd.f32 %v2798_v22, %v2573_v13  ;;  %v2575_v18 = vpop.f32.mrb[177].mxu0  ;;  %v7107_v26 = vpop.f32.mrb[162].mxu1  ;;  %3598 = vmatmul.mubr.bf16.gmra.mrb[236].mxu1 %v7825_v8  ;;  %v7840_v8 = vld [vmem:[#allocation7 + $0x154] ss:$12 sps:$4 sm:$0xff]   ;;  %v7806_v13 = vld [vmem:[#allocation7 + $0x158] ss:$12 sps:$4 sm:$0xff]  }
 0x398   :  { %4445 = vmatprep.subr.bf16.mxu0 %v9649_v60  ;;  %v2576_v21 = vpop.f32.mrb[178].mxu0  ;;  %v2801_v29 = vpop.f32.mrb[163].mxu1  ;;  %3605 = vmatprep.mubr.bf16.mxu1 %v7828_v31 }
 0x399   :  { %v2802_v48 = vadd.f32 %v2801_v29, %v2576_v21  ;;  %v2578_v39 = vpop.f32.mrb[179].mxu0  ;;  %v2941_v2 = vmax.f32 %v2799_v9, 0.0 }
 0x39a   :  { %7169 = vmatmul.mubr.bf16.gmra.mrb[0].mxu0 %v7792_v11 }
 0x39b   :  { %7172 = vmatprep.mubr.bf16.mxu0 %v7796_v3  ;;  %v2942_v35 = vmax.f32 %v2802_v48, 0.0  ;;  %4446 = vmatpush1.bf16.msra.mxu0 %v4030_v24  ;;  %v7802_v24 = vld [vmem:[#allocation7 + $0x140] ss:$12 sps:$4 sm:$0xff]  }
 0x39c   :  { %4447 = vmatprep.subr.bf16.mxu0 %v9649_v60 }
 0x39d   :  { %v4031_v58 = vpack.c.bf16 %v2942_v35, %v2941_v2  ;;  %v7110_v59 = vpop.f32.mrb[164].mxu1  ;;  %v7842_v2 = vld [vmem:[#allocation7 + $0x150] ss:$12 sps:$4 sm:$0xff]   ;;  %v7846_v35 = vld [vmem:[#allocation7 + $0x16c] ss:$12 sps:$4 sm:$0xff]  }
 0x39e   :  { %v2581_v43 = vpop.f32.mrb[180].mxu0  ;;  %v2814_v45 = vpop.f32.mrb[165].mxu1 }
 0x39f   :  { %v2807_v23 = vadd.f32 %v7106_v20, %v2581_v43  ;;  %v2583_v15 = vpop.f32.mrb[181].mxu0  ;;  %v7111_v41 = vpop.f32.mrb[166].mxu1  ;;  %4448 = vmatpush1.bf16.msra.mxu0 %v4031_v58  ;;  %3606 = vmatmul.mubr.bf16.gmra.mrb[240].mxu1 %v7830_v62  ;;  %v7807_v58 = vld [vmem:[#allocation7 + $0x170] ss:$12 sps:$4 sm:$0xff]  }
 0x3a0   :  { %v2584_v5 = vpop.f32.mrb[182].mxu0  ;;  %v2817_v38 = vpop.f32.mrb[167].mxu1  ;;  %4449 = vmatprep.subr.bf16.mxu0 %v9649_v60  ;;  %3613 = vmatprep.mubr.bf16.mxu1 %v7834_v44 }
 0x3a1   :  { %v2810_v51 = vadd.f32 %v7107_v26, %v2584_v5  ;;  %v2586_v28 = vpop.f32.mrb[183].mxu0  ;;  %v2943_v53 = vmax.f32 %v2807_v23, 0.0 }
 0x3a2   :  { %7173 = vmatmul.mubr.bf16.gmra.mrb[4].mxu0 %v7797_v25 }
 0x3a3   :  { %7176 = vmatprep.mubr.bf16.mxu0 %v7801_v10  ;;  %v2944_v55 = vmax.f32 %v2810_v51, 0.0 }
 0x3a5   :  { %v4032_v31 = vpack.c.bf16 %v2944_v55, %v2943_v53  ;;  %v9014_v50 = vpop.f32.mrb[168].mxu1 }
 0x3a6   :  { %v2589_v20 = vpop.f32.mrb[184].mxu0  ;;  %v2830_v11 = vpop.f32.mrb[169].mxu1 }
 0x3a7   :  { %v2815_v22 = vadd.f32 %v2814_v45, %v2589_v20  ;;  %v2591_v3 = vpop.f32.mrb[185].mxu0  ;;  %4450 = vmatpush1.bf16.msra.mxu0 %v4032_v31  ;;  %v9016_v9 = vpop.f32.mrb[170].mxu1  ;;  %3614 = vmatmul.mubr.bf16.gmra.mrb[244].mxu1 %v7836_v7  ;;  %v7811_v45 = vld [vmem:[#allocation7 + $0x188] ss:$12 sps:$4 sm:$0xff]  }
 0x3a8   :  { %v2592_v18 = vpop.f32.mrb[186].mxu0  ;;  %4451 = vmatprep.subr.bf16.mxu0 %v9649_v60  ;;  %v2833_v26 = vpop.f32.mrb[171].mxu1  ;;  %3621 = vmatprep.mubr.bf16.mxu1 %v7840_v8  ;;  %v7848_v7 = vld [vmem:[#allocation7 + $0x168] ss:$12 sps:$4 sm:$0xff]   ;;  %v7854_v8 = vld [vmem:[#allocation7 + $0x184] ss:$12 sps:$4 sm:$0xff]  }
 0x3a9   :  { %v2818_v21 = vadd.f32 %v2817_v38, %v2592_v18  ;;  %v2594_v29 = vpop.f32.mrb[187].mxu0  ;;  %v2945_v48 = vmax.f32 %v2815_v22, 0.0  ;;  %v7816_v22 = vld [vmem:[#allocation7 + $0x1b8] ss:$12 sps:$4 sm:$0xff]  }
 0x3aa   :  { %7177 = vmatmul.mubr.bf16.gmra.mrb[8].mxu0 %v7802_v24  ;;  %v7812_v24 = vld [vmem:[#allocation7 + $0x1a0] ss:$12 sps:$4 sm:$0xff]  }
 0x3ab   :  { %7180 = vmatprep.mubr.bf16.mxu0 %v7806_v13  ;;  %v2946_v39 = vmax.f32 %v2818_v21, 0.0 }
 0x3ad   :  { %v4033_v62 = vpack.c.bf16 %v2946_v39, %v2945_v48  ;;  %v9019_v44 = vpop.f32.mrb[172].mxu1 }
 0x3ae   :  { %v2597_v25 = vpop.f32.mrb[188].mxu0  ;;  %v9021_v43 = vpop.f32.mrb[173].mxu1 }
 0x3af   :  { %v2823_v10 = vadd.f32 %v7110_v59, %v2597_v25  ;;  %v2599_v23 = vpop.f32.mrb[189].mxu0  ;;  %4452 = vmatpush1.bf16.msra.mxu0 %v4033_v62  ;;  %v9023_v15 = vpop.f32.mrb[174].mxu1  ;;  %3622 = vmatmul.mubr.bf16.gmra.mrb[248].mxu1 %v7842_v2  ;;  %v7852_v62 = vld [vmem:[#allocation7 + $0x180] ss:$12 sps:$4 sm:$0xff]  }
 0x3b0   :  { %v2600_v5 = vpop.f32.mrb[190].mxu0  ;;  %4453 = vmatprep.subr.bf16.mxu0 %v9649_v60  ;;  %v9026_v38 = vpop.f32.mrb[175].mxu1  ;;  %3629 = vmatprep.mubr.bf16.mxu1 %v7846_v35 }
 0x3b1   :  { %v2826_v51 = vadd.f32 %v7111_v41, %v2600_v5  ;;  %v2602_v28 = vpop.f32.mrb[191].mxu0  ;;  %v2947_v53 = vmax.f32 %v2823_v10, 0.0 }
 0x3b2   :  { %7181 = vmatmul.mubr.bf16.gmra.mrb[12].mxu0 %v7807_v58  ;;  %v7860_v58 = vld [vmem:[#allocation7 + $0x19c] ss:$12 sps:$4 sm:$0xff]  }
 0x3b3   :  { %7184 = vmatprep.mubr.bf16.mxu0 %v7811_v45  ;;  %v2948_v55 = vmax.f32 %v2826_v51, 0.0  ;;  %v7817_v45 = vld [vmem:[#allocation7 + $0x1d0] ss:$12 sps:$4 sm:$0xff]   ;;  %v7821_v28 = vld [vmem:[#allocation7 + $0x1e8] ss:$12 sps:$4 sm:$0xff]  }
 0x3b5   :  { %v4034_v59 = vpack.c.bf16 %v2948_v55, %v2947_v53  ;;  %v9028_v31 = vpop.f32.mrb[176].mxu1 }
 0x3b6   :  { %v2605_v20 = vpop.f32.mrb[192].mxu0  ;;  %v9030_v13 = vpop.f32.mrb[177].mxu1 }
 0x3b7   :  { %v2831_v3 = vadd.f32 %v2830_v11, %v2605_v20  ;;  %v2607_v18 = vpop.f32.mrb[193].mxu0  ;;  %4454 = vmatpush1.bf16.msra.mxu0 %v4034_v59  ;;  %v9032_v21 = vpop.f32.mrb[178].mxu1  ;;  %3630 = vmatmul.mubr.bf16.gmra.mrb[252].mxu1 %v7848_v7  ;;  %v7866_v20 = vld [vmem:[#allocation7 + $0x1b4] ss:$12 sps:$4 sm:$0xff]  }
 0x3b8   :  { %v2608_v41 = vpop.f32.mrb[194].mxu0  ;;  %4455 = vmatprep.subr.bf16.mxu0 %v9649_v60  ;;  %v9035_v29 = vpop.f32.mrb[179].mxu1  ;;  %3637 = vmatprep.mubr.bf16.mxu1 %v7854_v8 }
 0x3b9   :  { %v2834_v48 = vadd.f32 %v2833_v26, %v2608_v41  ;;  %v2610_v39 = vpop.f32.mrb[195].mxu0  ;;  %v2949_v2 = vmax.f32 %v2831_v3, 0.0  ;;  %v7822_v41 = vld [vmem:[#allocation7 + $0x200] ss:$12 sps:$4 sm:$0xff]  }
 0x3ba   :  { %7185 = vmatmul.mubr.bf16.gmra.mrb[16].mxu0 %v7812_v24 }
 0x3bb   :  { %7188 = vmatprep.mubr.bf16.mxu0 %v7816_v22  ;;  %v2950_v35 = vmax.f32 %v2834_v48, 0.0 }
 0x3bd   :  { %v4035_v11 = vpack.c.bf16 %v2950_v35, %v2949_v2  ;;  %v9037_v25 = vpop.f32.mrb[180].mxu1  ;;  %v7826_v35 = vld [vmem:[#allocation7 + $0x218] ss:$12 sps:$4 sm:$0xff]  }
 0x3be   :  { %v2613_v10 = vpop.f32.mrb[196].mxu0  ;;  %v9039_v23 = vpop.f32.mrb[181].mxu1 }
 0x3bf   :  { %v2839_v5 = vadd.f32 %v9014_v50, %v2613_v10  ;;  %v2615_v51 = vpop.f32.mrb[197].mxu0  ;;  %4456 = vmatpush1.bf16.msra.mxu0 %v4035_v11  ;;  %3638 = vmatmul.mubr.bf16.gmra.mrb[0].mxu1 %v7852_v62  ;;  %v9042_v26 = vpop.f32.mrb[182].mxu1  ;;  %v7858_v50 = vld [vmem:[#allocation7 + $0x198] ss:$12 sps:$4 sm:$0xff]  }
 0x3c0   :  { %v2616_v53 = vpop.f32.mrb[198].mxu0  ;;  %4457 = vmatprep.subr.bf16.mxu0 %v9649_v60  ;;  %3645 = vmatprep.mubr.bf16.mxu1 %v7860_v58  ;;  %v9045_v55 = vpop.f32.mrb[183].mxu1  ;;  %v7872_v51 = vld [vmem:[#allocation7 + $0x1cc] ss:$12 sps:$4 sm:$0xff]  }
 0x3c1   :  { %v2842_v7 = vadd.f32 %v9016_v9, %v2616_v53  ;;  %v2618_v8 = vpop.f32.mrb[199].mxu0  ;;  %v2951_v59 = vmax.f32 %v2839_v5, 0.0 }
 0x3c2   :  { %7189 = vmatmul.mubr.bf16.gmra.mrb[20].mxu0 %v7817_v45  ;;  %v7827_v8 = vld [vmem:[#allocation7 + $0x230] ss:$12 sps:$4 sm:$0xff]  }
 0x3c3   :  { %v2952_v24 = vmax.f32 %v2842_v7, 0.0  ;;  %7192 = vmatprep.mubr.bf16.mxu0 %v7821_v28 }
 0x3c5   :  { %v4036_v22 = vpack.c.bf16 %v2952_v24, %v2951_v59  ;;  %v9048_v3 = vpop.f32.mrb[184].mxu1 }
 0x3c6   :  { %v2621_v18 = vpop.f32.mrb[200].mxu0  ;;  %v9050_v48 = vpop.f32.mrb[185].mxu1 }
 0x3c7   :  { %v2847_v39 = vadd.f32 %v9021_v43, %v2621_v18  ;;  %v2623_v2 = vpop.f32.mrb[201].mxu0  ;;  %4458 = vmatpush1.bf16.msra.mxu0 %v4036_v22  ;;  %3646 = vmatmul.mubr.bf16.gmra.mrb[4].mxu1 %v7858_v50  ;;  %v9053_v9 = vpop.f32.mrb[186].mxu1  ;;  %v7864_v43 = vld [vmem:[#allocation7 + $0x1b0] ss:$12 sps:$4 sm:$0xff]  }
 0x3c8   :  { %v2624_v62 = vpop.f32.mrb[202].mxu0  ;;  %4459 = vmatprep.subr.bf16.mxu0 %v9649_v60  ;;  %3653 = vmatprep.mubr.bf16.mxu1 %v7866_v20  ;;  %v9056_v58 = vpop.f32.mrb[187].mxu1  ;;  %v7833_v20 = vld [vmem:[#allocation8 + $0x4] ss:$12 sps:$4 sm:$0xff]  }
 0x3c9   :  { %v2850_v11 = vadd.f32 %v9026_v38, %v2624_v62  ;;  %v2626_v45 = vpop.f32.mrb[203].mxu0  ;;  %v2953_v10 = vmax.f32 %v2847_v39, 0.0  ;;  %v7878_v62 = vld [vmem:[#allocation7 + $0x1e4] ss:$12 sps:$4 sm:$0xff]  }
 0x3ca   :  { %7193 = vmatmul.mubr.bf16.gmra.mrb[24].mxu0 %v7822_v41  ;;  %v7831_v45 = vld [vmem:[#allocation8] ss:$12 sps:$4 sm:$0xff]  }
 0x3cb   :  { %v2954_v5 = vmax.f32 %v2850_v11, 0.0  ;;  %7196 = vmatprep.mubr.bf16.mxu0 %v7826_v35 }
 0x3cd   :  { %v4037_v28 = vpack.c.bf16 %v2954_v5, %v2953_v10  ;;  %v9059_v53 = vpop.f32.mrb[188].mxu1  ;;  %v7839_v5 = vld [vmem:[#allocation8 + $0x1c] ss:$12 sps:$4 sm:$0xff]  }
 0x3ce   :  { %v2629_v7 = vpop.f32.mrb[204].mxu0  ;;  %v9061_v59 = vpop.f32.mrb[189].mxu1 }
 0x3cf   :  { %v2855_v24 = vadd.f32 %v9019_v44, %v2629_v7  ;;  %v2631_v50 = vpop.f32.mrb[205].mxu0  ;;  %4460 = vmatpush1.bf16.msra.mxu0 %v4037_v28  ;;  %3654 = vmatmul.mubr.bf16.gmra.mrb[8].mxu1 %v7864_v43  ;;  %v9064_v38 = vpop.f32.mrb[190].mxu1  ;;  %v7870_v44 = vld [vmem:[#allocation7 + $0x1c8] ss:$12 sps:$4 sm:$0xff]  }
 0x3d0   :  { %v2632_v22 = vpop.f32.mrb[206].mxu0  ;;  %4461 = vmatprep.subr.bf16.mxu0 %v9649_v60  ;;  %3661 = vmatprep.mubr.bf16.mxu1 %v7872_v51  ;;  %v9067_v18 = vpop.f32.mrb[191].mxu1  ;;  %v7884_v50 = vld [vmem:[#allocation7 + $0x1fc] ss:$12 sps:$4 sm:$0xff]  }
 0x3d1   :  { %v2858_v41 = vadd.f32 %v9023_v15, %v2632_v22  ;;  %v2634_v39 = vpop.f32.mrb[207].mxu0  ;;  %v2955_v2 = vmax.f32 %v2855_v24, 0.0  ;;  %v7876_v24 = vld [vmem:[#allocation7 + $0x1e0] ss:$12 sps:$4 sm:$0xff]   ;;  %v7837_v22 = vld [vmem:[#allocation8 + $0x18] ss:$12 sps:$4 sm:$0xff]  }
 0x3d2   :  { %7197 = vmatmul.mubr.bf16.gmra.mrb[28].mxu0 %v7827_v8  ;;  %v7845_v39 = vld [vmem:[#allocation8 + $0x34] ss:$12 sps:$4 sm:$0xff]  }
 0x3d3   :  { %v2956_v35 = vmax.f32 %v2858_v41, 0.0  ;;  %4463 = vmatprep.mubr.bf16.mxu0 %v7833_v20 }
 0x3d5   :  { %v4038_v11 = vpack.c.bf16 %v2956_v35, %v2955_v2 }
 0x3d6   :  { %v2637_v10 = vpop.f32.mrb[208].mxu0 }
 0x3d7   :  { %4462 = vmatpush1.bf16.msra.mxu0 %v4038_v11  ;;  %v2863_v43 = vadd.f32 %v9030_v13, %v2637_v10  ;;  %v2639_v60 = vpop.f32.mrb[209].mxu0  ;;  %3662 = vmatmul.mubr.bf16.gmra.mrb[12].mxu1 %v7870_v44  ;;  %v7890_v10 = vld [vmem:[#allocation7 + $0x214] ss:$12 sps:$4 sm:$0xff]  }
 0x3d8   :  { %v2640_v51 = vpop.f32.mrb[210].mxu0  ;;  %3669 = vmatprep.mubr.bf16.mxu1 %v7878_v62 }
 0x3d9   :  { %v2957_v28 = vmax.f32 %v2863_v43, 0.0  ;;  %v2866_v15 = vadd.f32 %v9035_v29, %v2640_v51  ;;  %v2642_v7 = vpop.f32.mrb[211].mxu0  ;;  %v7843_v43 = vld [vmem:[#allocation8 + $0x30] ss:$12 sps:$4 sm:$0xff]   ;;  %v7851_v51 = vld [vmem:[#allocation8 + $0x4c] ss:$12 sps:$4 sm:$0xff]  }
 0x3da   :  { %4464 = vmatmul.mubr.bf16.vlgmr.msra.gmra.mrb[32].mxu0 %v7831_v45  ;;  %v7882_v45 = vld [vmem:[#allocation7 + $0x1f8] ss:$12 sps:$4 sm:$0xff]  }
 0x3db   :  { %4471 = vmatprep.mubr.bf16.mxu0 %v7839_v5  ;;  %v2958_v8 = vmax.f32 %v2866_v15, 0.0 }
 0x3dd   :  { %v4039_v20 = vpack.c.bf16 %v2958_v8, %v2957_v28 }
 0x3de   :  { %v2645_v41 = vpop.f32.mrb[212].mxu0 }
 0x3df   :  { %v2871_v2 = vadd.f32 %v9028_v31, %v2645_v41  ;;  %v2647_v13 = vpop.f32.mrb[213].mxu0  ;;  %7200 = vmatprep.subr.bf16.mxu1 %v4039_v20  ;;  %3670 = vmatmul.mubr.bf16.gmra.mrb[16].mxu1 %v7876_v24  ;;  %v7849_v41 = vld [vmem:[#allocation8 + $0x48] ss:$12 sps:$4 sm:$0xff]  }
 0x3e0   :  { %v2648_v35 = vpop.f32.mrb[214].mxu0  ;;  %7201 = vmatpush3.bf16.msra.mxu1 %v4039_v20  ;;  %3677 = vmatprep.mubr.bf16.mxu1 %v7884_v50  ;;  %v7888_v50 = vld [vmem:[#allocation7 + $0x210] ss:$12 sps:$4 sm:$0xff]   ;;  %v7896_v20 = vld [vmem:[#allocation7 + $0x22c] ss:$12 sps:$4 sm:$0xff]  }
 0x3e1   :  { %v2959_v44 = vmax.f32 %v2871_v2, 0.0  ;;  %v2874_v29 = vadd.f32 %v9032_v21, %v2648_v35  ;;  %v2650_v62 = vpop.f32.mrb[215].mxu0  ;;  %v7857_v2 = vld [vmem:[#allocation8 + $0x64] ss:$12 sps:$4 sm:$0xff]  }
 0x3e2   :  { %4472 = vmatmul.mubr.bf16.gmra.mrb[36].mxu0 %v7837_v22 }
 0x3e3   :  { %4479 = vmatprep.mubr.bf16.mxu0 %v7845_v39  ;;  %v2960_v11 = vmax.f32 %v2874_v29, 0.0 }
 0x3e5   :  { %v4040_v5 = vpack.c.bf16 %v2960_v11, %v2959_v44  ;;  %v7894_v11 = vld [vmem:[#allocation7 + $0x228] ss:$12 sps:$4 sm:$0xff]  }
 0x3e6   :  { %v2653_v60 = vpop.f32.mrb[216].mxu0 }
 0x3e7   :  { %7202 = vmatprep.subr.bf16.mxu1 %v4040_v5  ;;  %v2879_v31 = vadd.f32 %v9039_v23, %v2653_v60  ;;  %v2655_v28 = vpop.f32.mrb[217].mxu0  ;;  %3678 = vmatmul.mubr.bf16.gmra.mrb[20].mxu1 %v7882_v45  ;;  %v7900_v45 = vld [vmem:[#allocation8 + $0x8] ss:$12 sps:$4 sm:$0xff]  }
 0x3e8   :  { %7203 = vmatpush3.bf16.msra.mxu1 %v4040_v5  ;;  %v2656_v15 = vpop.f32.mrb[218].mxu0  ;;  %3685 = vmatprep.mubr.bf16.mxu1 %v7890_v10  ;;  %v7855_v5 = vld [vmem:[#allocation8 + $0x60] ss:$12 sps:$4 sm:$0xff]   ;;  %v7863_v60 = vld [vmem:[#allocation8 + $0x7c] ss:$12 sps:$4 sm:$0xff]  }
 0x3e9   :  { %v2961_v7 = vmax.f32 %v2879_v31, 0.0  ;;  %v2882_v21 = vadd.f32 %v9045_v55, %v2656_v15  ;;  %v2658_v8 = vpop.f32.mrb[219].mxu0 }
 0x3ea   :  { %4480 = vmatmul.mubr.bf16.gmra.mrb[40].mxu0 %v7843_v43  ;;  %v7861_v8 = vld [vmem:[#allocation8 + $0x78] ss:$12 sps:$4 sm:$0xff]  }
 0x3eb   :  { %4487 = vmatprep.mubr.bf16.mxu0 %v7851_v51  ;;  %v2962_v24 = vmax.f32 %v2882_v21, 0.0 }
 0x3ed   :  { %v4041_v22 = vpack.c.bf16 %v2962_v24, %v2961_v7 }
 0x3ee   :  { %v2661_v39 = vpop.f32.mrb[220].mxu0 }
 0x3ef   :  { %v2887_v23 = vadd.f32 %v9037_v25, %v2661_v39  ;;  %v2663_v13 = vpop.f32.mrb[221].mxu0  ;;  %7204 = vmatprep.subr.bf16.mxu1 %v4041_v22  ;;  %3686 = vmatmul.mubr.bf16.gmra.mrb[24].mxu1 %v7888_v50  ;;  %v7869_v50 = vld [vmem:[#allocation8 + $0x94] ss:$12 sps:$4 sm:$0xff]  }
 0x3f0   :  { %v2664_v35 = vpop.f32.mrb[222].mxu0  ;;  %7205 = vmatpush3.bf16.msra.mxu1 %v4041_v22  ;;  %3693 = vmatprep.mubr.bf16.mxu1 %v7896_v20  ;;  %v7867_v13 = vld [vmem:[#allocation8 + $0x90] ss:$12 sps:$4 sm:$0xff]  }
 0x3f1   :  { %v2963_v44 = vmax.f32 %v2887_v23, 0.0  ;;  %v2890_v55 = vadd.f32 %v9042_v26, %v2664_v35  ;;  %v2666_v29 = vpop.f32.mrb[223].mxu0 }
 0x3f2   :  { %4488 = vmatmul.mubr.bf16.gmra.mrb[44].mxu0 %v7849_v41 }
 0x3f3   :  { %4495 = vmatprep.mubr.bf16.mxu0 %v7857_v2  ;;  %v2964_v62 = vmax.f32 %v2890_v55, 0.0 }
 0x3f5   :  { %v4042_v10 = vpack.c.bf16 %v2964_v62, %v2963_v44  ;;  %v7875_v44 = vld [vmem:[#allocation8 + $0xac] ss:$12 sps:$4 sm:$0xff]  }
 0x3f6   :  { %v2669_v43 = vpop.f32.mrb[224].mxu0 }
 0x3f7   :  { %v2895_v25 = vadd.f32 %v9050_v48, %v2669_v43  ;;  %v2671_v51 = vpop.f32.mrb[225].mxu0  ;;  %7206 = vmatprep.subr.bf16.mxu1 %v4042_v10  ;;  %3694 = vmatmul.mubr.bf16.gmra.mrb[28].mxu1 %v7894_v11 }
 0x3f8   :  { %v2672_v31 = vpop.f32.mrb[226].mxu0  ;;  %7207 = vmatpush3.bf16.msra.mxu1 %v4042_v10  ;;  %7216 = vmatprep.mubr.bf16.mxu1 %v7900_v45 }
 0x3f9   :  { %v2965_v28 = vmax.f32 %v2895_v25, 0.0  ;;  %v2898_v26 = vadd.f32 %v9056_v58, %v2672_v31  ;;  %v2674_v15 = vpop.f32.mrb[227].mxu0 }
 0x3fa   :  { %4496 = vmatmul.mubr.bf16.gmra.mrb[48].mxu0 %v7855_v5  ;;  %v7873_v5 = vld [vmem:[#allocation8 + $0xa8] ss:$12 sps:$4 sm:$0xff]  }
 0x3fb   :  { %4503 = vmatprep.mubr.bf16.mxu0 %v7863_v60  ;;  %v2966_v7 = vmax.f32 %v2898_v26, 0.0  ;;  %v7881_v60 = vld [vmem:[#allocation8 + $0xc4] ss:$12 sps:$4 sm:$0xff]  }
 0x3fd   :  { %v4043_v21 = vpack.c.bf16 %v2966_v7, %v2965_v28 }
 0x3fe   :  { %v2677_v24 = vpop.f32.mrb[228].mxu0 }
 0x3ff   :  { %v2903_v20 = vadd.f32 %v9048_v3, %v2677_v24  ;;  %v2679_v48 = vpop.f32.mrb[229].mxu0  ;;  %7208 = vmatprep.subr.bf16.mxu1 %v4043_v21 }
 0x400   :  { %v2680_v22 = vpop.f32.mrb[230].mxu0  ;;  %7209 = vmatpush3.bf16.msra.mxu1 %v4043_v21  ;;  %v7905_v48 = vld [vmem:[#allocation8 + $0x38] ss:$12 sps:$4 sm:$0xff]  }
 0x401   :  { %v2967_v41 = vmax.f32 %v2903_v20, 0.0  ;;  %v2906_v39 = vadd.f32 %v9053_v9, %v2680_v22  ;;  %v2682_v2 = vpop.f32.mrb[231].mxu0  ;;  %v7901_v20 = vld [vmem:[#allocation8 + $0x20] ss:$12 sps:$4 sm:$0xff]  }
 0x402   :  { %4504 = vmatmul.mubr.bf16.gmra.mrb[52].mxu0 %v7861_v8  ;;  %v7885_v2 = vld [vmem:[#allocation8 + $0xd8] ss:$12 sps:$4 sm:$0xff]  }
 0x403   :  { %4511 = vmatprep.mubr.bf16.mxu0 %v7869_v50  ;;  %v2968_v58 = vmax.f32 %v2906_v39, 0.0  ;;  %v7879_v50 = vld [vmem:[#allocation8 + $0xc0] ss:$12 sps:$4 sm:$0xff]  }
 0x405   :  { %v4044_v23 = vpack.c.bf16 %v2968_v58, %v2967_v41  ;;  %v7893_v58 = vld [vmem:[#allocation8 + $0xf4] ss:$12 sps:$4 sm:$0xff]  }
 0x406   :  { %v2685_v35 = vpop.f32.mrb[232].mxu0 }
 0x407   :  { %v2911_v55 = vadd.f32 %v9061_v59, %v2685_v35  ;;  %v2687_v29 = vpop.f32.mrb[233].mxu0  ;;  %7210 = vmatprep.subr.bf16.mxu1 %v4044_v23 }
 0x408   :  { %v2688_v3 = vpop.f32.mrb[234].mxu0  ;;  %7211 = vmatpush3.bf16.msra.mxu1 %v4044_v23  ;;  %v7906_v23 = vld [vmem:[#allocation8 + $0x50] ss:$12 sps:$4 sm:$0xff]  }
 0x409   :  { %v2969_v62 = vmax.f32 %v2911_v55, 0.0  ;;  %v2914_v11 = vadd.f32 %v9067_v18, %v2688_v3  ;;  %v2690_v45 = vpop.f32.mrb[235].mxu0  ;;  %v7960_v55 = vld [vmem:[#allocation10 + $0x40] sm:$0xff]  }
 0x40a   :  { %4512 = vmatmul.mubr.bf16.gmra.mrb[56].mxu0 %v7867_v13  ;;  %v7910_v13 = vld [vmem:[#allocation8 + $0x68] ss:$12 sps:$4 sm:$0xff]   ;;  %v7911_v45 = vld [vmem:[#allocation8 + $0x80] ss:$12 sps:$4 sm:$0xff]  }
 0x40b   :  { %4519 = vmatprep.mubr.bf16.mxu0 %v7875_v44  ;;  %v2970_v9 = vmax.f32 %v2914_v11, 0.0  ;;  %v7899_v11 = vld [vmem:[#allocation8 + $0x10c] ss:$12 sps:$4 sm:$0xff]  }
 0x40d   :  { %v4045_v10 = vpack.c.bf16 %v2970_v9, %v2969_v62  ;;  %v7891_v62 = vld [vmem:[#allocation8 + $0xf0] ss:$12 sps:$4 sm:$0xff]   ;;  %v7915_v9 = vld [vmem:[#allocation8 + $0x98] ss:$12 sps:$4 sm:$0xff]  }
 0x40e   :  { %v2693_v43 = vpop.f32.mrb[236].mxu0 }
 0x40f   :  { %v2919_v25 = vadd.f32 %v9059_v53, %v2693_v43  ;;  %v2695_v51 = vpop.f32.mrb[237].mxu0  ;;  %7212 = vmatprep.subr.bf16.mxu1 %v4045_v10  ;;  %v7887_v53 = vld [vmem:[#allocation8 + $0xdc] ss:$12 sps:$4 sm:$0xff]  }
 0x410   :  { %v2696_v59 = vpop.f32.mrb[238].mxu0  ;;  %7213 = vmatpush3.bf16.msra.mxu1 %v4045_v10  ;;  %v7961_v43 = vld [vmem:[#allocation10 + $0x48] sm:$0xff]  }
 0x411   :  { %v2971_v31 = vmax.f32 %v2919_v25, 0.0  ;;  %v2922_v28 = vadd.f32 %v9064_v38, %v2696_v59  ;;  %v2698_v26 = vpop.f32.mrb[239].mxu0  ;;  %v7897_v51 = vld [vmem:[#allocation8 + $0x108] ss:$12 sps:$4 sm:$0xff]   ;;  %v7904_v59 = vld [vmem:[#allocation8 + $0x124] ss:$12 sps:$4 sm:$0xff]  }
 0x412   :  { %4520 = vmatmul.mubr.bf16.gmra.mrb[60].mxu0 %v7873_v5  ;;  %v9086_v18 = vpop.f32.mrb[192].mxu1 }
 0x413   :  { %4527 = vmatprep.mubr.bf16.mxu0 %v7881_v60  ;;  %v2972_v15 = vmax.f32 %v2922_v28, 0.0  ;;  %v3513_v7 = vpop.f32.mrb[193].mxu1  ;;  %v7920_v28 = vld [vmem:[#allocation8 + $0xc8] ss:$12 sps:$4 sm:$0xff]  }
 0x414   :  { %v9088_v21 = vpop.f32.mrb[194].mxu1  ;;  %v7962_v7 = vld [vmem:[#allocation10 + $0x50] sm:$0xff]  }
 0x415   :  { %v4046_v8 = vpack.c.bf16 %v2972_v15, %v2971_v31  ;;  %v3516_v24 = vpop.f32.mrb[195].mxu1  ;;  %v7916_v31 = vld [vmem:[#allocation8 + $0xb0] ss:$12 sps:$4 sm:$0xff]  }
 0x417   :  { %7214 = vmatprep.subr.bf16.mxu1 %v4046_v8 }
 0x418   :  { %7215 = vmatpush3.bf16.msra.mxu1 %v4046_v8 }
 0x419   :  { %7264 = vmatprep.subr.bf16.mxu1 %v7960_v55 }
 0x41a   :  { %4528 = vmatmul.mubr.bf16.gmra.mrb[64].mxu0 %v7879_v50  ;;  %v9090_v22 = vpop.f32.mrb[196].mxu1  ;;  %v7902_v50 = vld [vmem:[#allocation8 + $0x120] ss:$12 sps:$4 sm:$0xff]  }
 0x41b   :  { %4535 = vmatprep.mubr.bf16.mxu0 %v7887_v53  ;;  %7217 = vmatmul.mubr.bf16.vlgmr.msra.gmra.mrb[32].mxu1 %v7901_v20  ;;  %v3521_v38 = vpop.f32.mrb[197].mxu1  ;;  %v7909_v53 = vld [vmem:[#allocation8 + $0x13c] ss:$12 sps:$4 sm:$0xff]   ;;  %v7921_v20 = vld [vmem:[#allocation8 + $0xe0] ss:$12 sps:$4 sm:$0xff]  }
 0x41c   :  { %7220 = vmatprep.mubr.bf16.mxu1 %v7905_v48  ;;  %v9092_v41 = vpop.f32.mrb[198].mxu1  ;;  %7265 = vmatpush3.bf16.msra.mxu1 %v7960_v55  ;;  %v7925_v48 = vld [vmem:[#allocation8 + $0xf8] ss:$12 sps:$4 sm:$0xff]   ;;  %v7926_v55 = vld [vmem:[#allocation8 + $0x110] ss:$12 sps:$4 sm:$0xff]  }
 0x41d   :  { %v3524_v39 = vpop.f32.mrb[199].mxu1  ;;  %7266 = vmatprep.subr.bf16.mxu1 %v7961_v43 }
 0x420   :  { %7267 = vmatpush3.bf16.msra.mxu1 %v7961_v43  ;;  %v7912_v43 = vld [vmem:[#allocation8 + $0x150] ss:$12 sps:$4 sm:$0xff]  }
 0x421   :  { %7268 = vmatprep.subr.bf16.mxu1 %v7962_v7 }
 0x422   :  { %4536 = vmatmul.mubr.bf16.gmra.mrb[68].mxu0 %v7885_v2  ;;  %v9094_v35 = vpop.f32.mrb[200].mxu1  ;;  %v7963_v2 = vld [vmem:[#allocation10 + $0x58] sm:$0xff]  }
 0x423   :  { %4543 = vmatprep.mubr.bf16.mxu0 %v7893_v58  ;;  %7221 = vmatmul.mubr.bf16.gmra.mrb[36].mxu1 %v7906_v23  ;;  %v3529_v44 = vpop.f32.mrb[201].mxu1 }
 0x424   :  { %7224 = vmatprep.mubr.bf16.mxu1 %v7910_v13  ;;  %v9096_v29 = vpop.f32.mrb[202].mxu1  ;;  %7269 = vmatpush3.bf16.msra.mxu1 %v7962_v7  ;;  %v7907_v13 = vld [vmem:[#allocation8 + $0x138] ss:$12 sps:$4 sm:$0xff]   ;;  %v7914_v44 = vld [vmem:[#allocation8 + $0x154] ss:$12 sps:$4 sm:$0xff]  }
 0x425   :  { %v3532_v3 = vpop.f32.mrb[203].mxu1  ;;  %7270 = vmatprep.subr.bf16.mxu1 %v7963_v2 }
 0x426   :  { %v7930_v3 = vld [vmem:[#allocation8 + $0x128] ss:$12 sps:$4 sm:$0xff]  }
 0x428   :  { %7271 = vmatpush3.bf16.msra.mxu1 %v7963_v2  ;;  %v7936_v2 = vld [vmem:[#allocation8 + $0x170] ss:$12 sps:$4 sm:$0xff]  }
 0x42a   :  { %4544 = vmatmul.mubr.bf16.gmra.mrb[72].mxu0 %v7891_v62  ;;  %v9098_v10 = vpop.f32.mrb[204].mxu1 }
 0x42b   :  { %4551 = vmatprep.mubr.bf16.mxu0 %v7899_v11  ;;  %7225 = vmatmul.mubr.bf16.gmra.mrb[40].mxu1 %v7911_v45  ;;  %v3537_v5 = vpop.f32.mrb[205].mxu1  ;;  %v7964_v45 = vld [vmem:[#allocation10 + $0x60] sm:$0xff]  }
 0x42c   :  { %7228 = vmatprep.mubr.bf16.mxu1 %v7915_v9  ;;  %v9100_v60 = vpop.f32.mrb[206].mxu1  ;;  %7272 = vmatprep.subr.bf16.mxu1 %v7964_v45 }
 0x42d   :  { %v3540_v25 = vpop.f32.mrb[207].mxu1  ;;  %7273 = vmatpush3.bf16.msra.mxu1 %v7964_v45 }
 0x42e   :  { %v7919_v25 = vld [vmem:[#allocation8 + $0x16c] ss:$12 sps:$4 sm:$0xff]  }
 0x432   :  { %4552 = vmatmul.mubr.bf16.gmra.mrb[76].mxu0 %v7897_v51  ;;  %v9102_v26 = vpop.f32.mrb[208].mxu1  ;;  %v7931_v51 = vld [vmem:[#allocation8 + $0x140] ss:$12 sps:$4 sm:$0xff]  }
 0x433   :  { %4559 = vmatprep.mubr.bf16.mxu0 %v7904_v59  ;;  %7229 = vmatmul.mubr.bf16.gmra.mrb[44].mxu1 %v7916_v31  ;;  %v3545_v15 = vpop.f32.mrb[209].mxu1  ;;  %v7935_v59 = vld [vmem:[#allocation8 + $0x158] ss:$12 sps:$4 sm:$0xff]  }
 0x434   :  { %7232 = vmatprep.mubr.bf16.mxu1 %v7920_v28  ;;  %v9104_v8 = vpop.f32.mrb[210].mxu1  ;;  %v7965_v15 = vld [vmem:[#allocation10 + $0x68] sm:$0xff]  }
 0x435   :  { %v3548_v24 = vpop.f32.mrb[211].mxu1  ;;  %7274 = vmatprep.subr.bf16.mxu1 %v7965_v15 }
 0x436   :  { %7275 = vmatpush3.bf16.msra.mxu1 %v7965_v15  ;;  %v7941_v15 = vld [vmem:[#allocation8 + $0x1a0] ss:$12 sps:$4 sm:$0xff]  }
 0x43a   :  { %4560 = vmatmul.mubr.bf16.gmra.mrb[80].mxu0 %v7902_v50  ;;  %v9106_v38 = vpop.f32.mrb[212].mxu1 }
 0x43b   :  { %4567 = vmatprep.mubr.bf16.mxu0 %v7909_v53  ;;  %7233 = vmatmul.mubr.bf16.gmra.mrb[48].mxu1 %v7921_v20  ;;  %v3553_v39 = vpop.f32.mrb[213].mxu1  ;;  %v7917_v53 = vld [vmem:[#allocation8 + $0x168] ss:$12 sps:$4 sm:$0xff]  }
 0x43c   :  { %7236 = vmatprep.mubr.bf16.mxu1 %v7925_v48  ;;  %v9108_v58 = vpop.f32.mrb[214].mxu1  ;;  %v7924_v39 = vld [vmem:[#allocation8 + $0x184] ss:$12 sps:$4 sm:$0xff]  }
 0x43d   :  { %v3556_v23 = vpop.f32.mrb[215].mxu1 }
 0x442   :  { %4568 = vmatmul.mubr.bf16.gmra.mrb[84].mxu0 %v7907_v13  ;;  %v9110_v62 = vpop.f32.mrb[216].mxu1 }
 0x443   :  { %4575 = vmatprep.mubr.bf16.mxu0 %v7914_v44  ;;  %7237 = vmatmul.mubr.bf16.gmra.mrb[52].mxu1 %v7926_v55  ;;  %v3561_v11 = vpop.f32.mrb[217].mxu1  ;;  %v7940_v44 = vld [vmem:[#allocation8 + $0x188] ss:$12 sps:$4 sm:$0xff]  }
 0x444   :  { %7240 = vmatprep.mubr.bf16.mxu1 %v7930_v3  ;;  %v9112_v9 = vpop.f32.mrb[218].mxu1 }
 0x445   :  { %v3564_v5 = vpop.f32.mrb[219].mxu1 }
 0x44a   :  { %4576 = vmatmul.mubr.bf16.gmra.mrb[88].mxu0 %v7912_v43  ;;  %v9114_v31 = vpop.f32.mrb[220].mxu1 }
 0x44b   :  { %4583 = vmatprep.mubr.bf16.mxu0 %v7919_v25  ;;  %7241 = vmatmul.mubr.bf16.gmra.mrb[56].mxu1 %v7931_v51  ;;  %v3569_v28 = vpop.f32.mrb[221].mxu1  ;;  %v7922_v51 = vld [vmem:[#allocation8 + $0x180] ss:$12 sps:$4 sm:$0xff]  }
 0x44c   :  { %7244 = vmatprep.mubr.bf16.mxu1 %v7935_v59  ;;  %v9116_v7 = vpop.f32.mrb[222].mxu1  ;;  %v7929_v28 = vld [vmem:[#allocation8 + $0x19c] ss:$12 sps:$4 sm:$0xff]  }
 0x44d   :  { %v3572_v24 = vpop.f32.mrb[223].mxu1  ;;  %v7154_v50 = vpop.f32.mrb[240].mxu0 }
 0x44e   :  { %v9119_v20 = vadd.f32 %v7154_v50, %v9090_v22  ;;  %v3736_v48 = vpop.f32.mrb[241].mxu0 }
 0x44f   :  { %v9122_v23 = vadd.f32 %v3736_v48, %v9086_v18  ;;  %v7155_v13 = vpop.f32.mrb[242].mxu0  ;;  %v7937_v18 = vld [vmem:[#allocation8 + $0x1c8] ss:$12 sps:$4 sm:$0xff]  }
 0x450   :  { %v9125_v55 = vadd.f32 %v7155_v13, %v9092_v41  ;;  %v3739_v3 = vpop.f32.mrb[243].mxu0 }
 0x451   :  { %v9128_v11 = vadd.f32 %v3739_v3, %v9088_v21 }
 0x452   :  { %4584 = vmatmul.mubr.bf16.gmra.mrb[92].mxu0 %v7917_v53  ;;  %v9130_v45 = vpop.f32.mrb[224].mxu1  ;;  %v7945_v53 = vld [vmem:[#allocation8 + $0x1b8] ss:$12 sps:$4 sm:$0xff]  }
 0x453   :  { %4591 = vmatprep.mubr.bf16.mxu0 %v7924_v39  ;;  %7245 = vmatmul.mubr.bf16.gmra.mrb[60].mxu1 %v7936_v2  ;;  %v3577_v5 = vpop.f32.mrb[225].mxu1 }
 0x454   :  { %7248 = vmatprep.mubr.bf16.mxu1 %v7940_v44  ;;  %v9136_v43 = vpop.f32.mrb[226].mxu1 }
 0x455   :  { %v3580_v41 = vpop.f32.mrb[227].mxu1  ;;  %v7158_v25 = vpop.f32.mrb[244].mxu0 }
 0x456   :  { %v9139_v21 = vadd.f32 %v7158_v25, %v9098_v10  ;;  %v3752_v59 = vpop.f32.mrb[245].mxu0  ;;  %v7927_v41 = vld [vmem:[#allocation8 + $0x198] ss:$12 sps:$4 sm:$0xff]  }
 0x457   :  { %v9142_v24 = vadd.f32 %v3752_v59, %v9094_v35  ;;  %v7159_v50 = vpop.f32.mrb[246].mxu0  ;;  %v7946_v59 = vld [vmem:[#allocation8 + $0x1d0] ss:$12 sps:$4 sm:$0xff]  }
 0x458   :  { %v9145_v48 = vadd.f32 %v7159_v50, %v9100_v60  ;;  %v3755_v39 = vpop.f32.mrb[247].mxu0 }
 0x459   :  { %v9148_v2 = vadd.f32 %v3755_v39, %v9096_v29 }
 0x45a   :  { %4592 = vmatmul.mubr.bf16.gmra.mrb[96].mxu0 %v7922_v51  ;;  %v3583_v13 = vpop.f32.mrb[228].mxu1  ;;  %v7934_v51 = vld [vmem:[#allocation8 + $0x1b4] ss:$12 sps:$4 sm:$0xff]  }
 0x45b   :  { %4599 = vmatprep.mubr.bf16.mxu0 %v7929_v28  ;;  %7249 = vmatmul.mubr.bf16.gmra.mrb[64].mxu1 %v7941_v15  ;;  %v3585_v44 = vpop.f32.mrb[229].mxu1  ;;  %v7950_v15 = vld [vmem:[#allocation8 + $0x1e8] ss:$12 sps:$4 sm:$0xff]  }
 0x45c   :  { %7252 = vmatprep.mubr.bf16.mxu1 %v7945_v53  ;;  %v3586_v3 = vpop.f32.mrb[230].mxu1 }
 0x45d   :  { %v3588_v5 = vpop.f32.mrb[231].mxu1  ;;  %v7162_v60 = vpop.f32.mrb[248].mxu0 }
 0x45e   :  { %v9155_v25 = vadd.f32 %v7162_v60, %v9106_v38  ;;  %v3768_v29 = vpop.f32.mrb[249].mxu0 }
 0x45f   :  { %v9158_v50 = vadd.f32 %v3768_v29, %v9102_v26  ;;  %v7163_v28 = vpop.f32.mrb[250].mxu0 }
 0x460   :  { %v9161_v39 = vadd.f32 %v7163_v28, %v9108_v58  ;;  %v3771_v44 = vpop.f32.mrb[251].mxu0  ;;  %v7932_v28 = vld [vmem:[#allocation8 + $0x1b0] ss:$12 sps:$4 sm:$0xff]  }
 0x461   :  { %v9164_v53 = vadd.f32 %v3771_v44, %v9104_v8  ;;  %v7951_v44 = vld [vmem:[#allocation8 + $0x200] ss:$12 sps:$4 sm:$0xff]  }
 0x462   :  { %4600 = vmatmul.mubr.bf16.gmra.mrb[100].mxu0 %v7927_v41  ;;  %v3591_v5 = vpop.f32.mrb[232].mxu1  ;;  %v7939_v41 = vld [vmem:[#allocation8 + $0x1cc] ss:$12 sps:$4 sm:$0xff]  }
 0x463   :  { %4607 = vmatprep.mubr.bf16.mxu0 %v7934_v51  ;;  %7253 = vmatmul.mubr.bf16.gmra.mrb[68].mxu1 %v7946_v59  ;;  %v3593_v60 = vpop.f32.mrb[233].mxu1  ;;  %v7955_v59 = vld [vmem:[#allocation8 + $0x218] ss:$12 sps:$4 sm:$0xff]  }
 0x464   :  { %7256 = vmatprep.mubr.bf16.mxu1 %v7950_v15  ;;  %v3594_v29 = vpop.f32.mrb[234].mxu1 }
 0x465   :  { %v3596_v10 = vpop.f32.mrb[235].mxu1  ;;  %v7166_v58 = vpop.f32.mrb[252].mxu0 }
 0x466   :  { %v9171_v35 = vadd.f32 %v7166_v58, %v9114_v31  ;;  %v3784_v8 = vpop.f32.mrb[253].mxu0 }
 0x467   :  { %v9174_v22 = vadd.f32 %v3784_v8, %v9110_v62  ;;  %v7167_v51 = vpop.f32.mrb[254].mxu0 }
 0x468   :  { %v9177_v60 = vadd.f32 %v7167_v51, %v9116_v7  ;;  %v3787_v38 = vpop.f32.mrb[255].mxu0  ;;  %v7966_v51 = vld [vmem:[#allocation10 + $0x70] sm:$0xff]  }
 0x469   :  { %v9180_v15 = vadd.f32 %v3787_v38, %v9112_v9  ;;  %v7944_v38 = vld [vmem:[#allocation8 + $0x1e4] ss:$12 sps:$4 sm:$0xff]   ;;  %7276 = vmatprep.subr.bf16.mxu1 %v7966_v51 }
 0x46a   :  { %4608 = vmatmul.mubr.bf16.gmra.mrb[104].mxu0 %v7932_v28  ;;  %v3599_v10 = vpop.f32.mrb[236].mxu1  ;;  %v7956_v28 = vld [vmem:[#allocation8 + $0x230] ss:$12 sps:$4 sm:$0xff]   ;;  %7277 = vmatpush3.bf16.msra.mxu1 %v7966_v51  ;;  %v7942_v51 = vld [vmem:[#allocation8 + $0x1e0] ss:$12 sps:$4 sm:$0xff]  }
 0x46b   :  { %4615 = vmatprep.mubr.bf16.mxu0 %v7939_v41  ;;  %7257 = vmatmul.mubr.bf16.gmra.mrb[72].mxu1 %v7951_v44  ;;  %v3601_v58 = vpop.f32.mrb[237].mxu1 }
 0x46c   :  { %7260 = vmatprep.mubr.bf16.mxu1 %v7955_v59  ;;  %v3602_v8 = vpop.f32.mrb[238].mxu1 }
 0x46d   :  { %v3604_v26 = vpop.f32.mrb[239].mxu1  ;;  %v7170_v7 = vpop.f32.mrb[0].mxu0 }
 0x46e   :  { %v9186_v56 = vadd.f32 %v7170_v7, %v3583_v13  ;;  %v3800_v9 = vpop.f32.mrb[1].mxu0  ;;  %v7967_v26 = vld [vmem:[#allocation10 + $0x78] sm:$0xff]  }
 0x46f   :  { %v9189_v1 = vadd.f32 %v3800_v9, %v9130_v45  ;;  %v7171_v41 = vpop.f32.mrb[2].mxu0  ;;  %7278 = vmatprep.subr.bf16.mxu1 %v7967_v26 }
 0x470   :  { %v9191_v44 = vadd.f32 %v7171_v41, %v3586_v3  ;;  %v3803_v58 = vpop.f32.mrb[3].mxu0  ;;  %7279 = vmatpush3.bf16.msra.mxu1 %v7967_v26 }
 0x471   :  { %v9194_v59 = vadd.f32 %v3803_v58, %v9136_v43 }
 0x472   :  { %4616 = vmatmul.mubr.bf16.gmra.mrb[108].mxu0 %v7937_v18  ;;  %v3607_v31 = vpop.f32.mrb[240].mxu1  ;;  %v7949_v18 = vld [vmem:[#allocation8 + $0x1fc] ss:$12 sps:$4 sm:$0xff]  }
 0x473   :  { %4623 = vmatprep.mubr.bf16.mxu0 %v7944_v38  ;;  %7261 = vmatmul.mubr.bf16.gmra.mrb[76].mxu1 %v7956_v28  ;;  %v3609_v7 = vpop.f32.mrb[241].mxu1 }
 0x474   :  { %v3610_v9 = vpop.f32.mrb[242].mxu1 }
 0x475   :  { %v3612_v3 = vpop.f32.mrb[243].mxu1  ;;  %v7174_v41 = vpop.f32.mrb[4].mxu0 }
 0x476   :  { %v9200_v43 = vadd.f32 %v7174_v41, %v3599_v10  ;;  %v3816_v58 = vpop.f32.mrb[5].mxu0 }
 0x477   :  { %v9202_v62 = vadd.f32 %v3816_v58, %v3591_v5  ;;  %v7175_v61 = vpop.f32.mrb[6].mxu0  ;;  %v7947_v58 = vld [vmem:[#allocation8 + $0x1f8] ss:$12 sps:$4 sm:$0xff]  }
 0x478   :  { %v9204_v13 = vadd.f32 %v7175_v61, %v3602_v8  ;;  %v3819_v38 = vpop.f32.mrb[7].mxu0  ;;  %v7954_v8 = vld [vmem:[#allocation8 + $0x214] ss:$12 sps:$4 sm:$0xff]  }
 0x479   :  { %v9206_v28 = vadd.f32 %v3819_v38, %v3594_v29 }
 0x47a   :  { %4624 = vmatmul.mubr.bf16.gmra.mrb[112].mxu0 %v7942_v51  ;;  %v3615_v7 = vpop.f32.mrb[244].mxu1 }
 0x47b   :  { %4631 = vmatprep.mubr.bf16.mxu0 %v7949_v18  ;;  %v3617_v26 = vpop.f32.mrb[245].mxu1 }
 0x47c   :  { %v3618_v41 = vpop.f32.mrb[246].mxu1 }
 0x47d   :  { %v3620_v45 = vpop.f32.mrb[247].mxu1  ;;  %v7178_v5 = vpop.f32.mrb[8].mxu0 }
 0x47e   :  { %v9212_v4 = vadd.f32 %v7178_v5, %v3615_v7  ;;  %v3832_v61 = vpop.f32.mrb[9].mxu0 }
 0x47f   :  { %v9214_v29 = vadd.f32 %v3832_v61, %v3607_v31  ;;  %v7179_v51 = vpop.f32.mrb[10].mxu0  ;;  %v7952_v61 = vld [vmem:[#allocation8 + $0x210] ss:$12 sps:$4 sm:$0xff]  }
 0x480   :  { %v9216_v38 = vadd.f32 %v7179_v51, %v3618_v41  ;;  %v3835_v6 = vpop.f32.mrb[11].mxu0  ;;  %v7959_v41 = vld [vmem:[#allocation8 + $0x22c] ss:$12 sps:$4 sm:$0xff]  }
 0x481   :  { %v9218_v3 = vadd.f32 %v3835_v6, %v3610_v9 }
 0x482   :  { %4632 = vmatmul.mubr.bf16.gmra.mrb[116].mxu0 %v7947_v58  ;;  %v3623_v18 = vpop.f32.mrb[248].mxu1 }
 0x483   :  { %4639 = vmatprep.mubr.bf16.mxu0 %v7954_v8  ;;  %v3625_v45 = vpop.f32.mrb[249].mxu1 }
 0x484   :  { %v3626_v5 = vpop.f32.mrb[250].mxu1 }
 0x485   :  { %v3628_v10 = vpop.f32.mrb[251].mxu1  ;;  %v7182_v31 = vpop.f32.mrb[12].mxu0 }
 0x486   :  { %v3848_v0 = vpop.f32.mrb[13].mxu0 }
 0x487   :  { %v9224_v51 = vadd.f32 %v3848_v0, %v3623_v18  ;;  %v7183_v6 = vpop.f32.mrb[14].mxu0  ;;  %v7957_v0 = vld [vmem:[#allocation8 + $0x228] ss:$12 sps:$4 sm:$0xff]  }
 0x488   :  { %v3851_v9 = vpop.f32.mrb[15].mxu0 }
 0x489   :  { %9674 = vst [vmem:[#allocation67_spill] sm:$0xff] %v9224_v51  ;;  %v9226_v58 = vadd.f32 %v3851_v9, %v3626_v5 }
 0x48a   :  { %4640 = vmatmul.mubr.bf16.gmra.mrb[120].mxu0 %v7952_v61  ;;  %v3631_v37 = vpop.f32.mrb[252].mxu1 }
 0x48b   :  { %4647 = vmatprep.mubr.bf16.mxu0 %v7959_v41  ;;  %v3633_v8 = vpop.f32.mrb[253].mxu1  ;;  %v9228_v45 = vadd.f32 %v7182_v31, %v3631_v37 }
 0x48c   :  { %v3634_v10 = vpop.f32.mrb[254].mxu1 }
 0x48d   :  { %9675 = vst [vmem:[#allocation68_spill] sm:$0xff] %v9228_v45  ;;  %v3636_v7 = vpop.f32.mrb[255].mxu1  ;;  %v9232_v33 = vadd.f32 %v7183_v6, %v3634_v10  ;;  %v7186_v14 = vpop.f32.mrb[16].mxu0 }
 0x48e   :  { %v3864_v18 = vpop.f32.mrb[17].mxu0 }
 0x48f   :  { %9676 = vst [vmem:[#allocation69_spill] sm:$0xff] %v9232_v33  ;;  %v7187_v9 = vpop.f32.mrb[18].mxu0 }
 0x490   :  { %v3867_v61 = vpop.f32.mrb[19].mxu0 }
 0x492   :  { %4648 = vmatmul.mubr.bf16.gmra.mrb[124].mxu0 %v7957_v0  ;;  %v3639_v41 = vpop.f32.mrb[0].mxu1 }
 0x493   :  { %v3641_v8 = vpop.f32.mrb[1].mxu1  ;;  %v9236_v37 = vadd.f32 %v3864_v18, %v3639_v41 }
 0x494   :  { %v3642_v31 = vpop.f32.mrb[2].mxu1 }
 0x495   :  { %9677 = vst [vmem:[#allocation70_spill] sm:$0xff] %v9236_v37  ;;  %v3644_v34 = vpop.f32.mrb[3].mxu1  ;;  %v9238_v26 = vadd.f32 %v3867_v61, %v3642_v31  ;;  %v7190_v7 = vpop.f32.mrb[20].mxu0 }
 0x496   :  { %v3880_v6 = vpop.f32.mrb[21].mxu0 }
 0x497   :  { %9678 = vst [vmem:[#allocation71_spill] sm:$0xff] %v9238_v26  ;;  %v7191_v17 = vpop.f32.mrb[22].mxu0 }
 0x498   :  { %v3883_v52 = vpop.f32.mrb[23].mxu0 }
 0x49a   :  { %v3647_v54 = vpop.f32.mrb[4].mxu1 }
 0x49b   :  { %v3649_v5 = vpop.f32.mrb[5].mxu1  ;;  %v9242_v42 = vadd.f32 %v7186_v14, %v3647_v54 }
 0x49c   :  { %v3650_v0 = vpop.f32.mrb[6].mxu1 }
 0x49d   :  { %9679 = vst [vmem:[#allocation72_spill] sm:$0xff] %v9242_v42  ;;  %v3652_v46 = vpop.f32.mrb[7].mxu1  ;;  %v9244_v8 = vadd.f32 %v7187_v9, %v3650_v0  ;;  %v7194_v18 = vpop.f32.mrb[24].mxu0 }
 0x49e   :  { %v3896_v41 = vpop.f32.mrb[25].mxu0 }
 0x49f   :  { %9680 = vst [vmem:[#allocation73_spill] sm:$0xff] %v9244_v8  ;;  %v7195_v61 = vpop.f32.mrb[26].mxu0 }
 0x4a0   :  { %v3899_v31 = vpop.f32.mrb[27].mxu0 }
 0x4a2   :  { %v3655_v19 = vpop.f32.mrb[8].mxu1 }
 0x4a3   :  { %v3657_v47 = vpop.f32.mrb[9].mxu1  ;;  %v9248_v10 = vadd.f32 %v3880_v6, %v3655_v19 }
 0x4a4   :  { %v3658_v16 = vpop.f32.mrb[10].mxu1 }
 0x4a5   :  { %9681 = vst [vmem:[#allocation74_spill] sm:$0xff] %v9248_v10  ;;  %v3660_v27 = vpop.f32.mrb[11].mxu1  ;;  %v9250_v5 = vadd.f32 %v3883_v52, %v3658_v16  ;;  %v7198_v54 = vpop.f32.mrb[28].mxu0 }
 0x4a6   :  { %v3912_v14 = vpop.f32.mrb[29].mxu0 }
 0x4a7   :  { %9682 = vst [vmem:[#allocation75_spill] sm:$0xff] %v9250_v5  ;;  %v7199_v9 = vpop.f32.mrb[30].mxu0 }
 0x4a8   :  { %v3915_v0 = vpop.f32.mrb[31].mxu0 }
 0x4aa   :  { %v3663_v30 = vpop.f32.mrb[12].mxu1 }
 0x4ab   :  { %v3665_v12 = vpop.f32.mrb[13].mxu1  ;;  %v9254_v34 = vadd.f32 %v7190_v7, %v3663_v30 }
 0x4ac   :  { %v3666_v63 = vpop.f32.mrb[14].mxu1 }
 0x4ad   :  { %9683 = vst [vmem:[#allocation76_spill] sm:$0xff] %v9254_v34  ;;  %v3668_v57 = vpop.f32.mrb[15].mxu1  ;;  %v9256_v47 = vadd.f32 %v7191_v17, %v3666_v63  ;;  %v9258_v19 = vpop.f32.mrb[32].mxu0 }
 0x4ae   :  { %v4467_v27 = vpop.f32.mrb[33].mxu0 }
 0x4af   :  { %9684 = vst [vmem:[#allocation77_spill] sm:$0xff] %v9256_v47  ;;  %v9262_v52 = vpop.f32.mrb[34].mxu0 }
 0x4b0   :  { %v4470_v6 = vpop.f32.mrb[35].mxu0 }
 0x4b2   :  { %v3671_v46 = vpop.f32.mrb[16].mxu1 }
 0x4b3   :  { %v3673_v49 = vpop.f32.mrb[17].mxu1  ;;  %v9264_v40 = vadd.f32 %v3896_v41, %v3671_v46 }
 0x4b4   :  { %v3674_v12 = vpop.f32.mrb[18].mxu1 }
 0x4b5   :  { %9685 = vst [vmem:[#allocation78_spill] sm:$0xff] %v9264_v40  ;;  %v3676_v30 = vpop.f32.mrb[19].mxu1  ;;  %v9266_v7 = vadd.f32 %v3899_v31, %v3674_v12  ;;  %v4473_v57 = vpop.f32.mrb[36].mxu0 }
 0x4b6   :  { %v4475_v63 = vpop.f32.mrb[37].mxu0 }
 0x4b7   :  { %9686 = vst [vmem:[#allocation79_spill] sm:$0xff] %v9266_v7  ;;  %v4476_v27 = vpop.f32.mrb[38].mxu0  ;;  %v7968_v63 = vld [vmem:[#allocation10] sm:$0xff]  }
 0x4b8   :  { %v4478_v36 = vpop.f32.mrb[39].mxu0  ;;  %7328 = vmatprep.subr.bf16.mxu1 %v7968_v63 }
 0x4ba   :  { %v3679_v32 = vpop.f32.mrb[20].mxu1 }
 0x4bb   :  { %v3681_v16 = vpop.f32.mrb[21].mxu1  ;;  %v9270_v34 = vadd.f32 %v7194_v18, %v3679_v32 }
 0x4bc   :  { %v3682_v6 = vpop.f32.mrb[22].mxu1 }
 0x4bd   :  { %9687 = vst [vmem:[#allocation80_spill] sm:$0xff] %v9270_v34  ;;  %v3684_v47 = vpop.f32.mrb[23].mxu1  ;;  %v9272_v49 = vadd.f32 %v7195_v61, %v3682_v6  ;;  %v9274_v41 = vpop.f32.mrb[40].mxu0 }
 0x4be   :  { %v4483_v46 = vpop.f32.mrb[41].mxu0 }
 0x4bf   :  { %9688 = vst [vmem:[#allocation81_spill] sm:$0xff] %v9272_v49  ;;  %v9278_v12 = vpop.f32.mrb[42].mxu0 }
 0x4c0   :  { %v4486_v30 = vpop.f32.mrb[43].mxu0 }
 0x4c2   :  { %v3687_v17 = vpop.f32.mrb[24].mxu1 }
 0x4c3   :  { %v3689_v36 = vpop.f32.mrb[25].mxu1  ;;  %v9280_v16 = vadd.f32 %v3912_v14, %v3687_v17 }
 0x4c4   :  { %v3690_v32 = vpop.f32.mrb[26].mxu1 }
 0x4c5   :  { %9689 = vst [vmem:[#allocation82_spill] sm:$0xff] %v9280_v16  ;;  %v3692_v18 = vpop.f32.mrb[27].mxu1  ;;  %v9282_v47 = vadd.f32 %v3915_v0, %v3690_v32  ;;  %v4489_v61 = vpop.f32.mrb[44].mxu0 }
 0x4c6   :  { %v4491_v6 = vpop.f32.mrb[45].mxu0 }
 0x4c7   :  { %9690 = vst [vmem:[#allocation83_spill] sm:$0xff] %v9282_v47  ;;  %v4492_v40 = vpop.f32.mrb[46].mxu0 }
 0x4c8   :  { %v4494_v31 = vpop.f32.mrb[47].mxu0 }
 0x4ca   :  { %v3695_v34 = vpop.f32.mrb[28].mxu1 }
 0x4cb   :  { %v9286_v49 = vadd.f32 %v7198_v54, %v3695_v34  ;;  %v3697_v30 = vpop.f32.mrb[29].mxu1 }
 0x4cc   :  { %v3698_v7 = vpop.f32.mrb[30].mxu1 }
 0x4cd   :  { %9691 = vst [vmem:[#allocation84_spill] sm:$0xff] %v9286_v49  ;;  %v9288_v10 = vadd.f32 %v7199_v9, %v3698_v7  ;;  %v3700_v14 = vpop.f32.mrb[31].mxu1  ;;  %v4497_v17 = vpop.f32.mrb[48].mxu0 }
 0x4ce   :  { %v4499_v36 = vpop.f32.mrb[49].mxu0 }
 0x4cf   :  { %9692 = vst [vmem:[#allocation85_spill] sm:$0xff] %v9288_v10  ;;  %v9292_v32 = vpop.f32.mrb[50].mxu0 }
 0x4d0   :  { %v4502_v18 = vpop.f32.mrb[51].mxu0 }
 0x4d5   :  { %v4505_v6 = vpop.f32.mrb[52].mxu0 }
 0x4d6   :  { %v4507_v46 = vpop.f32.mrb[53].mxu0 }
 0x4d7   :  { %v4508_v16 = vpop.f32.mrb[54].mxu0 }
 0x4d8   :  { %v4510_v31 = vpop.f32.mrb[55].mxu0 }
 0x4dd   :  { %v9294_v47 = vpop.f32.mrb[56].mxu0 }
 0x4de   :  { %v4515_v34 = vpop.f32.mrb[57].mxu0 }
 0x4df   :  { %v9296_v54 = vpop.f32.mrb[58].mxu0 }
 0x4e0   :  { %v4518_v9 = vpop.f32.mrb[59].mxu0 }
 0x4e5   :  { %v9298_v7 = vpop.f32.mrb[60].mxu0 }
 0x4e6   :  { %v4523_v30 = vpop.f32.mrb[61].mxu0 }
 0x4e7   :  { %v9300_v14 = vpop.f32.mrb[62].mxu0 }
 0x4e8   :  { %v4526_v36 = vpop.f32.mrb[63].mxu0 }
 0x4e9   :  { %v7969_v36 = vld [vmem:[#allocation10 + $0x8] sm:$0xff]  }
 0x4ed   :  { %v9302_v0 = vpop.f32.mrb[64].mxu0 }
 0x4ee   :  { %v7218_v49 = vpop.f32.mrb[32].mxu1  ;;  %v4531_v18 = vpop.f32.mrb[65].mxu0 }
 0x4ef   :  { %v4690_v10 = vpop.f32.mrb[33].mxu1  ;;  %v4699_v46 = vadd.f32 %v7218_v49, %v4473_v57  ;;  %v9304_v5 = vpop.f32.mrb[66].mxu0 }
 0x4f0   :  { %v4691_v31 = vadd.f32 %v4690_v10, %v9258_v19  ;;  %v7219_v34 = vpop.f32.mrb[34].mxu1  ;;  %v4534_v42 = vpop.f32.mrb[67].mxu0 }
 0x4f1   :  { %v4693_v8 = vpop.f32.mrb[35].mxu1  ;;  %v4702_v9 = vadd.f32 %v7219_v34, %v4476_v27 }
 0x4f2   :  { %v4694_v37 = vadd.f32 %v4693_v8, %v9262_v52 }
 0x4f3   :  { %v4922_v30 = vpack.c.bf16 %v4702_v9, %v4699_v46 }
 0x4f4   :  { %v4921_v26 = vpack.c.bf16 %v4694_v37, %v4691_v31  ;;  %v7970_v37 = vld [vmem:[#allocation10 + $0x10] sm:$0xff]  }
 0x4f5   :  { %v9308_v45 = vpop.f32.mrb[68].mxu0 }
 0x4f6   :  { %v7222_v33 = vpop.f32.mrb[36].mxu1  ;;  %7280 = vmatprep.mubr.bf16.mxu1 %v4921_v26  ;;  %v4539_v18 = vpop.f32.mrb[69].mxu0 }
 0x4f7   :  { %v4706_v51 = vpop.f32.mrb[37].mxu1  ;;  %7281 = vmatmul.mubr.bf16.vlgmr.msra.gmra.mrb[80].mxu1 %v4922_v30  ;;  %v4715_v57 = vadd.f32 %v7222_v33, %v4489_v61  ;;  %v9310_v49 = vpop.f32.mrb[70].mxu0  ;;  %v7971_v33 = vld [vmem:[#allocation10 + $0x18] sm:$0xff]  }
 0x4f8   :  { %v4707_v10 = vadd.f32 %v4706_v51, %v9274_v41  ;;  %v7223_v42 = vpop.f32.mrb[38].mxu1  ;;  %v4542_v19 = vpop.f32.mrb[71].mxu0  ;;  %7329 = vmatpush3.bf16.msra.mxu1 %v7968_v63 }
 0x4f9   :  { %v4709_v27 = vpop.f32.mrb[39].mxu1  ;;  %v4718_v8 = vadd.f32 %v7223_v42, %v4492_v40  ;;  %7330 = vmatprep.subr.bf16.mxu1 %v7969_v36 }
 0x4fa   :  { %v4710_v52 = vadd.f32 %v4709_v27, %v9278_v12  ;;  %v7973_v27 = vld [vmem:[#allocation10 + $0x28] sm:$0xff]  }
 0x4fb   :  { %v4924_v46 = vpack.c.bf16 %v4718_v8, %v4715_v57 }
 0x4fc   :  { %v4923_v31 = vpack.c.bf16 %v4710_v52, %v4707_v10  ;;  %7331 = vmatpush3.bf16.msra.mxu1 %v7969_v36  ;;  %v7972_v36 = vld [vmem:[#allocation10 + $0x20] sm:$0xff]  }
 0x4fd   :  { %v9314_v26 = vpop.f32.mrb[72].mxu0  ;;  %7332 = vmatprep.subr.bf16.mxu1 %v7970_v37 }
 0x4fe   :  { %v7226_v61 = vpop.f32.mrb[40].mxu1  ;;  %7284 = vmatprep.mubr.bf16.mxu1 %v4923_v31  ;;  %v4547_v34 = vpop.f32.mrb[73].mxu0 }
 0x4ff   :  { %v4722_v51 = vpop.f32.mrb[41].mxu1  ;;  %7285 = vmatmul.mubr.bf16.gmra.mrb[84].mxu1 %v4924_v46  ;;  %v4731_v41 = vadd.f32 %v7226_v61, %v4505_v6  ;;  %v9316_v63 = vpop.f32.mrb[74].mxu0 }
 0x500   :  { %v4723_v40 = vadd.f32 %v4722_v51, %v4497_v17  ;;  %v7227_v9 = vpop.f32.mrb[42].mxu1  ;;  %v4550_v30 = vpop.f32.mrb[75].mxu0  ;;  %7333 = vmatpush3.bf16.msra.mxu1 %v7970_v37 }
 0x501   :  { %v4725_v12 = vpop.f32.mrb[43].mxu1  ;;  %v4734_v18 = vadd.f32 %v7227_v9, %v4508_v16  ;;  %7334 = vmatprep.subr.bf16.mxu1 %v7971_v33  ;;  %v7975_v9 = vld [vmem:[#allocation10 + $0x38] sm:$0xff]  }
 0x502   :  { %v4726_v57 = vadd.f32 %v4725_v12, %v9292_v32 }
 0x503   :  { %v4926_v10 = vpack.c.bf16 %v4734_v18, %v4731_v41 }
 0x504   :  { %v4925_v42 = vpack.c.bf16 %v4726_v57, %v4723_v40  ;;  %7335 = vmatpush3.bf16.msra.mxu1 %v7971_v33  ;;  %v7974_v33 = vld [vmem:[#allocation10 + $0x30] sm:$0xff]  }
 0x505   :  { %v4553_v19 = vpop.f32.mrb[76].mxu0  ;;  %7336 = vmatprep.subr.bf16.mxu1 %v7972_v36 }
 0x506   :  { %v7230_v8 = vpop.f32.mrb[44].mxu1  ;;  %7288 = vmatprep.mubr.bf16.mxu1 %v4925_v42  ;;  %v4555_v6 = vpop.f32.mrb[77].mxu0 }
 0x507   :  { %v4738_v52 = vpop.f32.mrb[45].mxu1  ;;  %7289 = vmatmul.mubr.bf16.gmra.mrb[88].mxu1 %v4926_v10  ;;  %v4747_v17 = vadd.f32 %v7230_v8, %v9298_v7  ;;  %v4556_v37 = vpop.f32.mrb[78].mxu0 }
 0x508   :  { %v4739_v16 = vadd.f32 %v4738_v52, %v9294_v47  ;;  %v7231_v46 = vpop.f32.mrb[46].mxu1  ;;  %v4558_v31 = vpop.f32.mrb[79].mxu0  ;;  %7337 = vmatpush3.bf16.msra.mxu1 %v7972_v36 }
 0x509   :  { %v4741_v32 = vpop.f32.mrb[47].mxu1  ;;  %v4750_v61 = vadd.f32 %v7231_v46, %v9300_v14  ;;  %7338 = vmatprep.subr.bf16.mxu1 %v7973_v27 }
 0x50a   :  { %v4742_v34 = vadd.f32 %v4741_v32, %v9296_v54 }
 0x50b   :  { %v4928_v51 = vpack.c.bf16 %v4750_v61, %v4747_v17 }
 0x50c   :  { %v4927_v41 = vpack.c.bf16 %v4742_v34, %v4739_v16  ;;  %7339 = vmatpush3.bf16.msra.mxu1 %v7973_v27 }
 0x50d   :  { %v4561_v40 = vpop.f32.mrb[80].mxu0  ;;  %7340 = vmatprep.subr.bf16.mxu1 %v7974_v33 }
 0x50e   :  { %v7234_v7 = vpop.f32.mrb[48].mxu1  ;;  %7292 = vmatprep.mubr.bf16.mxu1 %v4927_v41  ;;  %v4563_v30 = vpop.f32.mrb[81].mxu0 }
 0x50f   :  { %v4754_v47 = vpop.f32.mrb[49].mxu1  ;;  %7293 = vmatmul.mubr.bf16.gmra.mrb[92].mxu1 %v4928_v51  ;;  %v4763_v12 = vadd.f32 %v7234_v7, %v9308_v45  ;;  %v4564_v18 = vpop.f32.mrb[82].mxu0 }
 0x510   :  { %v4755_v14 = vadd.f32 %v4754_v47, %v9302_v0  ;;  %v7235_v36 = vpop.f32.mrb[50].mxu1  ;;  %v4566_v57 = vpop.f32.mrb[83].mxu0  ;;  %7341 = vmatpush3.bf16.msra.mxu1 %v7974_v33 }
 0x511   :  { %v4757_v54 = vpop.f32.mrb[51].mxu1  ;;  %v4766_v10 = vadd.f32 %v7235_v36, %v9310_v49  ;;  %7342 = vmatprep.subr.bf16.mxu1 %v7975_v9 }
 0x512   :  { %v4758_v42 = vadd.f32 %v4757_v54, %v9304_v5 }
 0x513   :  { %v4930_v27 = vpack.c.bf16 %v4766_v10, %v4763_v12 }
 0x514   :  { %v4929_v8 = vpack.c.bf16 %v4758_v42, %v4755_v14  ;;  %7343 = vmatpush3.bf16.msra.mxu1 %v7975_v9 }
 0x515   :  { %v4569_v6 = vpop.f32.mrb[84].mxu0 }
 0x516   :  { %v7238_v52 = vpop.f32.mrb[52].mxu1  ;;  %7296 = vmatprep.mubr.bf16.mxu1 %v4929_v8  ;;  %v4571_v17 = vpop.f32.mrb[85].mxu0 }
 0x517   :  { %v4770_v45 = vpop.f32.mrb[53].mxu1  ;;  %7297 = vmatmul.mubr.bf16.gmra.mrb[96].mxu1 %v4930_v27  ;;  %v4779_v16 = vadd.f32 %v7238_v52, %v4553_v19  ;;  %v4572_v0 = vpop.f32.mrb[86].mxu0 }
 0x518   :  { %v4771_v46 = vadd.f32 %v4770_v45, %v9314_v26  ;;  %v7239_v31 = vpop.f32.mrb[54].mxu1  ;;  %v4574_v32 = vpop.f32.mrb[87].mxu0 }
 0x519   :  { %v4773_v61 = vpop.f32.mrb[55].mxu1  ;;  %v4782_v49 = vadd.f32 %v7239_v31, %v4556_v37 }
 0x51a   :  { %v4774_v33 = vadd.f32 %v4773_v61, %v9316_v63 }
 0x51b   :  { %v4932_v5 = vpack.c.bf16 %v4782_v49, %v4779_v16 }
 0x51c   :  { %v4931_v34 = vpack.c.bf16 %v4774_v33, %v4771_v46 }
 0x51d   :  { %v4577_v51 = vpop.f32.mrb[88].mxu0 }
 0x51e   :  { %v7242_v41 = vpop.f32.mrb[56].mxu1  ;;  %7300 = vmatprep.mubr.bf16.mxu1 %v4931_v34  ;;  %v4579_v9 = vpop.f32.mrb[89].mxu0 }
 0x51f   :  { %v4786_v7 = vpop.f32.mrb[57].mxu1  ;;  %7301 = vmatmul.mubr.bf16.gmra.mrb[100].mxu1 %v4932_v5  ;;  %v4795_v30 = vadd.f32 %v7242_v41, %v4569_v6  ;;  %v4580_v47 = vpop.f32.mrb[90].mxu0 }
 0x520   :  { %v4787_v19 = vadd.f32 %v4786_v7, %v4561_v40  ;;  %v7243_v12 = vpop.f32.mrb[58].mxu1  ;;  %v4582_v14 = vpop.f32.mrb[91].mxu0 }
 0x521   :  { %v4789_v26 = vpop.f32.mrb[59].mxu1  ;;  %v4798_v36 = vadd.f32 %v7243_v12, %v4572_v0 }
 0x522   :  { %v4790_v57 = vadd.f32 %v4789_v26, %v4564_v18 }
 0x523   :  { %v4934_v54 = vpack.c.bf16 %v4798_v36, %v4795_v30 }
 0x524   :  { %v4933_v37 = vpack.c.bf16 %v4790_v57, %v4787_v19 }
 0x525   :  { %v4585_v10 = vpop.f32.mrb[92].mxu0 }
 0x526   :  { %v7246_v63 = vpop.f32.mrb[60].mxu1  ;;  %7304 = vmatprep.mubr.bf16.mxu1 %v4933_v37  ;;  %v4587_v42 = vpop.f32.mrb[93].mxu0 }
 0x527   :  { %v4802_v27 = vpop.f32.mrb[61].mxu1  ;;  %7305 = vmatmul.mubr.bf16.gmra.mrb[104].mxu1 %v4934_v54  ;;  %v4811_v8 = vadd.f32 %v7246_v63, %v4585_v10  ;;  %v4588_v52 = vpop.f32.mrb[94].mxu0 }
 0x528   :  { %v4803_v17 = vadd.f32 %v4802_v27, %v4577_v51  ;;  %v7247_v45 = vpop.f32.mrb[62].mxu1  ;;  %v4590_v6 = vpop.f32.mrb[95].mxu0 }
 0x529   :  { %v4805_v16 = vpop.f32.mrb[63].mxu1  ;;  %v4814_v40 = vadd.f32 %v7247_v45, %v4588_v52 }
 0x52a   :  { %v4806_v46 = vadd.f32 %v4805_v16, %v4580_v47 }
 0x52b   :  { %v4936_v31 = vpack.c.bf16 %v4814_v40, %v4811_v8 }
 0x52c   :  { %v4935_v32 = vpack.c.bf16 %v4806_v46, %v4803_v17 }
 0x52d   :  { %v4593_v0 = vpop.f32.mrb[96].mxu0 }
 0x52e   :  { %v4595_v18 = vpop.f32.mrb[97].mxu0  ;;  %v7250_v61 = vpop.f32.mrb[64].mxu1  ;;  %7308 = vmatprep.mubr.bf16.mxu1 %v4935_v32 }
 0x52f   :  { %v4596_v49 = vpop.f32.mrb[98].mxu0  ;;  %v4818_v33 = vpop.f32.mrb[65].mxu1  ;;  %7309 = vmatmul.mubr.bf16.gmra.mrb[108].mxu1 %v4936_v31 }
 0x530   :  { %v4598_v5 = vpop.f32.mrb[99].mxu0  ;;  %v4819_v34 = vadd.f32 %v4818_v33, %v4593_v0  ;;  %v7251_v41 = vpop.f32.mrb[66].mxu1 }
 0x531   :  { %v4821_v9 = vpop.f32.mrb[67].mxu1 }
 0x532   :  { %v4822_v7 = vadd.f32 %v4821_v9, %v4596_v49 }
 0x534   :  { %v4937_v51 = vpack.c.bf16 %v4822_v7, %v4819_v34  ;;  %v7976_v7 = vld [vmem:[#allocation11] sm:$0xff]  }
 0x535   :  { %v4601_v30 = vpop.f32.mrb[100].mxu0  ;;  %7392 = vmatprep.subr.bf16.mxu0 %v7976_v7 }
 0x536   :  { %v4827_v19 = vadd.f32 %v7250_v61, %v4601_v30  ;;  %v4603_v12 = vpop.f32.mrb[101].mxu0  ;;  %v7254_v14 = vpop.f32.mrb[68].mxu1  ;;  %7312 = vmatprep.mubr.bf16.mxu1 %v4937_v51  ;;  %v7977_v51 = vld [vmem:[#allocation11 + $0x8] sm:$0xff]   ;;  %7393 = vmatpush3.bf16.msra.mxu0 %v7976_v7 }
 0x537   :  { %v4604_v47 = vpop.f32.mrb[102].mxu0  ;;  %v4834_v26 = vpop.f32.mrb[69].mxu1  ;;  %7394 = vmatprep.subr.bf16.mxu0 %v7977_v51 }
 0x538   :  { %v4830_v36 = vadd.f32 %v7251_v41, %v4604_v47  ;;  %v4606_v57 = vpop.f32.mrb[103].mxu0  ;;  %v7255_v54 = vpop.f32.mrb[70].mxu1 }
 0x539   :  { %v4837_v37 = vpop.f32.mrb[71].mxu1 }
 0x53a   :  { %v4938_v10 = vpack.c.bf16 %v4830_v36, %v4827_v19  ;;  %v7978_v36 = vld [vmem:[#allocation11 + $0x10] sm:$0xff]   ;;  %7395 = vmatpush3.bf16.msra.mxu0 %v7977_v51 }
 0x53b   :  { %7396 = vmatprep.subr.bf16.mxu0 %v7978_v36 }
 0x53c   :  { %7313 = vmatmul.mubr.bf16.gmra.mrb[112].mxu1 %v4938_v10 }
 0x53d   :  { %v4609_v63 = vpop.f32.mrb[104].mxu0 }
 0x53e   :  { %v4611_v42 = vpop.f32.mrb[105].mxu0  ;;  %v4835_v27 = vadd.f32 %v4834_v26, %v4609_v63  ;;  %v7258_v8 = vpop.f32.mrb[72].mxu1  ;;  %7397 = vmatpush3.bf16.msra.mxu0 %v7978_v36  ;;  %v9731_v36 = vld [vmem:[#allocation82_spill] sm:$0xff] }
 0x53f   :  { %v4612_v52 = vpop.f32.mrb[106].mxu0  ;;  %v4850_v17 = vpop.f32.mrb[73].mxu1 }
 0x540   :  { %v4614_v45 = vpop.f32.mrb[107].mxu0  ;;  %v4838_v6 = vadd.f32 %v4837_v37, %v4612_v52  ;;  %v7259_v16 = vpop.f32.mrb[74].mxu1 }
 0x541   :  { %v4853_v40 = vpop.f32.mrb[75].mxu1 }
 0x542   :  { %v4939_v46 = vpack.c.bf16 %v4838_v6, %v4835_v27  ;;  %v7981_v6 = vld [vmem:[#allocation11 + $0x28] sm:$0xff]  }
 0x544   :  { %7316 = vmatprep.mubr.bf16.mxu1 %v4939_v46 }
 0x545   :  { %v4617_v31 = vpop.f32.mrb[108].mxu0 }
 0x546   :  { %v4843_v32 = vadd.f32 %v7254_v14, %v4617_v31  ;;  %v4619_v0 = vpop.f32.mrb[109].mxu0  ;;  %v7262_v18 = vpop.f32.mrb[76].mxu1 }
 0x547   :  { %v4620_v61 = vpop.f32.mrb[110].mxu0  ;;  %v4866_v49 = vpop.f32.mrb[77].mxu1 }
 0x548   :  { %v4846_v33 = vadd.f32 %v7255_v54, %v4620_v61  ;;  %v4622_v5 = vpop.f32.mrb[111].mxu0  ;;  %v7263_v34 = vpop.f32.mrb[78].mxu1  ;;  %v7979_v54 = vld [vmem:[#allocation11 + $0x18] sm:$0xff]  }
 0x549   :  { %v4869_v41 = vpop.f32.mrb[79].mxu1  ;;  %7398 = vmatprep.subr.bf16.mxu0 %v7979_v54 }
 0x54a   :  { %v4940_v9 = vpack.c.bf16 %v4846_v33, %v4843_v32  ;;  %7399 = vmatpush3.bf16.msra.mxu0 %v7979_v54  ;;  %v7982_v54 = vld [vmem:[#allocation11 + $0x30] sm:$0xff]  }
 0x54c   :  { %7317 = vmatmul.mubr.bf16.gmra.mrb[116].mxu1 %v4940_v9 }
 0x54d   :  { %v4625_v30 = vpop.f32.mrb[112].mxu0 }
 0x54e   :  { %v4627_v19 = vpop.f32.mrb[113].mxu0  ;;  %v4851_v12 = vadd.f32 %v4850_v17, %v4625_v30  ;;  %v7980_v17 = vld [vmem:[#allocation11 + $0x20] sm:$0xff]  }
 0x54f   :  { %v4628_v47 = vpop.f32.mrb[114].mxu0  ;;  %7400 = vmatprep.subr.bf16.mxu0 %v7980_v17  ;;  %v9693_v19 = vpack.c.bf16 %v9128_v11, %v9122_v23  ;;  %v9698_v23 = vpack.c.bf16 %v9161_v39, %v9155_v25  ;;  %v9701_v11 = vpack.c.bf16 %v9194_v59, %v9189_v1  ;;  %v9706_v1 = vpack.c.bf16 %v9216_v38, %v9212_v4  ;;  %v9710_v25 = vld [vmem:[#allocation68_spill] sm:$0xff]  ;;  %v9712_v39 = vld [vmem:[#allocation71_spill] sm:$0xff]  ;;  %v9725_v38 = vld [vmem:[#allocation78_spill] sm:$0xff] }
 0x550   :  { %v4630_v26 = vpop.f32.mrb[115].mxu0  ;;  %v4854_v14 = vadd.f32 %v4853_v40, %v4628_v47  ;;  %7401 = vmatpush3.bf16.msra.mxu0 %v7980_v17  ;;  %v9718_v59 = vld [vmem:[#allocation75_spill] sm:$0xff]  ;;  %v9728_v47 = vld [vmem:[#allocation80_spill] sm:$0xff] }
 0x551   :  { %7402 = vmatprep.subr.bf16.mxu0 %v7981_v6 }
 0x552   :  { %v4941_v57 = vpack.c.bf16 %v4854_v14, %v4851_v12  ;;  %v9727_v12 = vld [vmem:[#allocation81_spill] sm:$0xff]  ;;  %v9730_v14 = vld [vmem:[#allocation83_spill] sm:$0xff] }
 0x553   :  { %v9729_v26 = vpack.c.bf16 %v9727_v12, %v9728_v47 }
 0x554   :  { %7320 = vmatprep.mubr.bf16.mxu1 %v4941_v57  ;;  %7403 = vmatpush3.bf16.msra.mxu0 %v7981_v6  ;;  %v9732_v57 = vpack.c.bf16 %v9730_v14, %v9731_v36 }
 0x555   :  { %v4633_v37 = vpop.f32.mrb[116].mxu0  ;;  %7404 = vmatprep.subr.bf16.mxu0 %v7982_v54 }
 0x556   :  { %v4859_v10 = vadd.f32 %v7258_v8, %v4633_v37  ;;  %v4635_v63 = vpop.f32.mrb[117].mxu0  ;;  %v9733_v37 = vld [vmem:[#allocation85_spill] sm:$0xff] }
 0x557   :  { %v4636_v42 = vpop.f32.mrb[118].mxu0 }
 0x558   :  { %v4862_v27 = vadd.f32 %v7259_v16, %v4636_v42  ;;  %v4638_v52 = vpop.f32.mrb[119].mxu0  ;;  %7405 = vmatpush3.bf16.msra.mxu0 %v7982_v54  ;;  %v7983_v42 = vld [vmem:[#allocation11 + $0x38] sm:$0xff]  }
 0x559   :  { %7406 = vmatprep.subr.bf16.mxu0 %v7983_v42  ;;  %v5568_v52 = vpop.permute.xlu1 %5567 }
 0x55a   :  { %v4942_v45 = vpack.c.bf16 %v4862_v27, %v4859_v10  ;;  %v9734_v10 = vld [vmem:[#allocation84_spill] sm:$0xff]  ;;  %v5558_v27 = vpop.permute.xlu0 %5557 }
 0x55b   :  { %v9735_v63 = vpack.c.bf16 %v9733_v37, %v9734_v10 }
 0x55c   :  { %7321 = vmatmul.mubr.bf16.gmra.mrb[120].mxu1 %v4942_v45  ;;  %7407 = vmatpush3.bf16.msra.mxu0 %v7983_v42 }
 0x55d   :  { %v4641_v40 = vpop.f32.mrb[120].mxu0  ;;  %v5573_v45 = vpop.permute.xlu1 %5572 }
 0x55e   :  { %v4643_v46 = vpop.f32.mrb[121].mxu0  ;;  %v4867_v31 = vadd.f32 %v4866_v49, %v4641_v40  ;;  %v9694_v49 = vpack.c.bf16 %v9125_v55, %v9119_v20  ;;  %v9699_v20 = vpack.c.bf16 %v9180_v15, %v9174_v22  ;;  %v9700_v55 = vpack.c.bf16 %v9177_v60, %v9171_v35  ;;  %v9709_v35 = vld [vmem:[#allocation69_spill] sm:$0xff]  ;;  %v5563_v17 = vpop.permute.xlu0 %5562 }
 0x55f   :  { %v4644_v32 = vpop.f32.mrb[122].mxu0  ;;  %v9704_v22 = vpack.c.bf16 %v9204_v13, %v9200_v43  ;;  %v9715_v15 = vld [vmem:[#allocation73_spill] sm:$0xff]  ;;  %v9719_v13 = vld [vmem:[#allocation74_spill] sm:$0xff] }
 0x560   :  { %v4646_v0 = vpop.f32.mrb[123].mxu0  ;;  %v4870_v61 = vadd.f32 %v4869_v41, %v4644_v32  ;;  %v9695_v41 = vpack.c.bf16 %v9148_v2, %v9142_v24  ;;  %v9703_v24 = vpack.c.bf16 %v9206_v28, %v9202_v62  ;;  %v9707_v2 = vld [vmem:[#allocation67_spill] sm:$0xff]  ;;  %v9716_v62 = vld [vmem:[#allocation72_spill] sm:$0xff]  ;;  %v9720_v4 = vpack.c.bf16 %v9718_v59, %v9719_v13  ;;  %v9721_v43 = vld [vmem:[#allocation77_spill] sm:$0xff] }
 0x561   :  { %v9722_v28 = vld [vmem:[#allocation76_spill] sm:$0xff]  ;;  %v5583_v40 = vpop.permute.xlu1 %5582 }
 0x562   :  { %v4943_v8 = vpack.c.bf16 %v4870_v61, %v4867_v31  ;;  %v5578_v6 = vpop.permute.xlu0 %5577 }
 0x564   :  { %7324 = vmatprep.mubr.bf16.mxu1 %v4943_v8 }
 0x565   :  { %v4649_v16 = vpop.f32.mrb[124].mxu0  ;;  %v5593_v31 = vpop.permute.xlu1 %5592 }
 0x566   :  { %v4875_v33 = vadd.f32 %v7262_v18, %v4649_v16  ;;  %v4651_v5 = vpop.f32.mrb[125].mxu0  ;;  %v9696_v18 = vpack.c.bf16 %v9145_v48, %v9139_v21  ;;  %v9702_v21 = vpack.c.bf16 %v9191_v44, %v9186_v56  ;;  %v9705_v48 = vpack.c.bf16 %v9218_v3, %v9214_v29  ;;  %v9724_v29 = vld [vmem:[#allocation79_spill] sm:$0xff]  ;;  %v5588_v46 = vpop.permute.xlu0 %5587 }
 0x567   :  { %v4652_v9 = vpop.f32.mrb[126].mxu0  ;;  %v9708_v56 = vpack.c.bf16 %v9226_v58, %v9707_v2  ;;  %v9717_v44 = vpack.c.bf16 %v9715_v15, %v9716_v62  ;;  %v9723_v3 = vpack.c.bf16 %v9721_v43, %v9722_v28  ;;  %v9726_v58 = vpack.c.bf16 %v9724_v29, %v9725_v38  ;;  %v9740_v15 = vld [vmem:[#allocation23_spill] sm:$0xff]  ;;  %v9741_v43 = vld [vmem:[#allocation24_spill] sm:$0xff] }
 0x568   :  { %v4878_v7 = vadd.f32 %v7263_v34, %v4652_v9  ;;  %v4654_v51 = vpop.f32.mrb[127].mxu0  ;;  %v9697_v34 = vpack.c.bf16 %v9164_v53, %v9158_v50  ;;  %v9711_v50 = vpack.c.bf16 %v9709_v35, %v9710_v25  ;;  %v9713_v53 = vld [vmem:[#allocation70_spill] sm:$0xff]  ;;  %v5801_v62 = vmul.f32 %v9740_v15, %v5588_v46 }
 0x569   :  { %v9714_v60 = vpack.c.bf16 %v9712_v39, %v9713_v53  ;;  %v9401_v0 = vpop.permute.xlu1 %5602  ;;  %v5799_v28 = vmul.f32 %v5578_v6, %v9741_v43 }
 0x56a   :  { %v4944_v30 = vpack.c.bf16 %v4878_v7, %v4875_v33  ;;  %v5598_v32 = vpop.permute.xlu0 %5597 }
 0x56c   :  { %7325 = vmatmul.mubr.bf16.gmra.mrb[124].mxu1 %v4944_v30  ;;  %v9736_v30 = vld [vmem:[#allocation19_spill] sm:$0xff] }
 0x56d   :  { %7344 = vmatprep.mubr.bf16.mxu1 %v9693_v19  ;;  %v5613_v8 = vpop.permute.xlu1 %5612  ;;  %v5797_v19 = vmul.f32 %v9736_v30, %v5568_v52  ;;  %v9745_v30 = vld [vmem:[#allocation28_spill] sm:$0xff] }
 0x56e   :  { %v5608_v61 = vpop.permute.xlu0 %5607 }
 0x571   :  { %v9405_v33 = vpop.permute.xlu1 %5622 }
 0x572   :  { %v9403_v16 = vpop.permute.xlu0 %5617 }
 0x574   :  { %7345 = vmatmul.mubr.bf16.vlgmr.msra.gmra.mrb[80].mxu1 %v9694_v49 }
 0x575   :  { %7348 = vmatprep.mubr.bf16.mxu1 %v9695_v41  ;;  %v9409_v9 = vpop.permute.xlu1 %5632 }
 0x576   :  { %v9407_v5 = vpop.permute.xlu0 %5627 }
 0x579   :  { %v9413_v51 = vpop.permute.xlu1 %5642 }
 0x57a   :  { %v9411_v7 = vpop.permute.xlu0 %5637 }
 0x57c   :  { %7349 = vmatmul.mubr.bf16.gmra.mrb[84].mxu1 %v9696_v18  ;;  %v9737_v18 = vld [vmem:[#allocation20_spill] sm:$0xff] }
 0x57d   :  { %7352 = vmatprep.mubr.bf16.mxu1 %v9697_v34  ;;  %v5795_v34 = vmul.f32 %v5558_v27, %v9737_v18 }
 0x57e   :  { %v9416_v49 = vpop.permute.xlu0 %5647 }
 0x582   :  { %v9423_v39 = vpop.permute.xlu0 %5657 }
 0x584   :  { %7353 = vmatmul.mubr.bf16.gmra.mrb[88].mxu1 %v9698_v23  ;;  %v9738_v23 = vld [vmem:[#allocation21_spill] sm:$0xff] }
 0x585   :  { %7356 = vmatprep.mubr.bf16.mxu1 %v9699_v20  ;;  %v5798_v20 = vmul.f32 %v9738_v23, %v5573_v45 }
 0x586   :  { %v9431_v54 = vpop.permute.xlu0 %5667 }
 0x58a   :  { %v9438_v23 = vpop.permute.xlu0 %5677 }
 0x58c   :  { %7357 = vmatmul.mubr.bf16.gmra.mrb[92].mxu1 %v9700_v55 }
 0x58d   :  { %7360 = vmatprep.mubr.bf16.mxu1 %v9701_v11 }
 0x594   :  { %7361 = vmatmul.mubr.bf16.gmra.mrb[96].mxu1 %v9702_v21  ;;  %v9420_v21 = vpop.permute.xlu1 %5652 }
 0x595   :  { %7364 = vmatprep.mubr.bf16.mxu1 %v9703_v24 }
 0x598   :  { %v9426_v59 = vpop.permute.xlu1 %5662 }
 0x59c   :  { %7365 = vmatmul.mubr.bf16.gmra.mrb[100].mxu1 %v9704_v22  ;;  %v9433_v42 = vpop.permute.xlu1 %5672 }
 0x59d   :  { %7368 = vmatprep.mubr.bf16.mxu1 %v9705_v48  ;;  %v9739_v48 = vld [vmem:[#allocation22_spill] sm:$0xff] }
 0x5a4   :  { %7369 = vmatmul.mubr.bf16.gmra.mrb[104].mxu1 %v9706_v1  ;;  %v5796_v1 = vmul.f32 %v5563_v17, %v9739_v48  ;;  %v9744_v17 = vld [vmem:[#allocation27_spill] sm:$0xff] }
 0x5a5   :  { %7372 = vmatprep.mubr.bf16.mxu1 %v9708_v56  ;;  %v5805_v45 = vmul.f32 %v9744_v17, %v5608_v61  ;;  %v9442_v61 = vpop.permute.xlu1 %5682  ;;  %v9753_v17 = vld [vmem:[#allocation36_spill] sm:$0xff] }
 0x5ac   :  { %7373 = vmatmul.mubr.bf16.gmra.mrb[108].mxu1 %v9711_v50 }
 0x5ad   :  { %7376 = vmatprep.mubr.bf16.mxu1 %v9714_v60 }
 0x5b4   :  { %7377 = vmatmul.mubr.bf16.gmra.mrb[112].mxu1 %v9717_v44 }
 0x5b5   :  { %7380 = vmatprep.mubr.bf16.mxu1 %v9720_v4 }
 0x5bc   :  { %7381 = vmatmul.mubr.bf16.gmra.mrb[116].mxu1 %v9723_v3  ;;  %v9742_v3 = vld [vmem:[#allocation25_spill] sm:$0xff] }
 0x5bd   :  { %7384 = vmatprep.mubr.bf16.mxu1 %v9726_v58  ;;  %v5802_v29 = vmul.f32 %v9742_v3, %v5593_v31 }
 0x5c4   :  { %7385 = vmatmul.mubr.bf16.gmra.mrb[120].mxu1 %v9729_v26  ;;  %v9743_v26 = vld [vmem:[#allocation26_spill] sm:$0xff] }
 0x5c5   :  { %7388 = vmatprep.mubr.bf16.mxu1 %v9732_v57  ;;  %v5800_v14 = vmul.f32 %v5583_v40, %v9743_v26  ;;  %v9746_v40 = vld [vmem:[#allocation29_spill] sm:$0xff] }
 0x5cc   :  { %7389 = vmatmul.mubr.bf16.gmra.mrb[124].mxu1 %v9735_v63 }
 0x647   :  { %v7346_v41 = vpop.f32.mrb[80].mxu1 }
 0x648   :  { %v5845_v55 = vadd.f32 %v7346_v41, %v5797_v19  ;;  %v5316_v11 = vpop.f32.mrb[81].mxu1  ;;  %v5803_v19 = vmul.f32 %v5598_v32, %v9745_v30  ;;  %v5806_v41 = vmul.f32 %v9746_v40, %v5613_v8  ;;  %v9755_v40 = vld [vmem:[#allocation38_spill] sm:$0xff] }
 0x649   :  { %v5843_v24 = vadd.f32 %v5795_v34, %v5316_v11  ;;  %v7347_v22 = vpop.f32.mrb[82].mxu1  ;;  %v9747_v11 = vld [vmem:[#allocation30_spill] sm:$0xff] }
 0x64a   :  { %v5846_v2 = vadd.f32 %v7347_v22, %v5798_v20  ;;  %v5319_v56 = vpop.f32.mrb[83].mxu1  ;;  %v5893_v25 = vmax.f32 %v5845_v55, 0.0 }
 0x64b   :  { %v5844_v35 = vadd.f32 %v5796_v1, %v5319_v56  ;;  %v5891_v53 = vmax.f32 %v5843_v24, 0.0  ;;  %v5804_v24 = vmul.f32 %v9401_v0, %v9747_v11 }
 0x64c   :  { %v5894_v50 = vmax.f32 %v5846_v2, 0.0 }
 0x64d   :  { %v5892_v60 = vmax.f32 %v5844_v35, 0.0  ;;  %v9748_v35 = vld [vmem:[#allocation31_spill] sm:$0xff] }
 0x64e   :  { %v5940_v44 = vpack.c.bf16 %v5894_v50, %v5893_v25  ;;  %v5809_v25 = vmul.f32 %v9748_v35, %v9407_v5 }
 0x64f   :  { %v5939_v13 = vpack.c.bf16 %v5892_v60, %v5891_v53  ;;  %v7350_v4 = vpop.f32.mrb[84].mxu1  ;;  %v9446_v53 = vpop.permute.xlu0 %5687 }
 0x650   :  { %v5849_v38 = vadd.f32 %v7350_v4, %v5801_v62  ;;  %v5332_v58 = vpop.f32.mrb[85].mxu1  ;;  %v9749_v62 = vld [vmem:[#allocation32_spill] sm:$0xff] }
 0x651   :  { %v5847_v12 = vadd.f32 %v5799_v28, %v5332_v58  ;;  %v7351_v47 = vpop.f32.mrb[86].mxu1  ;;  %7408 = vmatprep.mubr.bf16.mxu0 %v5939_v13  ;;  %v5807_v0 = vmul.f32 %v9403_v16, %v9749_v62  ;;  %v9452_v28 = vpop.permute.xlu1 %5692 }
 0x652   :  { %v5850_v36 = vadd.f32 %v7351_v47, %v5802_v29  ;;  %v5335_v57 = vpop.f32.mrb[87].mxu1  ;;  %7409 = vmatmul.mubr.bf16.vlgmr.msra.gmra.mrb[128].mxu0 %v5940_v44  ;;  %v5897_v10 = vmax.f32 %v5849_v38, 0.0  ;;  %v9750_v44 = vld [vmem:[#allocation33_spill] sm:$0xff]  ;;  %v9751_v38 = vld [vmem:[#allocation34_spill] sm:$0xff] }
 0x653   :  { %v5848_v37 = vadd.f32 %v5800_v14, %v5335_v57  ;;  %v5895_v27 = vmax.f32 %v5847_v12, 0.0  ;;  %v5810_v13 = vmul.f32 %v9750_v44, %v9409_v9  ;;  %v5808_v5 = vmul.f32 %v9405_v33, %v9751_v38  ;;  %v9456_v16 = vpop.permute.xlu0 %5697  ;;  %v9752_v57 = vld [vmem:[#allocation35_spill] sm:$0xff] }
 0x654   :  { %v5898_v63 = vmax.f32 %v5850_v36, 0.0  ;;  %v5811_v33 = vmul.f32 %v9411_v7, %v9753_v17  ;;  %v9760_v38 = vld [vmem:[#allocation43_spill] sm:$0xff]  ;;  %v9763_v17 = vld [vmem:[#allocation46_spill] sm:$0xff] }
 0x655   :  { %v5896_v52 = vmax.f32 %v5848_v37, 0.0  ;;  %v5813_v37 = vmul.f32 %v9752_v57, %v9416_v49 }
 0x656   :  { %v5942_v6 = vpack.c.bf16 %v5898_v63, %v5897_v10  ;;  %v9460_v63 = vpop.permute.xlu1 %5702 }
 0x657   :  { %v5941_v46 = vpack.c.bf16 %v5896_v52, %v5895_v27  ;;  %v7354_v31 = vpop.f32.mrb[88].mxu1 }
 0x658   :  { %v5853_v18 = vadd.f32 %v7354_v31, %v5805_v45  ;;  %v5348_v34 = vpop.f32.mrb[89].mxu1  ;;  %v9754_v45 = vld [vmem:[#allocation37_spill] sm:$0xff] }
 0x659   :  { %v5851_v20 = vadd.f32 %v5803_v19, %v5348_v34  ;;  %v7355_v55 = vpop.f32.mrb[90].mxu1  ;;  %7412 = vmatprep.mubr.bf16.mxu0 %v5941_v46  ;;  %v5708_v34 = vpop.permute.xlu0 %5707 }
 0x65a   :  { %v5854_v22 = vadd.f32 %v7355_v55, %v5806_v41  ;;  %v5351_v48 = vpop.f32.mrb[91].mxu1  ;;  %7413 = vmatmul.mubr.bf16.gmra.mrb[132].mxu0 %v5942_v6  ;;  %v5901_v2 = vmax.f32 %v5853_v18, 0.0  ;;  %v5814_v6 = vmul.f32 %v9754_v45, %v9420_v21  ;;  %v5812_v41 = vmul.f32 %v9413_v51, %v9755_v40  ;;  %v9756_v21 = vld [vmem:[#allocation39_spill] sm:$0xff]  ;;  %v9758_v51 = vld [vmem:[#allocation41_spill] sm:$0xff] }
 0x65b   :  { %v5852_v1 = vadd.f32 %v5804_v24, %v5351_v48  ;;  %v5899_v56 = vmax.f32 %v5851_v20, 0.0  ;;  %v5713_v24 = vpop.permute.xlu1 %5712  ;;  %v5817_v48 = vmul.f32 %v9756_v21, %v9431_v54  ;;  %v5818_v35 = vmul.f32 %v9758_v51, %v9433_v42  ;;  %v9764_v40 = vld [vmem:[#allocation47_spill] sm:$0xff] }
 0x65c   :  { %v5902_v32 = vmax.f32 %v5854_v22, 0.0 }
 0x65d   :  { %v5900_v8 = vmax.f32 %v5852_v1, 0.0 }
 0x65e   :  { %v5944_v50 = vpack.c.bf16 %v5902_v32, %v5901_v2 }
 0x65f   :  { %v5943_v60 = vpack.c.bf16 %v5900_v8, %v5899_v56  ;;  %v7358_v15 = vpop.f32.mrb[92].mxu1  ;;  %v9757_v56 = vld [vmem:[#allocation40_spill] sm:$0xff] }
 0x660   :  { %v5857_v4 = vadd.f32 %v7358_v15, %v5809_v25  ;;  %v5364_v43 = vpop.f32.mrb[93].mxu1  ;;  %v5815_v8 = vmul.f32 %v9423_v39, %v9757_v56 }
 0x661   :  { %v5855_v3 = vadd.f32 %v5807_v0, %v5364_v43  ;;  %v7359_v29 = vpop.f32.mrb[94].mxu1  ;;  %7416 = vmatprep.mubr.bf16.mxu0 %v5943_v60  ;;  %v9474_v60 = vpop.permute.xlu0 %5717  ;;  %v9759_v0 = vld [vmem:[#allocation42_spill] sm:$0xff] }
 0x662   :  { %v5858_v58 = vadd.f32 %v7359_v29, %v5810_v13  ;;  %v5367_v12 = vpop.f32.mrb[95].mxu1  ;;  %7417 = vmatmul.mubr.bf16.gmra.mrb[136].mxu0 %v5944_v50  ;;  %v5905_v26 = vmax.f32 %v5857_v4, 0.0  ;;  %v5816_v44 = vmul.f32 %v9426_v59, %v9759_v0  ;;  %v9478_v4 = vpop.permute.xlu1 %5722 }
 0x663   :  { %v5856_v47 = vadd.f32 %v5808_v5, %v5367_v12  ;;  %v5903_v36 = vmax.f32 %v5855_v3, 0.0  ;;  %v5821_v5 = vmul.f32 %v9760_v38, %v9446_v53 }
 0x664   :  { %v5906_v14 = vmax.f32 %v5858_v58, 0.0 }
 0x665   :  { %v5904_v9 = vmax.f32 %v5856_v47, 0.0  ;;  %v5728_v12 = vpop.permute.xlu0 %5727 }
 0x666   :  { %v5946_v10 = vpack.c.bf16 %v5906_v14, %v5905_v26  ;;  %v9761_v14 = vld [vmem:[#allocation44_spill] sm:$0xff] }
 0x667   :  { %v5945_v27 = vpack.c.bf16 %v5904_v9, %v5903_v36  ;;  %v7362_v52 = vpop.f32.mrb[96].mxu1  ;;  %v5819_v59 = vmul.f32 %v9438_v23, %v9761_v14  ;;  %v9762_v36 = vld [vmem:[#allocation45_spill] sm:$0xff] }
 0x668   :  { %v5861_v46 = vadd.f32 %v7362_v52, %v5813_v37  ;;  %v5380_v31 = vpop.f32.mrb[97].mxu1  ;;  %v5822_v9 = vmul.f32 %v9762_v36, %v9452_v28  ;;  %v5825_v28 = vmul.f32 %v9764_v40, %v5708_v34 }
 0x669   :  { %v5859_v30 = vadd.f32 %v5811_v33, %v5380_v31  ;;  %v7363_v19 = vpop.f32.mrb[98].mxu1  ;;  %7420 = vmatprep.mubr.bf16.mxu0 %v5945_v27  ;;  %v5820_v33 = vmul.f32 %v9442_v61, %v9763_v17 }
 0x66a   :  { %v5862_v49 = vadd.f32 %v7363_v19, %v5814_v6  ;;  %v5383_v18 = vpop.f32.mrb[99].mxu1  ;;  %7421 = vmatmul.mubr.bf16.gmra.mrb[140].mxu0 %v5946_v10  ;;  %v5909_v55 = vmax.f32 %v5861_v46, 0.0  ;;  %v5733_v10 = vpop.permute.xlu1 %5732 }
 0x66b   :  { %v5860_v20 = vadd.f32 %v5812_v41, %v5383_v18  ;;  %v5907_v7 = vmax.f32 %v5859_v30, 0.0  ;;  %v5738_v30 = vpop.permute.xlu0 %5737 }
 0x66c   :  { %v5910_v11 = vmax.f32 %v5862_v49, 0.0 }
 0x66d   :  { %v5908_v22 = vmax.f32 %v5860_v20, 0.0 }
 0x66e   :  { %v5948_v1 = vpack.c.bf16 %v5910_v11, %v5909_v55  ;;  %v5743_v49 = vpop.permute.xlu1 %5742  ;;  %v9765_v55 = vld [vmem:[#allocation48_spill] sm:$0xff] }
 0x66f   :  { %v5947_v2 = vpack.c.bf16 %v5908_v22, %v5907_v7  ;;  %v7366_v32 = vpop.f32.mrb[100].mxu1  ;;  %v5823_v11 = vmul.f32 %v9456_v16, %v9765_v55  ;;  %v9766_v7 = vld [vmem:[#allocation49_spill] sm:$0xff]  ;;  %v5748_v34 = vpop.permute.xlu0 %5747 }
 0x670   :  { %v5865_v25 = vadd.f32 %v7366_v32, %v5817_v48  ;;  %v5396_v50 = vpop.f32.mrb[101].mxu1  ;;  %v5826_v61 = vmul.f32 %v9766_v7, %v5713_v24 }
 0x671   :  { %v5863_v15 = vadd.f32 %v5815_v8, %v5396_v50  ;;  %v7367_v62 = vpop.f32.mrb[102].mxu1  ;;  %7424 = vmatprep.mubr.bf16.mxu0 %v5947_v2  ;;  %v9767_v2 = vld [vmem:[#allocation50_spill] sm:$0xff] }
 0x672   :  { %v5866_v54 = vadd.f32 %v7367_v62, %v5818_v35  ;;  %v5399_v13 = vpop.f32.mrb[103].mxu1  ;;  %7425 = vmatmul.mubr.bf16.gmra.mrb[144].mxu0 %v5948_v1  ;;  %v5913_v39 = vmax.f32 %v5865_v25, 0.0  ;;  %v5824_v32 = vmul.f32 %v9460_v63, %v9767_v2  ;;  %v5753_v50 = vpop.permute.xlu1 %5752  ;;  %v9768_v62 = vld [vmem:[#allocation51_spill] sm:$0xff] }
 0x673   :  { %v5864_v43 = vadd.f32 %v5816_v44, %v5399_v13  ;;  %v5911_v29 = vmax.f32 %v5863_v15, 0.0  ;;  %v5829_v24 = vmul.f32 %v9768_v62, %v5728_v12  ;;  %v9769_v13 = vld [vmem:[#allocation52_spill] sm:$0xff] }
 0x674   :  { %v5914_v3 = vmax.f32 %v5866_v54, 0.0 }
 0x675   :  { %v5912_v42 = vmax.f32 %v5864_v43, 0.0  ;;  %v5827_v43 = vmul.f32 %v9474_v60, %v9769_v13 }
 0x676   :  { %v5950_v58 = vpack.c.bf16 %v5914_v3, %v5913_v39  ;;  %v9770_v39 = vld [vmem:[#allocation53_spill] sm:$0xff]  ;;  %v5763_v12 = vpop.permute.xlu1 %5762 }
 0x677   :  { %v5949_v47 = vpack.c.bf16 %v5912_v42, %v5911_v29  ;;  %v7370_v26 = vpop.f32.mrb[104].mxu1  ;;  %v5830_v63 = vmul.f32 %v9770_v39, %v5733_v10  ;;  %v5758_v42 = vpop.permute.xlu0 %5757 }
 0x678   :  { %v5869_v57 = vadd.f32 %v7370_v26, %v5821_v5  ;;  %v5412_v37 = vpop.f32.mrb[105].mxu1 }
 0x679   :  { %v5867_v27 = vadd.f32 %v5819_v59, %v5412_v37  ;;  %v7371_v52 = vpop.f32.mrb[106].mxu1  ;;  %7428 = vmatprep.mubr.bf16.mxu0 %v5949_v47  ;;  %v9772_v37 = vld [vmem:[#allocation55_spill] sm:$0xff] }
 0x67a   :  { %v5870_v53 = vadd.f32 %v7371_v52, %v5822_v9  ;;  %v5415_v45 = vpop.f32.mrb[107].mxu1  ;;  %7429 = vmatmul.mubr.bf16.gmra.mrb[148].mxu0 %v5950_v58  ;;  %v5917_v46 = vmax.f32 %v5869_v57, 0.0  ;;  %v9771_v58 = vld [vmem:[#allocation54_spill] sm:$0xff]  ;;  %v5833_v10 = vmul.f32 %v9772_v37, %v5748_v34 }
 0x67b   :  { %v5868_v6 = vadd.f32 %v5820_v33, %v5415_v45  ;;  %v5915_v23 = vmax.f32 %v5867_v27, 0.0  ;;  %v5828_v47 = vmul.f32 %v9478_v4, %v9771_v58  ;;  %v5768_v52 = vpop.permute.xlu0 %5767 }
 0x67c   :  { %v5918_v31 = vmax.f32 %v5870_v53, 0.0  ;;  %v9773_v53 = vld [vmem:[#allocation56_spill] sm:$0xff] }
 0x67d   :  { %v5916_v19 = vmax.f32 %v5868_v6, 0.0  ;;  %v5831_v45 = vmul.f32 %v5738_v30, %v9773_v53  ;;  %v9774_v6 = vld [vmem:[#allocation57_spill] sm:$0xff]  ;;  %v9776_v30 = vld [vmem:[#allocation59_spill] sm:$0xff] }
 0x67e   :  { %v5952_v41 = vpack.c.bf16 %v5918_v31, %v5917_v46  ;;  %v5834_v46 = vmul.f32 %v9774_v6, %v5753_v50 }
 0x67f   :  { %v5951_v18 = vpack.c.bf16 %v5916_v19, %v5915_v23  ;;  %v7374_v20 = vpop.f32.mrb[108].mxu1  ;;  %v5773_v23 = vpop.permute.xlu1 %5772 }
 0x680   :  { %v5873_v22 = vadd.f32 %v7374_v20, %v5825_v28  ;;  %v5428_v21 = vpop.f32.mrb[109].mxu1  ;;  %v9775_v28 = vld [vmem:[#allocation58_spill] sm:$0xff] }
 0x681   :  { %v5871_v48 = vadd.f32 %v5823_v11, %v5428_v21  ;;  %v7375_v1 = vpop.f32.mrb[110].mxu1  ;;  %7432 = vmatprep.mubr.bf16.mxu0 %v5951_v18 }
 0x682   :  { %v5874_v56 = vadd.f32 %v7375_v1, %v5826_v61  ;;  %v5431_v8 = vpop.f32.mrb[111].mxu1  ;;  %7433 = vmatmul.mubr.bf16.gmra.mrb[152].mxu0 %v5952_v41  ;;  %v5921_v35 = vmax.f32 %v5873_v22, 0.0  ;;  %v5832_v41 = vmul.f32 %v5743_v49, %v9775_v28  ;;  %v5778_v61 = vpop.permute.xlu0 %5777 }
 0x683   :  { %v5872_v51 = vadd.f32 %v5824_v32, %v5431_v8  ;;  %v5919_v15 = vmax.f32 %v5871_v48, 0.0  ;;  %v5837_v48 = vmul.f32 %v9776_v30, %v5768_v52  ;;  %v5783_v2 = vpop.permute.xlu1 %5782  ;;  %v9777_v8 = vld [vmem:[#allocation60_spill] sm:$0xff] }
 0x684   :  { %v5922_v25 = vmax.f32 %v5874_v56, 0.0  ;;  %v5835_v34 = vmul.f32 %v5758_v42, %v9777_v8 }
 0x685   :  { %v5920_v16 = vmax.f32 %v5872_v51, 0.0  ;;  %v9778_v51 = vld [vmem:[#allocation61_spill] sm:$0xff] }
 0x686   :  { %v5954_v0 = vpack.c.bf16 %v5922_v25, %v5921_v35  ;;  %v5838_v35 = vmul.f32 %v9778_v51, %v5773_v23 }
 0x687   :  { %v5953_v44 = vpack.c.bf16 %v5920_v16, %v5919_v15  ;;  %v7378_v54 = vpop.f32.mrb[112].mxu1  ;;  %v9779_v16 = vld [vmem:[#allocation62_spill] sm:$0xff]  ;;  %v5793_v39 = vpop.permute.xlu1 %5792 }
 0x688   :  { %v5877_v3 = vadd.f32 %v7378_v54, %v5829_v24  ;;  %v5444_v29 = vpop.f32.mrb[113].mxu1  ;;  %v5836_v62 = vmul.f32 %v5763_v12, %v9779_v16 }
 0x689   :  { %v5875_v38 = vadd.f32 %v5827_v43, %v5444_v29  ;;  %v7379_v5 = vpop.f32.mrb[114].mxu1  ;;  %7436 = vmatprep.mubr.bf16.mxu0 %v5953_v44  ;;  %v5788_v44 = vpop.permute.xlu0 %5787  ;;  %v9780_v29 = vld [vmem:[#allocation63_spill] sm:$0xff] }
 0x68a   :  { %v5878_v26 = vadd.f32 %v7379_v5, %v5830_v63  ;;  %v5447_v14 = vpop.f32.mrb[115].mxu1  ;;  %7437 = vmatmul.mubr.bf16.gmra.mrb[156].mxu0 %v5954_v0  ;;  %v5925_v36 = vmax.f32 %v5877_v3, 0.0  ;;  %v5841_v42 = vmul.f32 %v9780_v29, %v5788_v44 }
 0x68b   :  { %v5876_v59 = vadd.f32 %v5828_v47, %v5447_v14  ;;  %v5923_v57 = vmax.f32 %v5875_v38, 0.0  ;;  %v9781_v47 = vld [vmem:[#allocation64_spill] sm:$0xff]  ;;  %v9782_v14 = vld [vmem:[#allocation65_spill] sm:$0xff] }
 0x68c   :  { %v5926_v9 = vmax.f32 %v5878_v26, 0.0  ;;  %v5839_v26 = vmul.f32 %v5778_v61, %v9781_v47 }
 0x68d   :  { %v5924_v60 = vmax.f32 %v5876_v59, 0.0  ;;  %v5842_v59 = vmul.f32 %v9782_v14, %v5793_v39 }
 0x68e   :  { %v5956_v27 = vpack.c.bf16 %v5926_v9, %v5925_v36 }
 0x68f   :  { %v5955_v17 = vpack.c.bf16 %v5924_v60, %v5923_v57  ;;  %v7382_v33 = vpop.f32.mrb[116].mxu1  ;;  %v9783_v60 = vld [vmem:[#allocation66_spill] sm:$0xff] }
 0x690   :  { %v5881_v4 = vadd.f32 %v7382_v33, %v5833_v10  ;;  %v5460_v31 = vpop.f32.mrb[117].mxu1  ;;  %v5840_v37 = vmul.f32 %v5783_v2, %v9783_v60 }
 0x691   :  { %v5879_v19 = vadd.f32 %v5831_v45, %v5460_v31  ;;  %v7383_v40 = vpop.f32.mrb[118].mxu1  ;;  %7440 = vmatprep.mubr.bf16.mxu0 %v5955_v17 }
 0x692   :  { %v5882_v18 = vadd.f32 %v7383_v40, %v5834_v46  ;;  %v5463_v20 = vpop.f32.mrb[119].mxu1  ;;  %7441 = vmatmul.mubr.bf16.gmra.mrb[160].mxu0 %v5956_v27  ;;  %v5929_v11 = vmax.f32 %v5881_v4, 0.0  ;;  %v9515_v4 = vld [vmem:[%s9586_s9] ss:$0 sm:$0xff]  ;;  %s8159_s9 = smov [#allocation13]  }
 0x693   :  { %v5880_v55 = vadd.f32 %v5832_v41, %v5463_v20  ;;  %v5927_v22 = vmax.f32 %v5879_v19, 0.0  ;;  %s6312_s8 = sshll.u32 %s8159_s9, 4  ;;  %s6313_s8 = int_to_ptr.vmem [resolvable:$true] %s6312_s8 }
 0x694   :  { %v5930_v7 = vmax.f32 %v5882_v18, 0.0  ;;  %s8116_s28 = scalar_lea.vmem %s6313_s8, 6144  ;;  %p8121_p7 = scmp.lt.s32.totalorder %s6313_s8, %s6313_s8 }
 0x695   :  { %v5928_v21 = vmax.f32 %v5880_v55, 0.0  ;;  %p8117_p6 = scmp.ne.s32.totalorder %s6313_s8, %s8116_s28  ;;  %p8122_p8 = scmp.lt.s32.totalorder %s8116_s28, %s8116_s28 }
 0x696   :  { %v5958_v1 = vpack.c.bf16 %v5930_v7, %v5929_v11 }
 0x697   :  { %v5957_v32 = vpack.c.bf16 %v5928_v21, %v5927_v22  ;;  %v7386_v56 = vpop.f32.mrb[120].mxu1  ;;  %p8123_p9 = por %p8122_p8, %p8121_p7 }
 0x698   :  { %v5885_v49 = vadd.f32 %v7386_v56, %v5837_v48  ;;  %v5476_v25 = vpop.f32.mrb[121].mxu1 }
 0x699   :  { %v5883_v50 = vadd.f32 %v5835_v34, %v5476_v25  ;;  %v7387_v15 = vpop.f32.mrb[122].mxu1  ;;  %7444 = vmatprep.mubr.bf16.mxu0 %v5957_v32  ;;  %p8124_p10 = pnand %p8123_p9, %p8117_p6 }
 0x69a   :  { %v5886_v24 = vadd.f32 %v7387_v15, %v5838_v35  ;;  %v5479_v0 = vpop.f32.mrb[123].mxu1  ;;  %7445 = vmatmul.mubr.bf16.gmra.mrb[164].mxu0 %v5958_v1  ;;  %v5933_v13 = vmax.f32 %v5885_v49, 0.0 }
 0x69b   :  { %v5884_v54 = vadd.f32 %v5836_v62, %v5479_v0  ;;  %v5931_v63 = vmax.f32 %v5883_v50, 0.0 }
 0x69c   :  { %v5934_v43 = vmax.f32 %v5886_v24, 0.0 }
 0x69d   :  { %v5932_v3 = vmax.f32 %v5884_v54, 0.0 }
 0x69e   :  { %v5960_v38 = vpack.c.bf16 %v5934_v43, %v5933_v13 }
 0x69f   :  { %v5959_v5 = vpack.c.bf16 %v5932_v3, %v5931_v63  ;;  %v7390_v58 = vpop.f32.mrb[124].mxu1 }
 0x6a0   :  { %v5889_v12 = vadd.f32 %v7390_v58, %v5841_v42  ;;  %v5492_v36 = vpop.f32.mrb[125].mxu1 }
 0x6a1   :  { %v5887_v9 = vadd.f32 %v5839_v26, %v5492_v36  ;;  %v7391_v57 = vpop.f32.mrb[126].mxu1  ;;  %7448 = vmatprep.mubr.bf16.mxu0 %v5959_v5 }
 0x6a2   :  { %v5890_v10 = vadd.f32 %v7391_v57, %v5842_v59  ;;  %v5495_v27 = vpop.f32.mrb[127].mxu1  ;;  %7449 = vmatmul.mubr.bf16.gmra.mrb[168].mxu0 %v5960_v38  ;;  %v5937_v17 = vmax.f32 %v5889_v12, 0.0 }
 0x6a3   :  { %v5888_v52 = vadd.f32 %v5840_v37, %v5495_v27  ;;  %v5935_v53 = vmax.f32 %v5887_v9, 0.0 }
 0x6a4   :  { %v5938_v33 = vmax.f32 %v5890_v10, 0.0 }
 0x6a5   :  { %v5936_v45 = vmax.f32 %v5888_v52, 0.0 }
 0x6a6   :  { %v5962_v6 = vpack.c.bf16 %v5938_v33, %v5937_v17 }
 0x6a7   :  { %v5961_v46 = vpack.c.bf16 %v5936_v45, %v5935_v53 }
 0x6a9   :  { %7452 = vmatprep.mubr.bf16.mxu0 %v5961_v46 }
 0x6aa   :  { %7453 = vmatmul.mubr.bf16.gmra.mrb[172].mxu0 %v5962_v6 }
 0x725   :  { %v7410_v31 = vpop.f32.mrb[128].mxu0 }
 0x726   :  { %v6077_v23 = vadd.f32 %v7410_v31, %v9515_v4  ;;  %v6068_v19 = vpop.f32.mrb[129].mxu0 }
 0x727   :  { %v6069_v40 = vadd.f32 %v9515_v4, %v6068_v19  ;;  %v7411_v28 = vpop.f32.mrb[130].mxu0 }
 0x728   :  { %6261 = vst [vmem:[#allocation13 + $0x10] sm:$0xff] %v6077_v23  ;;  %v6080_v41 = vadd.f32 %v7411_v28, %v9515_v4  ;;  %v6071_v18 = vpop.f32.mrb[131].mxu0 }
 0x729   :  { %6259 = vst [vmem:[#allocation13] sm:$0xff] %v6069_v40  ;;  %v6072_v20 = vadd.f32 %v9515_v4, %v6071_v18 }
 0x72a   :  { %6262 = vst [vmem:[#allocation13 + $0x18] sm:$0xff] %v6080_v41 }
 0x72b   :  { %6260 = vst [vmem:[#allocation13 + $0x8] sm:$0xff] %v6072_v20 }
 0x72d   :  { %v7414_v55 = vpop.f32.mrb[132].mxu0 }
 0x72e   :  { %v6093_v11 = vadd.f32 %v7414_v55, %v9515_v4  ;;  %v6084_v7 = vpop.f32.mrb[133].mxu0 }
 0x72f   :  { %v6085_v61 = vadd.f32 %v9515_v4, %v6084_v7  ;;  %v7415_v22 = vpop.f32.mrb[134].mxu0 }
 0x730   :  { %6265 = vst [vmem:[#allocation13 + $0x30] sm:$0xff] %v6093_v11  ;;  %v6096_v21 = vadd.f32 %v7415_v22, %v9515_v4  ;;  %v6087_v30 = vpop.f32.mrb[135].mxu0 }
 0x731   :  { %6263 = vst [vmem:[#allocation13 + $0x20] sm:$0xff] %v6085_v61  ;;  %v6088_v48 = vadd.f32 %v9515_v4, %v6087_v30 }
 0x732   :  { %6266 = vst [vmem:[#allocation13 + $0x38] sm:$0xff] %v6096_v21 }
 0x733   :  { %6264 = vst [vmem:[#allocation13 + $0x28] sm:$0xff] %v6088_v48 }
 0x735   :  { %v7418_v1 = vpop.f32.mrb[136].mxu0 }
 0x736   :  { %v6109_v2 = vadd.f32 %v7418_v1, %v9515_v4  ;;  %v6100_v32 = vpop.f32.mrb[137].mxu0 }
 0x737   :  { %v6101_v56 = vadd.f32 %v9515_v4, %v6100_v32  ;;  %v7419_v8 = vpop.f32.mrb[138].mxu0 }
 0x738   :  { %6269 = vst [vmem:[#allocation13 + $0x50] sm:$0xff] %v6109_v2  ;;  %v6112_v34 = vadd.f32 %v7419_v8, %v9515_v4  ;;  %v6103_v51 = vpop.f32.mrb[139].mxu0 }
 0x739   :  { %6267 = vst [vmem:[#allocation13 + $0x40] sm:$0xff] %v6101_v56  ;;  %v6104_v35 = vadd.f32 %v9515_v4, %v6103_v51 }
 0x73a   :  { %6270 = vst [vmem:[#allocation13 + $0x58] sm:$0xff] %v6112_v34 }
 0x73b   :  { %6268 = vst [vmem:[#allocation13 + $0x48] sm:$0xff] %v6104_v35 }
 0x73d   :  { %v7422_v49 = vpop.f32.mrb[140].mxu0 }
 0x73e   :  { %v6125_v25 = vadd.f32 %v7422_v49, %v9515_v4  ;;  %v6116_v50 = vpop.f32.mrb[141].mxu0 }
 0x73f   :  { %v6117_v15 = vadd.f32 %v9515_v4, %v6116_v50  ;;  %v7423_v16 = vpop.f32.mrb[142].mxu0 }
 0x740   :  { %6273 = vst [vmem:[#allocation13 + $0x70] sm:$0xff] %v6125_v25  ;;  %v6128_v62 = vadd.f32 %v7423_v16, %v9515_v4  ;;  %v6119_v24 = vpop.f32.mrb[143].mxu0 }
 0x741   :  { %6271 = vst [vmem:[#allocation13 + $0x60] sm:$0xff] %v6117_v15  ;;  %v6120_v0 = vadd.f32 %v9515_v4, %v6119_v24 }
 0x742   :  { %6274 = vst [vmem:[#allocation13 + $0x78] sm:$0xff] %v6128_v62 }
 0x743   :  { %6272 = vst [vmem:[#allocation13 + $0x68] sm:$0xff] %v6120_v0 }
 0x745   :  { %v7426_v44 = vpop.f32.mrb[144].mxu0 }
 0x746   :  { %v6141_v54 = vadd.f32 %v7426_v44, %v9515_v4  ;;  %v6132_v13 = vpop.f32.mrb[145].mxu0 }
 0x747   :  { %v6133_v43 = vadd.f32 %v9515_v4, %v6132_v13  ;;  %v7427_v39 = vpop.f32.mrb[146].mxu0 }
 0x748   :  { %6277 = vst [vmem:[#allocation13 + $0x90] sm:$0xff] %v6141_v54  ;;  %v6144_v63 = vadd.f32 %v7427_v39, %v9515_v4  ;;  %v6135_v3 = vpop.f32.mrb[147].mxu0 }
 0x749   :  { %6275 = vst [vmem:[#allocation13 + $0x80] sm:$0xff] %v6133_v43  ;;  %v6136_v29 = vadd.f32 %v9515_v4, %v6135_v3 }
 0x74a   :  { %6278 = vst [vmem:[#allocation13 + $0x98] sm:$0xff] %v6144_v63 }
 0x74b   :  { %6276 = vst [vmem:[#allocation13 + $0x88] sm:$0xff] %v6136_v29 }
 0x74d   :  { %v7430_v42 = vpop.f32.mrb[148].mxu0 }
 0x74e   :  { %v6157_v38 = vadd.f32 %v7430_v42, %v9515_v4  ;;  %v6148_v5 = vpop.f32.mrb[149].mxu0 }
 0x74f   :  { %v6149_v58 = vadd.f32 %v9515_v4, %v6148_v5  ;;  %v7431_v47 = vpop.f32.mrb[150].mxu0 }
 0x750   :  { %6281 = vst [vmem:[#allocation13 + $0xb0] sm:$0xff] %v6157_v38  ;;  %v6160_v26 = vadd.f32 %v7431_v47, %v9515_v4  ;;  %v6151_v14 = vpop.f32.mrb[151].mxu0 }
 0x751   :  { %6279 = vst [vmem:[#allocation13 + $0xa0] sm:$0xff] %v6149_v58  ;;  %v6152_v59 = vadd.f32 %v9515_v4, %v6151_v14 }
 0x752   :  { %6282 = vst [vmem:[#allocation13 + $0xb8] sm:$0xff] %v6160_v26 }
 0x753   :  { %6280 = vst [vmem:[#allocation13 + $0xa8] sm:$0xff] %v6152_v59 }
 0x755   :  { %v7434_v12 = vpop.f32.mrb[152].mxu0 }
 0x756   :  { %v6173_v36 = vadd.f32 %v7434_v12, %v9515_v4  ;;  %v6164_v9 = vpop.f32.mrb[153].mxu0 }
 0x757   :  { %v6165_v57 = vadd.f32 %v9515_v4, %v6164_v9  ;;  %v7435_v60 = vpop.f32.mrb[154].mxu0 }
 0x758   :  { %6285 = vst [vmem:[#allocation13 + $0xd0] sm:$0xff] %v6173_v36  ;;  %v6176_v37 = vadd.f32 %v7435_v60, %v9515_v4  ;;  %v6167_v10 = vpop.f32.mrb[155].mxu0 }
 0x759   :  { %6283 = vst [vmem:[#allocation13 + $0xc0] sm:$0xff] %v6165_v57  ;;  %v6168_v27 = vadd.f32 %v9515_v4, %v6167_v10 }
 0x75a   :  { %6286 = vst [vmem:[#allocation13 + $0xd8] sm:$0xff] %v6176_v37 }
 0x75b   :  { %6284 = vst [vmem:[#allocation13 + $0xc8] sm:$0xff] %v6168_v27 }
 0x75d   :  { %v7438_v52 = vpop.f32.mrb[156].mxu0 }
 0x75e   :  { %v6189_v17 = vadd.f32 %v7438_v52, %v9515_v4  ;;  %v6180_v33 = vpop.f32.mrb[157].mxu0 }
 0x75f   :  { %v6181_v53 = vadd.f32 %v9515_v4, %v6180_v33  ;;  %v7439_v45 = vpop.f32.mrb[158].mxu0 }
 0x760   :  { %6289 = vst [vmem:[#allocation13 + $0xf0] sm:$0xff] %v6189_v17  ;;  %v6192_v6 = vadd.f32 %v7439_v45, %v9515_v4  ;;  %v6183_v46 = vpop.f32.mrb[159].mxu0 }
 0x761   :  { %6287 = vst [vmem:[#allocation13 + $0xe0] sm:$0xff] %v6181_v53  ;;  %v6184_v31 = vadd.f32 %v9515_v4, %v6183_v46 }
 0x762   :  { %6290 = vst [vmem:[#allocation13 + $0xf8] sm:$0xff] %v6192_v6 }
 0x763   :  { %6288 = vst [vmem:[#allocation13 + $0xe8] sm:$0xff] %v6184_v31 }
 0x765   :  { %v7442_v23 = vpop.f32.mrb[160].mxu0 }
 0x766   :  { %v6205_v19 = vadd.f32 %v7442_v23, %v9515_v4  ;;  %v6196_v40 = vpop.f32.mrb[161].mxu0 }
 0x767   :  { %v6197_v28 = vadd.f32 %v9515_v4, %v6196_v40  ;;  %v7443_v41 = vpop.f32.mrb[162].mxu0 }
 0x768   :  { %6293 = vst [vmem:[#allocation13 + $0x110] sm:$0xff] %v6205_v19  ;;  %v6208_v18 = vadd.f32 %v7443_v41, %v9515_v4  ;;  %v6199_v20 = vpop.f32.mrb[163].mxu0 }
 0x769   :  { %6291 = vst [vmem:[#allocation13 + $0x100] sm:$0xff] %v6197_v28  ;;  %v6200_v55 = vadd.f32 %v9515_v4, %v6199_v20 }
 0x76a   :  { %6294 = vst [vmem:[#allocation13 + $0x118] sm:$0xff] %v6208_v18 }
 0x76b   :  { %6292 = vst [vmem:[#allocation13 + $0x108] sm:$0xff] %v6200_v55 }
 0x76d   :  { %v7446_v11 = vpop.f32.mrb[164].mxu0 }
 0x76e   :  { %v6221_v7 = vadd.f32 %v7446_v11, %v9515_v4  ;;  %v6212_v61 = vpop.f32.mrb[165].mxu0 }
 0x76f   :  { %v6213_v22 = vadd.f32 %v9515_v4, %v6212_v61  ;;  %v7447_v21 = vpop.f32.mrb[166].mxu0 }
 0x770   :  { %6297 = vst [vmem:[#allocation13 + $0x130] sm:$0xff] %v6221_v7  ;;  %v6224_v30 = vadd.f32 %v7447_v21, %v9515_v4  ;;  %v6215_v48 = vpop.f32.mrb[167].mxu0 }
 0x771   :  { %6295 = vst [vmem:[#allocation13 + $0x120] sm:$0xff] %v6213_v22  ;;  %v6216_v1 = vadd.f32 %v9515_v4, %v6215_v48 }
 0x772   :  { %6298 = vst [vmem:[#allocation13 + $0x138] sm:$0xff] %v6224_v30 }
 0x773   :  { %6296 = vst [vmem:[#allocation13 + $0x128] sm:$0xff] %v6216_v1 }
 0x775   :  { %v7450_v2 = vpop.f32.mrb[168].mxu0 }
 0x776   :  { %v6237_v32 = vadd.f32 %v7450_v2, %v9515_v4  ;;  %v6228_v56 = vpop.f32.mrb[169].mxu0 }
 0x777   :  { %v6229_v8 = vadd.f32 %v9515_v4, %v6228_v56  ;;  %v7451_v34 = vpop.f32.mrb[170].mxu0 }
 0x778   :  { %6301 = vst [vmem:[#allocation13 + $0x150] sm:$0xff] %v6237_v32  ;;  %v6240_v51 = vadd.f32 %v7451_v34, %v9515_v4  ;;  %v6231_v35 = vpop.f32.mrb[171].mxu0 }
 0x779   :  { %6299 = vst [vmem:[#allocation13 + $0x140] sm:$0xff] %v6229_v8  ;;  %v6232_v49 = vadd.f32 %v9515_v4, %v6231_v35 }
 0x77a   :  { %6302 = vst [vmem:[#allocation13 + $0x158] sm:$0xff] %v6240_v51 }
 0x77b   :  { %6300 = vst [vmem:[#allocation13 + $0x148] sm:$0xff] %v6232_v49 }
 0x77d   :  { %v7454_v25 = vpop.f32.mrb[172].mxu0 }
 0x77e   :  { %v6253_v50 = vadd.f32 %v7454_v25, %v9515_v4  ;;  %v6244_v15 = vpop.f32.mrb[173].mxu0 }
 0x77f   :  { %v6245_v16 = vadd.f32 %v9515_v4, %v6244_v15  ;;  %v7455_v62 = vpop.f32.mrb[174].mxu0 }
 0x780   :  { %6305 = vst [vmem:[#allocation13 + $0x170] sm:$0xff] %v6253_v50  ;;  %v6256_v24 = vadd.f32 %v7455_v62, %v9515_v4  ;;  %v6247_v0 = vpop.f32.mrb[175].mxu0 }
 0x781   :  { %6303 = vst [vmem:[#allocation13 + $0x160] sm:$0xff] %v6245_v16  ;;  %v6248_v44 = vadd.f32 %v9515_v4, %v6247_v0 }
 0x782   :  { %6306 = vst [vmem:[#allocation13 + $0x178] sm:$0xff] %v6256_v24 }
 0x783   :  { %6304 = vst [vmem:[#allocation13 + $0x168] sm:$0xff] %v6248_v44 }
 0x784   :  { %8127 = shalt.err (!%p8124_p10)
}
 0x785   :  { %s8128_s11 = scalar_lea.hbm %s9587_s10, 6144 }
 0x786   :  { %p8129_p11 = scmp.ne.s32.totalorder %s9587_s10, %s8128_s11  ;;  %p8132_p12 = scmp.lt.u32.totalorder %s8128_s11, %s9587_s10 }
 0x788   :  { %p8134_p13 = pnand %p8132_p12, %p8129_p11 }
 0x78a   :  { %8137 = shalt.err (!%p8134_p13)
}
 0x78b   :  { %s8160_s25 = smov 128   ;;  %s8161_s26 = smov 8  }
 0x78c   :  { %6318 = dma.vmem_to_hbm [thread:$0]  %s6313_s8, 6144, %s9587_s10, [#allocation4], %s8160_s25, %s8160_s25, %s8161_s26  }
 0x78d   :  { %8146 = dma.done.wait [#allocation4], 6144  }
 0x78e   :  { %8147 = vsyncadd [#allocation4], 4294961152 }
 0x78f   :  { %6322 = vsyncpa [#allocation3], 1 }
 0x790   :  { %6323 = vsyncpa [#allocation6], 1 }
 0x791   :  { %6324 = vsyncpa [#allocation9], 1 }
 0x792   :  { %6325 = vsyncpa [#allocation12], 1 }
 0x793   :  { %6326 = vsyncpa [#allocation4], 1 }

</bundles_post_ra>
